<compile_context>
chip_gen: v6e
topology: v6e:2x2x1
jax: 0.10.0
libtpu: 0.0.40
codegen_flags: <defaults>
</compile_context>

<pallas_src>
import functools

import jax
import jax.numpy as jnp
from jax.experimental import pallas as pl
from jax.experimental.pallas import tpu as pltpu


def _round_up(x, n):
    return (x + n - 1) // n * n


def _gate_dnm_kernel(x_ref, h_ref, eye_x_ref, eye_h_ref, w_ref, q_ref,
                     k_ref, qs_ref, out_ref, *, in_size, hid, M, O_pad,
                     active_func):
    # x_ref   : [TB, in_size]   native layout (batch on sublanes)
    # h_ref   : [TB, hid]       native layout
    # eye_x   : [in_pad, in_size]  identity (rows >= in_size are zero)
    # eye_h   : [hid_pad, hid]     identity
    # w_ref   : [M*O_pad, D]    dendrite j = m*O_pad + o on sublanes, d on lanes
    # q_ref   : [M*O_pad, D]
    # k_ref, qs_ref : SMEM scalars, shape (1,)
    # out_ref : [O_pad, TB]     lane-dense output, batch on lanes
    f32 = jnp.float32

    # Fused layout prep: one tiny identity matmul per activation turns the
    # native [TB, feat] block into [feat, TB] (batch on lanes).  The MXU is
    # otherwise idle in this kernel, so this is essentially free and removes
    # every wrapper-side HBM round trip over the activations.
    x_t = jax.lax.dot_general(
        eye_x_ref[...], x_ref[...].astype(f32),
        dimension_numbers=(((1,), (1,)), ((), ())),
        preferred_element_type=f32)                       # [in_pad, TB]
    h_t = jax.lax.dot_general(
        eye_h_ref[...], h_ref[...].astype(f32),
        dimension_numbers=(((1,), (1,)), ((), ())),
        preferred_element_type=f32)                       # [hid_pad, TB]

    def feat_row(d):
        # xh = cat([x, h_pre], 1): the concat is resolved at trace time.
        if d < in_size:
            return x_t[d:d + 1, :]
        return h_t[d - in_size:d - in_size + 1, :]

    # EUP-minimal sigmoid product:
    #   prod_d sigmoid(z_d) == 1 / prod_d (1 + exp(-z_d))
    # -> exactly one EUP transcendental (exp) per (j, b, d) element, plus one
    # reciprocal per (j, b) after the loop.
    # Overflow note: if the product hits +inf (many strongly negative z_d) the
    # reciprocal returns 0, which matches the underflowed sigmoid product to
    # far below f32 resolution, so no clamping is needed for the forward pass.
    D = in_size + hid
    acc = None
    for d in range(D):                          # small, static -> fully unrolled
        xr = feat_row(d)                        # [1, TB]   (sublane broadcast)
        wc = w_ref[:, d:d + 1]                  # [OMp, 1]  (lane broadcast)
        qc = q_ref[:, d:d + 1]
        t = jnp.exp(qc - wc * xr)               # exp(-z_d): the single EUP op
        acc = (1.0 + t) if acc is None else acc * (1.0 + t)
    sig_prod = pl.reciprocal(acc, approx=False)  # [OMp, TB]

    # Sum over the M dendrites: sublane-aligned static slices, pure VPU adds.
    y = sig_prod[0:O_pad, :]
    for m in range(1, M):
        y = y + sig_prod[m * O_pad:(m + 1) * O_pad, :]

    # Fused affine + activation epilogue (activation runs on the EUP slot).
    k = k_ref[0]
    qs = qs_ref[0]
    out_ref[...] = active_func(k * (y - qs)).astype(out_ref.dtype)


def prepare_gate_dnm_params(W, Q, k, qs):
    """One-time repack of DNM_Linear_M parameters into the kernel layout.

    Call once at init (parameter-only work); reuse the result every forward.
    For Gate_DNM, W has shape [hidden_dim, M, input_size + hidden_dim].
    """
    O, M, D = W.shape
    hid = O
    in_size = D - O
    O_pad = _round_up(O, 8)

    # j = m*O_pad + o on the leading (sublane) axis; feature d on lanes
    # (full-dim lane blocks, so no feature padding is needed).  Padded output
    # rows (o >= O) stay in their own sublanes and are sliced off afterwards,
    # so their values never matter; use zeros.
    Wp = jnp.zeros((O_pad, M, D), jnp.float32).at[:O].set(W.astype(jnp.float32))
    Qp = jnp.zeros((O_pad, M, D), jnp.float32).at[:O].set(Q.astype(jnp.float32))
    w2 = jnp.transpose(Wp, (1, 0, 2)).reshape(M * O_pad, D)
    q2 = jnp.transpose(Qp, (1, 0, 2)).reshape(M * O_pad, D)

    # Identity matrices used by the in-kernel MXU transposes (rows padded to a
    # sublane multiple; extra rows are zero and unused).
    in_pad = _round_up(max(in_size, 1), 8)
    hid_pad = _round_up(max(hid, 1), 8)
    eye_x = jnp.eye(in_pad, in_size, dtype=jnp.float32)
    eye_h = jnp.eye(hid_pad, hid, dtype=jnp.float32)

    return {
        "w2": w2, "q2": q2, "eye_x": eye_x, "eye_h": eye_h,
        "k": jnp.asarray(k, jnp.float32).reshape(1),
        "qs": jnp.asarray(qs, jnp.float32).reshape(1),
        "O": O, "M": M, "D": D, "in_size": in_size, "hid": hid, "O_pad": O_pad,
    }


def _pick_tb(B, tb_max=256):
    """Lane-dense batch tile: multiple of 128, capped for f32 vreg pressure,
    and sized so the grid has >= 2 steps when B > 128 (both v7x TCs busy)."""
    B128 = _round_up(max(B, 1), 128)
    if B128 <= 128:
        return 128
    return max(128, min(tb_max, _round_up(B128 // 2, 128)))


def gate_dnm_forward(x, h_pre, params, active_func, *, tb=None):
    """Gate_DNM.forward: active_func(k * (DNM_Linear_M(cat([x, h_pre], 1)) - qs)).

    active_func must be a JAX-traceable elementwise fn (e.g. jnp.tanh,
    jax.nn.sigmoid); it is baked into the kernel at trace time.
    """
    B, in_size = x.shape
    hid = h_pre.shape[1]
    assert in_size == params["in_size"] and hid == params["hid"]
    M, O, O_pad, D = params["M"], params["O"], params["O_pad"], params["D"]
    w2, q2 = params["w2"], params["q2"]
    OMp = w2.shape[0]
    in_pad = params["eye_x"].shape[0]
    hid_pad = params["eye_h"].shape[0]

    if tb is None:
        tb = _pick_tb(B)
    n_blocks = pl.cdiv(B, tb)
    B_pad = n_blocks * tb   # lane-dense output; extra lanes are junk, sliced off

    out = pl.pallas_call(
        functools.partial(_gate_dnm_kernel, in_size=in_size, hid=hid, M=M,
                          O_pad=O_pad, active_func=active_func),
        out_shape=jax.ShapeDtypeStruct((O_pad, B_pad), jnp.float32),
        grid=(n_blocks,),
        in_specs=[
            pl.BlockSpec((tb, in_size), lambda b: (b, 0)),       # x  (native layout)
            pl.BlockSpec((tb, hid), lambda b: (b, 0)),           # h_pre (native layout)
            pl.BlockSpec((in_pad, in_size), lambda b: (0, 0)),   # identity for x transpose
            pl.BlockSpec((hid_pad, hid), lambda b: (0, 0)),      # identity for h transpose
            pl.BlockSpec((OMp, D), lambda b: (0, 0)),            # W  (grid-invariant)
            pl.BlockSpec((OMp, D), lambda b: (0, 0)),            # q  (grid-invariant)
            pl.BlockSpec(memory_space=pltpu.MemorySpace.SMEM),   # k
            pl.BlockSpec(memory_space=pltpu.MemorySpace.SMEM),   # qs
        ],
        out_specs=pl.BlockSpec((O_pad, tb), lambda b: (0, b)),
        compiler_params=pltpu.CompilerParams(
            dimension_semantics=("parallel",)),
    )(x, h_pre, params["eye_x"], params["eye_h"], w2, q2,
      params["k"], params["qs"])

    return out[:O, :B].T                                         # [B, O]


def ref_forward(x, h_pre, W, Q, k, qs, active_func):
    """Pure-JAX reference mirroring the PyTorch code."""
    xh = jnp.concatenate([x, h_pre], axis=1)                     # [B, D]
    z = xh[:, None, None, :] * W[None] - Q[None]                 # [B, O, M, D]
    s = jax.nn.sigmoid(z)
    p = jnp.prod(s, axis=3)                                      # [B, O, M]
    y = jnp.sum(p, axis=2)                                       # [B, O]
    return active_func(k[0] * (y - qs[0]))


if __name__ == "__main__":
    input_size, hidden_dim, M, B = 24, 8, 5, 2
    D = input_size + hidden_dim          # 32
    O = hidden_dim                       # 8

    key = jax.random.PRNGKey(0)
    kW, kk, kqs, kx, kh = jax.random.split(key, 5)

    # Parameters (matching DNM_Linear_M.__init__ shapes / init):
    W = jax.random.uniform(kW, (O, M, D), dtype=jnp.float32)        # torch.rand
    Q = jnp.full((O, M, D), 0.1, dtype=jnp.float32)                 # constant_(0.1)
    k_param = jax.random.uniform(kk, (1,), dtype=jnp.float32)       # torch.rand(1)
    qs_param = jax.random.uniform(kqs, (1,), dtype=jnp.float32)     # torch.rand(1)

    # Inputs
    x = jax.random.normal(kx, (B, input_size), dtype=jnp.float32)
    h_pre = jax.random.normal(kh, (B, hidden_dim), dtype=jnp.float32)

    active = jnp.tanh

    # One-time parameter repack (hoisted out of the forward pass).
    params = prepare_gate_dnm_params(W, Q, k_param, qs_param)

    @jax.jit
    def fwd(x, h_pre):
        return gate_dnm_forward(x, h_pre, params, active)

    out = jax.block_until_ready(fwd(x, h_pre))

    ref = ref_forward(x, h_pre, W, Q, k_param, qs_param, active)
    assert out.shape == (B, hidden_dim), out.shape
    assert jnp.allclose(out, ref, rtol=1e-4, atol=1e-5), (out, ref)

    print("KERNEL_OK")
</pallas_src>

<mosaic_0001>
module attributes {stable_mosaic.version = 11 : i64} {
  func.func @_gate_dnm_kernel(%arg0: i32, %arg1: memref<128x24xf32, #tpu.memory_space<vmem>>, %arg2: memref<128x8xf32, #tpu.memory_space<vmem>>, %arg3: memref<24x24xf32, #tpu.memory_space<vmem>>, %arg4: memref<8x8xf32, #tpu.memory_space<vmem>>, %arg5: memref<40x32xf32, #tpu.memory_space<vmem>>, %arg6: memref<40x32xf32, #tpu.memory_space<vmem>>, %arg7: memref<1xf32, #tpu.memory_space<smem>>, %arg8: memref<1xf32, #tpu.memory_space<smem>>, %arg9: memref<8x128xf32, #tpu.memory_space<vmem>>) attributes {dimension_semantics = [#tpu.dimension_semantics<parallel>], iteration_bounds = array<i64: 1>, scalar_prefetch = 0 : i64, scratch_operands = 0 : i64, tpu.core_type = #tpu.core_type<tc>, window_params = [{transform_indices = @transform_0, window_bounds = array<i64: 128, 24>}, {transform_indices = @transform_1, window_bounds = array<i64: 128, 8>}, {pipeline_mode = #tpu.pipeline_mode<synchronous>, transform_indices = @transform_2, window_bounds = array<i64: 24, 24>}, {pipeline_mode = #tpu.pipeline_mode<synchronous>, transform_indices = @transform_3, window_bounds = array<i64: 8, 8>}, {pipeline_mode = #tpu.pipeline_mode<synchronous>, transform_indices = @transform_4, window_bounds = array<i64: 40, 32>}, {pipeline_mode = #tpu.pipeline_mode<synchronous>, transform_indices = @transform_5, window_bounds = array<i64: 40, 32>}, {transform_indices = @transform_6, window_bounds = array<i64: 1>}, {transform_indices = @transform_7, window_bounds = array<i64: 1>}, {transform_indices = @transform_8, window_bounds = array<i64: 8, 128>}]} {
    %c0 = arith.constant 0 : index
    %c0_0 = arith.constant 0 : index
    %0 = vector.load %arg3[%c0, %c0_0] : memref<24x24xf32, #tpu.memory_space<vmem>>, vector<24x24xf32>
    %c0_1 = arith.constant 0 : index
    %c0_2 = arith.constant 0 : index
    %1 = vector.load %arg1[%c0_1, %c0_2] : memref<128x24xf32, #tpu.memory_space<vmem>>, vector<128x24xf32>
    %cst = arith.constant dense<0.000000e+00> : vector<24x128xf32>
    %2 = tpu.matmul %0, %1, %cst {dimension_numbers = #tpu.dot_dimension_numbers<[1], [1], [0], [0], [0, 0, 1, 0], [], []>} : vector<24x24xf32>, vector<128x24xf32>, vector<24x128xf32> -> vector<24x128xf32>
    %c0_3 = arith.constant 0 : index
    %c0_4 = arith.constant 0 : index
    %3 = vector.load %arg4[%c0_3, %c0_4] : memref<8x8xf32, #tpu.memory_space<vmem>>, vector<8x8xf32>
    %c0_5 = arith.constant 0 : index
    %c0_6 = arith.constant 0 : index
    %4 = vector.load %arg2[%c0_5, %c0_6] : memref<128x8xf32, #tpu.memory_space<vmem>>, vector<128x8xf32>
    %cst_7 = arith.constant dense<0.000000e+00> : vector<8x128xf32>
    %5 = tpu.matmul %3, %4, %cst_7 {dimension_numbers = #tpu.dot_dimension_numbers<[1], [1], [0], [0], [0, 0, 1, 0], [], []>} : vector<8x8xf32>, vector<128x8xf32>, vector<8x128xf32> -> vector<8x128xf32>
    %6 = vector.extract_strided_slice %2 {offsets = [0, 0], sizes = [1, 128], strides = [1, 1]} : vector<24x128xf32> to vector<1x128xf32>
    %c0_8 = arith.constant 0 : index
    %c0_9 = arith.constant 0 : index
    %7 = vector.load %arg5[%c0_8, %c0_9] : memref<40x32xf32, #tpu.memory_space<vmem>>, vector<40x1xf32>
    %c0_10 = arith.constant 0 : index
    %c0_11 = arith.constant 0 : index
    %8 = vector.load %arg6[%c0_10, %c0_11] : memref<40x32xf32, #tpu.memory_space<vmem>>, vector<40x1xf32>
    %9 = vector.broadcast %7 : vector<40x1xf32> to vector<40x128xf32>
    %10 = vector.broadcast %6 : vector<1x128xf32> to vector<40x128xf32>
    %11 = arith.mulf %9, %10 : vector<40x128xf32>
    %12 = vector.broadcast %8 : vector<40x1xf32> to vector<40x128xf32>
    %13 = arith.subf %12, %11 : vector<40x128xf32>
    %14 = math.exp %13 : vector<40x128xf32>
    %cst_12 = arith.constant 1.000000e+00 : f32
    %15 = vector.broadcast %cst_12 : f32 to vector<40x128xf32>
    %16 = arith.addf %15, %14 : vector<40x128xf32>
    %17 = vector.extract_strided_slice %2 {offsets = [1, 0], sizes = [1, 128], strides = [1, 1]} : vector<24x128xf32> to vector<1x128xf32>
    %c0_13 = arith.constant 0 : index
    %c1 = arith.constant 1 : index
    %18 = vector.load %arg5[%c0_13, %c1] : memref<40x32xf32, #tpu.memory_space<vmem>>, vector<40x1xf32>
    %c0_14 = arith.constant 0 : index
    %c1_15 = arith.constant 1 : index
    %19 = vector.load %arg6[%c0_14, %c1_15] : memref<40x32xf32, #tpu.memory_space<vmem>>, vector<40x1xf32>
    %20 = vector.broadcast %18 : vector<40x1xf32> to vector<40x128xf32>
    %21 = vector.broadcast %17 : vector<1x128xf32> to vector<40x128xf32>
    %22 = arith.mulf %20, %21 : vector<40x128xf32>
    %23 = vector.broadcast %19 : vector<40x1xf32> to vector<40x128xf32>
    %24 = arith.subf %23, %22 : vector<40x128xf32>
    %25 = math.exp %24 : vector<40x128xf32>
    %cst_16 = arith.constant 1.000000e+00 : f32
    %26 = vector.broadcast %cst_16 : f32 to vector<40x128xf32>
    %27 = arith.addf %26, %25 : vector<40x128xf32>
    %28 = arith.mulf %16, %27 : vector<40x128xf32>
    %29 = vector.extract_strided_slice %2 {offsets = [2, 0], sizes = [1, 128], strides = [1, 1]} : vector<24x128xf32> to vector<1x128xf32>
    %c0_17 = arith.constant 0 : index
    %c2 = arith.constant 2 : index
    %30 = vector.load %arg5[%c0_17, %c2] : memref<40x32xf32, #tpu.memory_space<vmem>>, vector<40x1xf32>
    %c0_18 = arith.constant 0 : index
    %c2_19 = arith.constant 2 : index
    %31 = vector.load %arg6[%c0_18, %c2_19] : memref<40x32xf32, #tpu.memory_space<vmem>>, vector<40x1xf32>
    %32 = vector.broadcast %30 : vector<40x1xf32> to vector<40x128xf32>
    %33 = vector.broadcast %29 : vector<1x128xf32> to vector<40x128xf32>
    %34 = arith.mulf %32, %33 : vector<40x128xf32>
    %35 = vector.broadcast %31 : vector<40x1xf32> to vector<40x128xf32>
    %36 = arith.subf %35, %34 : vector<40x128xf32>
    %37 = math.exp %36 : vector<40x128xf32>
    %cst_20 = arith.constant 1.000000e+00 : f32
    %38 = vector.broadcast %cst_20 : f32 to vector<40x128xf32>
    %39 = arith.addf %38, %37 : vector<40x128xf32>
    %40 = arith.mulf %28, %39 : vector<40x128xf32>
    %41 = vector.extract_strided_slice %2 {offsets = [3, 0], sizes = [1, 128], strides = [1, 1]} : vector<24x128xf32> to vector<1x128xf32>
    %c0_21 = arith.constant 0 : index
    %c3 = arith.constant 3 : index
    %42 = vector.load %arg5[%c0_21, %c3] : memref<40x32xf32, #tpu.memory_space<vmem>>, vector<40x1xf32>
    %c0_22 = arith.constant 0 : index
    %c3_23 = arith.constant 3 : index
    %43 = vector.load %arg6[%c0_22, %c3_23] : memref<40x32xf32, #tpu.memory_space<vmem>>, vector<40x1xf32>
    %44 = vector.broadcast %42 : vector<40x1xf32> to vector<40x128xf32>
    %45 = vector.broadcast %41 : vector<1x128xf32> to vector<40x128xf32>
    %46 = arith.mulf %44, %45 : vector<40x128xf32>
    %47 = vector.broadcast %43 : vector<40x1xf32> to vector<40x128xf32>
    %48 = arith.subf %47, %46 : vector<40x128xf32>
    %49 = math.exp %48 : vector<40x128xf32>
    %cst_24 = arith.constant 1.000000e+00 : f32
    %50 = vector.broadcast %cst_24 : f32 to vector<40x128xf32>
    %51 = arith.addf %50, %49 : vector<40x128xf32>
    %52 = arith.mulf %40, %51 : vector<40x128xf32>
    %53 = vector.extract_strided_slice %2 {offsets = [4, 0], sizes = [1, 128], strides = [1, 1]} : vector<24x128xf32> to vector<1x128xf32>
    %c0_25 = arith.constant 0 : index
    %c4 = arith.constant 4 : index
    %54 = vector.load %arg5[%c0_25, %c4] : memref<40x32xf32, #tpu.memory_space<vmem>>, vector<40x1xf32>
    %c0_26 = arith.constant 0 : index
    %c4_27 = arith.constant 4 : index
    %55 = vector.load %arg6[%c0_26, %c4_27] : memref<40x32xf32, #tpu.memory_space<vmem>>, vector<40x1xf32>
    %56 = vector.broadcast %54 : vector<40x1xf32> to vector<40x128xf32>
    %57 = vector.broadcast %53 : vector<1x128xf32> to vector<40x128xf32>
    %58 = arith.mulf %56, %57 : vector<40x128xf32>
    %59 = vector.broadcast %55 : vector<40x1xf32> to vector<40x128xf32>
    %60 = arith.subf %59, %58 : vector<40x128xf32>
    %61 = math.exp %60 : vector<40x128xf32>
    %cst_28 = arith.constant 1.000000e+00 : f32
    %62 = vector.broadcast %cst_28 : f32 to vector<40x128xf32>
    %63 = arith.addf %62, %61 : vector<40x128xf32>
    %64 = arith.mulf %52, %63 : vector<40x128xf32>
    %65 = vector.extract_strided_slice %2 {offsets = [5, 0], sizes = [1, 128], strides = [1, 1]} : vector<24x128xf32> to vector<1x128xf32>
    %c0_29 = arith.constant 0 : index
    %c5 = arith.constant 5 : index
    %66 = vector.load %arg5[%c0_29, %c5] : memref<40x32xf32, #tpu.memory_space<vmem>>, vector<40x1xf32>
    %c0_30 = arith.constant 0 : index
    %c5_31 = arith.constant 5 : index
    %67 = vector.load %arg6[%c0_30, %c5_31] : memref<40x32xf32, #tpu.memory_space<vmem>>, vector<40x1xf32>
    %68 = vector.broadcast %66 : vector<40x1xf32> to vector<40x128xf32>
    %69 = vector.broadcast %65 : vector<1x128xf32> to vector<40x128xf32>
    %70 = arith.mulf %68, %69 : vector<40x128xf32>
    %71 = vector.broadcast %67 : vector<40x1xf32> to vector<40x128xf32>
    %72 = arith.subf %71, %70 : vector<40x128xf32>
    %73 = math.exp %72 : vector<40x128xf32>
    %cst_32 = arith.constant 1.000000e+00 : f32
    %74 = vector.broadcast %cst_32 : f32 to vector<40x128xf32>
    %75 = arith.addf %74, %73 : vector<40x128xf32>
    %76 = arith.mulf %64, %75 : vector<40x128xf32>
    %77 = vector.extract_strided_slice %2 {offsets = [6, 0], sizes = [1, 128], strides = [1, 1]} : vector<24x128xf32> to vector<1x128xf32>
    %c0_33 = arith.constant 0 : index
    %c6 = arith.constant 6 : index
    %78 = vector.load %arg5[%c0_33, %c6] : memref<40x32xf32, #tpu.memory_space<vmem>>, vector<40x1xf32>
    %c0_34 = arith.constant 0 : index
    %c6_35 = arith.constant 6 : index
    %79 = vector.load %arg6[%c0_34, %c6_35] : memref<40x32xf32, #tpu.memory_space<vmem>>, vector<40x1xf32>
    %80 = vector.broadcast %78 : vector<40x1xf32> to vector<40x128xf32>
    %81 = vector.broadcast %77 : vector<1x128xf32> to vector<40x128xf32>
    %82 = arith.mulf %80, %81 : vector<40x128xf32>
    %83 = vector.broadcast %79 : vector<40x1xf32> to vector<40x128xf32>
    %84 = arith.subf %83, %82 : vector<40x128xf32>
    %85 = math.exp %84 : vector<40x128xf32>
    %cst_36 = arith.constant 1.000000e+00 : f32
    %86 = vector.broadcast %cst_36 : f32 to vector<40x128xf32>
    %87 = arith.addf %86, %85 : vector<40x128xf32>
    %88 = arith.mulf %76, %87 : vector<40x128xf32>
    %89 = vector.extract_strided_slice %2 {offsets = [7, 0], sizes = [1, 128], strides = [1, 1]} : vector<24x128xf32> to vector<1x128xf32>
    %c0_37 = arith.constant 0 : index
    %c7 = arith.constant 7 : index
    %90 = vector.load %arg5[%c0_37, %c7] : memref<40x32xf32, #tpu.memory_space<vmem>>, vector<40x1xf32>
    %c0_38 = arith.constant 0 : index
    %c7_39 = arith.constant 7 : index
    %91 = vector.load %arg6[%c0_38, %c7_39] : memref<40x32xf32, #tpu.memory_space<vmem>>, vector<40x1xf32>
    %92 = vector.broadcast %90 : vector<40x1xf32> to vector<40x128xf32>
    %93 = vector.broadcast %89 : vector<1x128xf32> to vector<40x128xf32>
    %94 = arith.mulf %92, %93 : vector<40x128xf32>
    %95 = vector.broadcast %91 : vector<40x1xf32> to vector<40x128xf32>
    %96 = arith.subf %95, %94 : vector<40x128xf32>
    %97 = math.exp %96 : vector<40x128xf32>
    %cst_40 = arith.constant 1.000000e+00 : f32
    %98 = vector.broadcast %cst_40 : f32 to vector<40x128xf32>
    %99 = arith.addf %98, %97 : vector<40x128xf32>
    %100 = arith.mulf %88, %99 : vector<40x128xf32>
    %101 = vector.extract_strided_slice %2 {offsets = [8, 0], sizes = [1, 128], strides = [1, 1]} : vector<24x128xf32> to vector<1x128xf32>
    %c0_41 = arith.constant 0 : index
    %c8 = arith.constant 8 : index
    %102 = vector.load %arg5[%c0_41, %c8] : memref<40x32xf32, #tpu.memory_space<vmem>>, vector<40x1xf32>
    %c0_42 = arith.constant 0 : index
    %c8_43 = arith.constant 8 : index
    %103 = vector.load %arg6[%c0_42, %c8_43] : memref<40x32xf32, #tpu.memory_space<vmem>>, vector<40x1xf32>
    %104 = vector.broadcast %102 : vector<40x1xf32> to vector<40x128xf32>
    %105 = vector.broadcast %101 : vector<1x128xf32> to vector<40x128xf32>
    %106 = arith.mulf %104, %105 : vector<40x128xf32>
    %107 = vector.broadcast %103 : vector<40x1xf32> to vector<40x128xf32>
    %108 = arith.subf %107, %106 : vector<40x128xf32>
    %109 = math.exp %108 : vector<40x128xf32>
    %cst_44 = arith.constant 1.000000e+00 : f32
    %110 = vector.broadcast %cst_44 : f32 to vector<40x128xf32>
    %111 = arith.addf %110, %109 : vector<40x128xf32>
    %112 = arith.mulf %100, %111 : vector<40x128xf32>
    %113 = vector.extract_strided_slice %2 {offsets = [9, 0], sizes = [1, 128], strides = [1, 1]} : vector<24x128xf32> to vector<1x128xf32>
    %c0_45 = arith.constant 0 : index
    %c9 = arith.constant 9 : index
    %114 = vector.load %arg5[%c0_45, %c9] : memref<40x32xf32, #tpu.memory_space<vmem>>, vector<40x1xf32>
    %c0_46 = arith.constant 0 : index
    %c9_47 = arith.constant 9 : index
    %115 = vector.load %arg6[%c0_46, %c9_47] : memref<40x32xf32, #tpu.memory_space<vmem>>, vector<40x1xf32>
    %116 = vector.broadcast %114 : vector<40x1xf32> to vector<40x128xf32>
    %117 = vector.broadcast %113 : vector<1x128xf32> to vector<40x128xf32>
    %118 = arith.mulf %116, %117 : vector<40x128xf32>
    %119 = vector.broadcast %115 : vector<40x1xf32> to vector<40x128xf32>
    %120 = arith.subf %119, %118 : vector<40x128xf32>
    %121 = math.exp %120 : vector<40x128xf32>
    %cst_48 = arith.constant 1.000000e+00 : f32
    %122 = vector.broadcast %cst_48 : f32 to vector<40x128xf32>
    %123 = arith.addf %122, %121 : vector<40x128xf32>
    %124 = arith.mulf %112, %123 : vector<40x128xf32>
    %125 = vector.extract_strided_slice %2 {offsets = [10, 0], sizes = [1, 128], strides = [1, 1]} : vector<24x128xf32> to vector<1x128xf32>
    %c0_49 = arith.constant 0 : index
    %c10 = arith.constant 10 : index
    %126 = vector.load %arg5[%c0_49, %c10] : memref<40x32xf32, #tpu.memory_space<vmem>>, vector<40x1xf32>
    %c0_50 = arith.constant 0 : index
    %c10_51 = arith.constant 10 : index
    %127 = vector.load %arg6[%c0_50, %c10_51] : memref<40x32xf32, #tpu.memory_space<vmem>>, vector<40x1xf32>
    %128 = vector.broadcast %126 : vector<40x1xf32> to vector<40x128xf32>
    %129 = vector.broadcast %125 : vector<1x128xf32> to vector<40x128xf32>
    %130 = arith.mulf %128, %129 : vector<40x128xf32>
    %131 = vector.broadcast %127 : vector<40x1xf32> to vector<40x128xf32>
    %132 = arith.subf %131, %130 : vector<40x128xf32>
    %133 = math.exp %132 : vector<40x128xf32>
    %cst_52 = arith.constant 1.000000e+00 : f32
    %134 = vector.broadcast %cst_52 : f32 to vector<40x128xf32>
    %135 = arith.addf %134, %133 : vector<40x128xf32>
    %136 = arith.mulf %124, %135 : vector<40x128xf32>
    %137 = vector.extract_strided_slice %2 {offsets = [11, 0], sizes = [1, 128], strides = [1, 1]} : vector<24x128xf32> to vector<1x128xf32>
    %c0_53 = arith.constant 0 : index
    %c11 = arith.constant 11 : index
    %138 = vector.load %arg5[%c0_53, %c11] : memref<40x32xf32, #tpu.memory_space<vmem>>, vector<40x1xf32>
    %c0_54 = arith.constant 0 : index
    %c11_55 = arith.constant 11 : index
    %139 = vector.load %arg6[%c0_54, %c11_55] : memref<40x32xf32, #tpu.memory_space<vmem>>, vector<40x1xf32>
    %140 = vector.broadcast %138 : vector<40x1xf32> to vector<40x128xf32>
    %141 = vector.broadcast %137 : vector<1x128xf32> to vector<40x128xf32>
    %142 = arith.mulf %140, %141 : vector<40x128xf32>
    %143 = vector.broadcast %139 : vector<40x1xf32> to vector<40x128xf32>
    %144 = arith.subf %143, %142 : vector<40x128xf32>
    %145 = math.exp %144 : vector<40x128xf32>
    %cst_56 = arith.constant 1.000000e+00 : f32
    %146 = vector.broadcast %cst_56 : f32 to vector<40x128xf32>
    %147 = arith.addf %146, %145 : vector<40x128xf32>
    %148 = arith.mulf %136, %147 : vector<40x128xf32>
    %149 = vector.extract_strided_slice %2 {offsets = [12, 0], sizes = [1, 128], strides = [1, 1]} : vector<24x128xf32> to vector<1x128xf32>
    %c0_57 = arith.constant 0 : index
    %c12 = arith.constant 12 : index
    %150 = vector.load %arg5[%c0_57, %c12] : memref<40x32xf32, #tpu.memory_space<vmem>>, vector<40x1xf32>
    %c0_58 = arith.constant 0 : index
    %c12_59 = arith.constant 12 : index
    %151 = vector.load %arg6[%c0_58, %c12_59] : memref<40x32xf32, #tpu.memory_space<vmem>>, vector<40x1xf32>
    %152 = vector.broadcast %150 : vector<40x1xf32> to vector<40x128xf32>
    %153 = vector.broadcast %149 : vector<1x128xf32> to vector<40x128xf32>
    %154 = arith.mulf %152, %153 : vector<40x128xf32>
    %155 = vector.broadcast %151 : vector<40x1xf32> to vector<40x128xf32>
    %156 = arith.subf %155, %154 : vector<40x128xf32>
    %157 = math.exp %156 : vector<40x128xf32>
    %cst_60 = arith.constant 1.000000e+00 : f32
    %158 = vector.broadcast %cst_60 : f32 to vector<40x128xf32>
    %159 = arith.addf %158, %157 : vector<40x128xf32>
    %160 = arith.mulf %148, %159 : vector<40x128xf32>
    %161 = vector.extract_strided_slice %2 {offsets = [13, 0], sizes = [1, 128], strides = [1, 1]} : vector<24x128xf32> to vector<1x128xf32>
    %c0_61 = arith.constant 0 : index
    %c13 = arith.constant 13 : index
    %162 = vector.load %arg5[%c0_61, %c13] : memref<40x32xf32, #tpu.memory_space<vmem>>, vector<40x1xf32>
    %c0_62 = arith.constant 0 : index
    %c13_63 = arith.constant 13 : index
    %163 = vector.load %arg6[%c0_62, %c13_63] : memref<40x32xf32, #tpu.memory_space<vmem>>, vector<40x1xf32>
    %164 = vector.broadcast %162 : vector<40x1xf32> to vector<40x128xf32>
    %165 = vector.broadcast %161 : vector<1x128xf32> to vector<40x128xf32>
    %166 = arith.mulf %164, %165 : vector<40x128xf32>
    %167 = vector.broadcast %163 : vector<40x1xf32> to vector<40x128xf32>
    %168 = arith.subf %167, %166 : vector<40x128xf32>
    %169 = math.exp %168 : vector<40x128xf32>
    %cst_64 = arith.constant 1.000000e+00 : f32
    %170 = vector.broadcast %cst_64 : f32 to vector<40x128xf32>
    %171 = arith.addf %170, %169 : vector<40x128xf32>
    %172 = arith.mulf %160, %171 : vector<40x128xf32>
    %173 = vector.extract_strided_slice %2 {offsets = [14, 0], sizes = [1, 128], strides = [1, 1]} : vector<24x128xf32> to vector<1x128xf32>
    %c0_65 = arith.constant 0 : index
    %c14 = arith.constant 14 : index
    %174 = vector.load %arg5[%c0_65, %c14] : memref<40x32xf32, #tpu.memory_space<vmem>>, vector<40x1xf32>
    %c0_66 = arith.constant 0 : index
    %c14_67 = arith.constant 14 : index
    %175 = vector.load %arg6[%c0_66, %c14_67] : memref<40x32xf32, #tpu.memory_space<vmem>>, vector<40x1xf32>
    %176 = vector.broadcast %174 : vector<40x1xf32> to vector<40x128xf32>
    %177 = vector.broadcast %173 : vector<1x128xf32> to vector<40x128xf32>
    %178 = arith.mulf %176, %177 : vector<40x128xf32>
    %179 = vector.broadcast %175 : vector<40x1xf32> to vector<40x128xf32>
    %180 = arith.subf %179, %178 : vector<40x128xf32>
    %181 = math.exp %180 : vector<40x128xf32>
    %cst_68 = arith.constant 1.000000e+00 : f32
    %182 = vector.broadcast %cst_68 : f32 to vector<40x128xf32>
    %183 = arith.addf %182, %181 : vector<40x128xf32>
    %184 = arith.mulf %172, %183 : vector<40x128xf32>
    %185 = vector.extract_strided_slice %2 {offsets = [15, 0], sizes = [1, 128], strides = [1, 1]} : vector<24x128xf32> to vector<1x128xf32>
    %c0_69 = arith.constant 0 : index
    %c15 = arith.constant 15 : index
    %186 = vector.load %arg5[%c0_69, %c15] : memref<40x32xf32, #tpu.memory_space<vmem>>, vector<40x1xf32>
    %c0_70 = arith.constant 0 : index
    %c15_71 = arith.constant 15 : index
    %187 = vector.load %arg6[%c0_70, %c15_71] : memref<40x32xf32, #tpu.memory_space<vmem>>, vector<40x1xf32>
    %188 = vector.broadcast %186 : vector<40x1xf32> to vector<40x128xf32>
    %189 = vector.broadcast %185 : vector<1x128xf32> to vector<40x128xf32>
    %190 = arith.mulf %188, %189 : vector<40x128xf32>
    %191 = vector.broadcast %187 : vector<40x1xf32> to vector<40x128xf32>
    %192 = arith.subf %191, %190 : vector<40x128xf32>
    %193 = math.exp %192 : vector<40x128xf32>
    %cst_72 = arith.constant 1.000000e+00 : f32
    %194 = vector.broadcast %cst_72 : f32 to vector<40x128xf32>
    %195 = arith.addf %194, %193 : vector<40x128xf32>
    %196 = arith.mulf %184, %195 : vector<40x128xf32>
    %197 = vector.extract_strided_slice %2 {offsets = [16, 0], sizes = [1, 128], strides = [1, 1]} : vector<24x128xf32> to vector<1x128xf32>
    %c0_73 = arith.constant 0 : index
    %c16 = arith.constant 16 : index
    %198 = vector.load %arg5[%c0_73, %c16] : memref<40x32xf32, #tpu.memory_space<vmem>>, vector<40x1xf32>
    %c0_74 = arith.constant 0 : index
    %c16_75 = arith.constant 16 : index
    %199 = vector.load %arg6[%c0_74, %c16_75] : memref<40x32xf32, #tpu.memory_space<vmem>>, vector<40x1xf32>
    %200 = vector.broadcast %198 : vector<40x1xf32> to vector<40x128xf32>
    %201 = vector.broadcast %197 : vector<1x128xf32> to vector<40x128xf32>
    %202 = arith.mulf %200, %201 : vector<40x128xf32>
    %203 = vector.broadcast %199 : vector<40x1xf32> to vector<40x128xf32>
    %204 = arith.subf %203, %202 : vector<40x128xf32>
    %205 = math.exp %204 : vector<40x128xf32>
    %cst_76 = arith.constant 1.000000e+00 : f32
    %206 = vector.broadcast %cst_76 : f32 to vector<40x128xf32>
    %207 = arith.addf %206, %205 : vector<40x128xf32>
    %208 = arith.mulf %196, %207 : vector<40x128xf32>
    %209 = vector.extract_strided_slice %2 {offsets = [17, 0], sizes = [1, 128], strides = [1, 1]} : vector<24x128xf32> to vector<1x128xf32>
    %c0_77 = arith.constant 0 : index
    %c17 = arith.constant 17 : index
    %210 = vector.load %arg5[%c0_77, %c17] : memref<40x32xf32, #tpu.memory_space<vmem>>, vector<40x1xf32>
    %c0_78 = arith.constant 0 : index
    %c17_79 = arith.constant 17 : index
    %211 = vector.load %arg6[%c0_78, %c17_79] : memref<40x32xf32, #tpu.memory_space<vmem>>, vector<40x1xf32>
    %212 = vector.broadcast %210 : vector<40x1xf32> to vector<40x128xf32>
    %213 = vector.broadcast %209 : vector<1x128xf32> to vector<40x128xf32>
    %214 = arith.mulf %212, %213 : vector<40x128xf32>
    %215 = vector.broadcast %211 : vector<40x1xf32> to vector<40x128xf32>
    %216 = arith.subf %215, %214 : vector<40x128xf32>
    %217 = math.exp %216 : vector<40x128xf32>
    %cst_80 = arith.constant 1.000000e+00 : f32
    %218 = vector.broadcast %cst_80 : f32 to vector<40x128xf32>
    %219 = arith.addf %218, %217 : vector<40x128xf32>
    %220 = arith.mulf %208, %219 : vector<40x128xf32>
    %221 = vector.extract_strided_slice %2 {offsets = [18, 0], sizes = [1, 128], strides = [1, 1]} : vector<24x128xf32> to vector<1x128xf32>
    %c0_81 = arith.constant 0 : index
    %c18 = arith.constant 18 : index
    %222 = vector.load %arg5[%c0_81, %c18] : memref<40x32xf32, #tpu.memory_space<vmem>>, vector<40x1xf32>
    %c0_82 = arith.constant 0 : index
    %c18_83 = arith.constant 18 : index
    %223 = vector.load %arg6[%c0_82, %c18_83] : memref<40x32xf32, #tpu.memory_space<vmem>>, vector<40x1xf32>
    %224 = vector.broadcast %222 : vector<40x1xf32> to vector<40x128xf32>
    %225 = vector.broadcast %221 : vector<1x128xf32> to vector<40x128xf32>
    %226 = arith.mulf %224, %225 : vector<40x128xf32>
    %227 = vector.broadcast %223 : vector<40x1xf32> to vector<40x128xf32>
    %228 = arith.subf %227, %226 : vector<40x128xf32>
    %229 = math.exp %228 : vector<40x128xf32>
    %cst_84 = arith.constant 1.000000e+00 : f32
    %230 = vector.broadcast %cst_84 : f32 to vector<40x128xf32>
    %231 = arith.addf %230, %229 : vector<40x128xf32>
    %232 = arith.mulf %220, %231 : vector<40x128xf32>
    %233 = vector.extract_strided_slice %2 {offsets = [19, 0], sizes = [1, 128], strides = [1, 1]} : vector<24x128xf32> to vector<1x128xf32>
    %c0_85 = arith.constant 0 : index
    %c19 = arith.constant 19 : index
    %234 = vector.load %arg5[%c0_85, %c19] : memref<40x32xf32, #tpu.memory_space<vmem>>, vector<40x1xf32>
    %c0_86 = arith.constant 0 : index
    %c19_87 = arith.constant 19 : index
    %235 = vector.load %arg6[%c0_86, %c19_87] : memref<40x32xf32, #tpu.memory_space<vmem>>, vector<40x1xf32>
    %236 = vector.broadcast %234 : vector<40x1xf32> to vector<40x128xf32>
    %237 = vector.broadcast %233 : vector<1x128xf32> to vector<40x128xf32>
    %238 = arith.mulf %236, %237 : vector<40x128xf32>
    %239 = vector.broadcast %235 : vector<40x1xf32> to vector<40x128xf32>
    %240 = arith.subf %239, %238 : vector<40x128xf32>
    %241 = math.exp %240 : vector<40x128xf32>
    %cst_88 = arith.constant 1.000000e+00 : f32
    %242 = vector.broadcast %cst_88 : f32 to vector<40x128xf32>
    %243 = arith.addf %242, %241 : vector<40x128xf32>
    %244 = arith.mulf %232, %243 : vector<40x128xf32>
    %245 = vector.extract_strided_slice %2 {offsets = [20, 0], sizes = [1, 128], strides = [1, 1]} : vector<24x128xf32> to vector<1x128xf32>
    %c0_89 = arith.constant 0 : index
    %c20 = arith.constant 20 : index
    %246 = vector.load %arg5[%c0_89, %c20] : memref<40x32xf32, #tpu.memory_space<vmem>>, vector<40x1xf32>
    %c0_90 = arith.constant 0 : index
    %c20_91 = arith.constant 20 : index
    %247 = vector.load %arg6[%c0_90, %c20_91] : memref<40x32xf32, #tpu.memory_space<vmem>>, vector<40x1xf32>
    %248 = vector.broadcast %246 : vector<40x1xf32> to vector<40x128xf32>
    %249 = vector.broadcast %245 : vector<1x128xf32> to vector<40x128xf32>
    %250 = arith.mulf %248, %249 : vector<40x128xf32>
    %251 = vector.broadcast %247 : vector<40x1xf32> to vector<40x128xf32>
    %252 = arith.subf %251, %250 : vector<40x128xf32>
    %253 = math.exp %252 : vector<40x128xf32>
    %cst_92 = arith.constant 1.000000e+00 : f32
    %254 = vector.broadcast %cst_92 : f32 to vector<40x128xf32>
    %255 = arith.addf %254, %253 : vector<40x128xf32>
    %256 = arith.mulf %244, %255 : vector<40x128xf32>
    %257 = vector.extract_strided_slice %2 {offsets = [21, 0], sizes = [1, 128], strides = [1, 1]} : vector<24x128xf32> to vector<1x128xf32>
    %c0_93 = arith.constant 0 : index
    %c21 = arith.constant 21 : index
    %258 = vector.load %arg5[%c0_93, %c21] : memref<40x32xf32, #tpu.memory_space<vmem>>, vector<40x1xf32>
    %c0_94 = arith.constant 0 : index
    %c21_95 = arith.constant 21 : index
    %259 = vector.load %arg6[%c0_94, %c21_95] : memref<40x32xf32, #tpu.memory_space<vmem>>, vector<40x1xf32>
    %260 = vector.broadcast %258 : vector<40x1xf32> to vector<40x128xf32>
    %261 = vector.broadcast %257 : vector<1x128xf32> to vector<40x128xf32>
    %262 = arith.mulf %260, %261 : vector<40x128xf32>
    %263 = vector.broadcast %259 : vector<40x1xf32> to vector<40x128xf32>
    %264 = arith.subf %263, %262 : vector<40x128xf32>
    %265 = math.exp %264 : vector<40x128xf32>
    %cst_96 = arith.constant 1.000000e+00 : f32
    %266 = vector.broadcast %cst_96 : f32 to vector<40x128xf32>
    %267 = arith.addf %266, %265 : vector<40x128xf32>
    %268 = arith.mulf %256, %267 : vector<40x128xf32>
    %269 = vector.extract_strided_slice %2 {offsets = [22, 0], sizes = [1, 128], strides = [1, 1]} : vector<24x128xf32> to vector<1x128xf32>
    %c0_97 = arith.constant 0 : index
    %c22 = arith.constant 22 : index
    %270 = vector.load %arg5[%c0_97, %c22] : memref<40x32xf32, #tpu.memory_space<vmem>>, vector<40x1xf32>
    %c0_98 = arith.constant 0 : index
    %c22_99 = arith.constant 22 : index
    %271 = vector.load %arg6[%c0_98, %c22_99] : memref<40x32xf32, #tpu.memory_space<vmem>>, vector<40x1xf32>
    %272 = vector.broadcast %270 : vector<40x1xf32> to vector<40x128xf32>
    %273 = vector.broadcast %269 : vector<1x128xf32> to vector<40x128xf32>
    %274 = arith.mulf %272, %273 : vector<40x128xf32>
    %275 = vector.broadcast %271 : vector<40x1xf32> to vector<40x128xf32>
    %276 = arith.subf %275, %274 : vector<40x128xf32>
    %277 = math.exp %276 : vector<40x128xf32>
    %cst_100 = arith.constant 1.000000e+00 : f32
    %278 = vector.broadcast %cst_100 : f32 to vector<40x128xf32>
    %279 = arith.addf %278, %277 : vector<40x128xf32>
    %280 = arith.mulf %268, %279 : vector<40x128xf32>
    %281 = vector.extract_strided_slice %2 {offsets = [23, 0], sizes = [1, 128], strides = [1, 1]} : vector<24x128xf32> to vector<1x128xf32>
    %c0_101 = arith.constant 0 : index
    %c23 = arith.constant 23 : index
    %282 = vector.load %arg5[%c0_101, %c23] : memref<40x32xf32, #tpu.memory_space<vmem>>, vector<40x1xf32>
    %c0_102 = arith.constant 0 : index
    %c23_103 = arith.constant 23 : index
    %283 = vector.load %arg6[%c0_102, %c23_103] : memref<40x32xf32, #tpu.memory_space<vmem>>, vector<40x1xf32>
    %284 = vector.broadcast %282 : vector<40x1xf32> to vector<40x128xf32>
    %285 = vector.broadcast %281 : vector<1x128xf32> to vector<40x128xf32>
    %286 = arith.mulf %284, %285 : vector<40x128xf32>
    %287 = vector.broadcast %283 : vector<40x1xf32> to vector<40x128xf32>
    %288 = arith.subf %287, %286 : vector<40x128xf32>
    %289 = math.exp %288 : vector<40x128xf32>
    %cst_104 = arith.constant 1.000000e+00 : f32
    %290 = vector.broadcast %cst_104 : f32 to vector<40x128xf32>
    %291 = arith.addf %290, %289 : vector<40x128xf32>
    %292 = arith.mulf %280, %291 : vector<40x128xf32>
    %293 = vector.extract_strided_slice %5 {offsets = [0, 0], sizes = [1, 128], strides = [1, 1]} : vector<8x128xf32> to vector<1x128xf32>
    %c0_105 = arith.constant 0 : index
    %c24 = arith.constant 24 : index
    %294 = vector.load %arg5[%c0_105, %c24] : memref<40x32xf32, #tpu.memory_space<vmem>>, vector<40x1xf32>
    %c0_106 = arith.constant 0 : index
    %c24_107 = arith.constant 24 : index
    %295 = vector.load %arg6[%c0_106, %c24_107] : memref<40x32xf32, #tpu.memory_space<vmem>>, vector<40x1xf32>
    %296 = vector.broadcast %294 : vector<40x1xf32> to vector<40x128xf32>
    %297 = vector.broadcast %293 : vector<1x128xf32> to vector<40x128xf32>
    %298 = arith.mulf %296, %297 : vector<40x128xf32>
    %299 = vector.broadcast %295 : vector<40x1xf32> to vector<40x128xf32>
    %300 = arith.subf %299, %298 : vector<40x128xf32>
    %301 = math.exp %300 : vector<40x128xf32>
    %cst_108 = arith.constant 1.000000e+00 : f32
    %302 = vector.broadcast %cst_108 : f32 to vector<40x128xf32>
    %303 = arith.addf %302, %301 : vector<40x128xf32>
    %304 = arith.mulf %292, %303 : vector<40x128xf32>
    %305 = vector.extract_strided_slice %5 {offsets = [1, 0], sizes = [1, 128], strides = [1, 1]} : vector<8x128xf32> to vector<1x128xf32>
    %c0_109 = arith.constant 0 : index
    %c25 = arith.constant 25 : index
    %306 = vector.load %arg5[%c0_109, %c25] : memref<40x32xf32, #tpu.memory_space<vmem>>, vector<40x1xf32>
    %c0_110 = arith.constant 0 : index
    %c25_111 = arith.constant 25 : index
    %307 = vector.load %arg6[%c0_110, %c25_111] : memref<40x32xf32, #tpu.memory_space<vmem>>, vector<40x1xf32>
    %308 = vector.broadcast %306 : vector<40x1xf32> to vector<40x128xf32>
    %309 = vector.broadcast %305 : vector<1x128xf32> to vector<40x128xf32>
    %310 = arith.mulf %308, %309 : vector<40x128xf32>
    %311 = vector.broadcast %307 : vector<40x1xf32> to vector<40x128xf32>
    %312 = arith.subf %311, %310 : vector<40x128xf32>
    %313 = math.exp %312 : vector<40x128xf32>
    %cst_112 = arith.constant 1.000000e+00 : f32
    %314 = vector.broadcast %cst_112 : f32 to vector<40x128xf32>
    %315 = arith.addf %314, %313 : vector<40x128xf32>
    %316 = arith.mulf %304, %315 : vector<40x128xf32>
    %317 = vector.extract_strided_slice %5 {offsets = [2, 0], sizes = [1, 128], strides = [1, 1]} : vector<8x128xf32> to vector<1x128xf32>
    %c0_113 = arith.constant 0 : index
    %c26 = arith.constant 26 : index
    %318 = vector.load %arg5[%c0_113, %c26] : memref<40x32xf32, #tpu.memory_space<vmem>>, vector<40x1xf32>
    %c0_114 = arith.constant 0 : index
    %c26_115 = arith.constant 26 : index
    %319 = vector.load %arg6[%c0_114, %c26_115] : memref<40x32xf32, #tpu.memory_space<vmem>>, vector<40x1xf32>
    %320 = vector.broadcast %318 : vector<40x1xf32> to vector<40x128xf32>
    %321 = vector.broadcast %317 : vector<1x128xf32> to vector<40x128xf32>
    %322 = arith.mulf %320, %321 : vector<40x128xf32>
    %323 = vector.broadcast %319 : vector<40x1xf32> to vector<40x128xf32>
    %324 = arith.subf %323, %322 : vector<40x128xf32>
    %325 = math.exp %324 : vector<40x128xf32>
    %cst_116 = arith.constant 1.000000e+00 : f32
    %326 = vector.broadcast %cst_116 : f32 to vector<40x128xf32>
    %327 = arith.addf %326, %325 : vector<40x128xf32>
    %328 = arith.mulf %316, %327 : vector<40x128xf32>
    %329 = vector.extract_strided_slice %5 {offsets = [3, 0], sizes = [1, 128], strides = [1, 1]} : vector<8x128xf32> to vector<1x128xf32>
    %c0_117 = arith.constant 0 : index
    %c27 = arith.constant 27 : index
    %330 = vector.load %arg5[%c0_117, %c27] : memref<40x32xf32, #tpu.memory_space<vmem>>, vector<40x1xf32>
    %c0_118 = arith.constant 0 : index
    %c27_119 = arith.constant 27 : index
    %331 = vector.load %arg6[%c0_118, %c27_119] : memref<40x32xf32, #tpu.memory_space<vmem>>, vector<40x1xf32>
    %332 = vector.broadcast %330 : vector<40x1xf32> to vector<40x128xf32>
    %333 = vector.broadcast %329 : vector<1x128xf32> to vector<40x128xf32>
    %334 = arith.mulf %332, %333 : vector<40x128xf32>
    %335 = vector.broadcast %331 : vector<40x1xf32> to vector<40x128xf32>
    %336 = arith.subf %335, %334 : vector<40x128xf32>
    %337 = math.exp %336 : vector<40x128xf32>
    %cst_120 = arith.constant 1.000000e+00 : f32
    %338 = vector.broadcast %cst_120 : f32 to vector<40x128xf32>
    %339 = arith.addf %338, %337 : vector<40x128xf32>
    %340 = arith.mulf %328, %339 : vector<40x128xf32>
    %341 = vector.extract_strided_slice %5 {offsets = [4, 0], sizes = [1, 128], strides = [1, 1]} : vector<8x128xf32> to vector<1x128xf32>
    %c0_121 = arith.constant 0 : index
    %c28 = arith.constant 28 : index
    %342 = vector.load %arg5[%c0_121, %c28] : memref<40x32xf32, #tpu.memory_space<vmem>>, vector<40x1xf32>
    %c0_122 = arith.constant 0 : index
    %c28_123 = arith.constant 28 : index
    %343 = vector.load %arg6[%c0_122, %c28_123] : memref<40x32xf32, #tpu.memory_space<vmem>>, vector<40x1xf32>
    %344 = vector.broadcast %342 : vector<40x1xf32> to vector<40x128xf32>
    %345 = vector.broadcast %341 : vector<1x128xf32> to vector<40x128xf32>
    %346 = arith.mulf %344, %345 : vector<40x128xf32>
    %347 = vector.broadcast %343 : vector<40x1xf32> to vector<40x128xf32>
    %348 = arith.subf %347, %346 : vector<40x128xf32>
    %349 = math.exp %348 : vector<40x128xf32>
    %cst_124 = arith.constant 1.000000e+00 : f32
    %350 = vector.broadcast %cst_124 : f32 to vector<40x128xf32>
    %351 = arith.addf %350, %349 : vector<40x128xf32>
    %352 = arith.mulf %340, %351 : vector<40x128xf32>
    %353 = vector.extract_strided_slice %5 {offsets = [5, 0], sizes = [1, 128], strides = [1, 1]} : vector<8x128xf32> to vector<1x128xf32>
    %c0_125 = arith.constant 0 : index
    %c29 = arith.constant 29 : index
    %354 = vector.load %arg5[%c0_125, %c29] : memref<40x32xf32, #tpu.memory_space<vmem>>, vector<40x1xf32>
    %c0_126 = arith.constant 0 : index
    %c29_127 = arith.constant 29 : index
    %355 = vector.load %arg6[%c0_126, %c29_127] : memref<40x32xf32, #tpu.memory_space<vmem>>, vector<40x1xf32>
    %356 = vector.broadcast %354 : vector<40x1xf32> to vector<40x128xf32>
    %357 = vector.broadcast %353 : vector<1x128xf32> to vector<40x128xf32>
    %358 = arith.mulf %356, %357 : vector<40x128xf32>
    %359 = vector.broadcast %355 : vector<40x1xf32> to vector<40x128xf32>
    %360 = arith.subf %359, %358 : vector<40x128xf32>
    %361 = math.exp %360 : vector<40x128xf32>
    %cst_128 = arith.constant 1.000000e+00 : f32
    %362 = vector.broadcast %cst_128 : f32 to vector<40x128xf32>
    %363 = arith.addf %362, %361 : vector<40x128xf32>
    %364 = arith.mulf %352, %363 : vector<40x128xf32>
    %365 = vector.extract_strided_slice %5 {offsets = [6, 0], sizes = [1, 128], strides = [1, 1]} : vector<8x128xf32> to vector<1x128xf32>
    %c0_129 = arith.constant 0 : index
    %c30 = arith.constant 30 : index
    %366 = vector.load %arg5[%c0_129, %c30] : memref<40x32xf32, #tpu.memory_space<vmem>>, vector<40x1xf32>
    %c0_130 = arith.constant 0 : index
    %c30_131 = arith.constant 30 : index
    %367 = vector.load %arg6[%c0_130, %c30_131] : memref<40x32xf32, #tpu.memory_space<vmem>>, vector<40x1xf32>
    %368 = vector.broadcast %366 : vector<40x1xf32> to vector<40x128xf32>
    %369 = vector.broadcast %365 : vector<1x128xf32> to vector<40x128xf32>
    %370 = arith.mulf %368, %369 : vector<40x128xf32>
    %371 = vector.broadcast %367 : vector<40x1xf32> to vector<40x128xf32>
    %372 = arith.subf %371, %370 : vector<40x128xf32>
    %373 = math.exp %372 : vector<40x128xf32>
    %cst_132 = arith.constant 1.000000e+00 : f32
    %374 = vector.broadcast %cst_132 : f32 to vector<40x128xf32>
    %375 = arith.addf %374, %373 : vector<40x128xf32>
    %376 = arith.mulf %364, %375 : vector<40x128xf32>
    %377 = vector.extract_strided_slice %5 {offsets = [7, 0], sizes = [1, 128], strides = [1, 1]} : vector<8x128xf32> to vector<1x128xf32>
    %c0_133 = arith.constant 0 : index
    %c31 = arith.constant 31 : index
    %378 = vector.load %arg5[%c0_133, %c31] : memref<40x32xf32, #tpu.memory_space<vmem>>, vector<40x1xf32>
    %c0_134 = arith.constant 0 : index
    %c31_135 = arith.constant 31 : index
    %379 = vector.load %arg6[%c0_134, %c31_135] : memref<40x32xf32, #tpu.memory_space<vmem>>, vector<40x1xf32>
    %380 = vector.broadcast %378 : vector<40x1xf32> to vector<40x128xf32>
    %381 = vector.broadcast %377 : vector<1x128xf32> to vector<40x128xf32>
    %382 = arith.mulf %380, %381 : vector<40x128xf32>
    %383 = vector.broadcast %379 : vector<40x1xf32> to vector<40x128xf32>
    %384 = arith.subf %383, %382 : vector<40x128xf32>
    %385 = math.exp %384 : vector<40x128xf32>
    %cst_136 = arith.constant 1.000000e+00 : f32
    %386 = vector.broadcast %cst_136 : f32 to vector<40x128xf32>
    %387 = arith.addf %386, %385 : vector<40x128xf32>
    %388 = arith.mulf %376, %387 : vector<40x128xf32>
    %389 = tpu.reciprocal %388 : vector<40x128xf32> -> vector<40x128xf32>
    %390 = vector.extract_strided_slice %389 {offsets = [0, 0], sizes = [8, 128], strides = [1, 1]} : vector<40x128xf32> to vector<8x128xf32>
    %391 = vector.extract_strided_slice %389 {offsets = [8, 0], sizes = [8, 128], strides = [1, 1]} : vector<40x128xf32> to vector<8x128xf32>
    %392 = arith.addf %390, %391 : vector<8x128xf32>
    %393 = vector.extract_strided_slice %389 {offsets = [16, 0], sizes = [8, 128], strides = [1, 1]} : vector<40x128xf32> to vector<8x128xf32>
    %394 = arith.addf %392, %393 : vector<8x128xf32>
    %395 = vector.extract_strided_slice %389 {offsets = [24, 0], sizes = [8, 128], strides = [1, 1]} : vector<40x128xf32> to vector<8x128xf32>
    %396 = arith.addf %394, %395 : vector<8x128xf32>
    %397 = vector.extract_strided_slice %389 {offsets = [32, 0], sizes = [8, 128], strides = [1, 1]} : vector<40x128xf32> to vector<8x128xf32>
    %398 = arith.addf %396, %397 : vector<8x128xf32>
    %c0_137 = arith.constant 0 : index
    %399 = memref.load %arg7[%c0_137] : memref<1xf32, #tpu.memory_space<smem>>
    %c0_138 = arith.constant 0 : index
    %400 = memref.load %arg8[%c0_138] : memref<1xf32, #tpu.memory_space<smem>>
    %401 = vector.broadcast %400 : f32 to vector<8x128xf32>
    %402 = arith.subf %398, %401 : vector<8x128xf32>
    %403 = vector.broadcast %399 : f32 to vector<8x128xf32>
    %404 = arith.mulf %403, %402 : vector<8x128xf32>
    %405 = math.tanh %404 : vector<8x128xf32>
    %c0_139 = arith.constant 0 : index
    %c0_140 = arith.constant 0 : index
    %406 = vector.load %arg9[%c0_139, %c0_140] : memref<8x128xf32, #tpu.memory_space<vmem>>, vector<8x128xf32>
    tpu.vector_store %arg9[%c0_139, %c0_140], %405 {strides = array<i32>} : memref<8x128xf32, #tpu.memory_space<vmem>>, vector<8x128xf32>,
    return
  }
  func.func @transform_0(%arg0: i32) -> (i32, i32) {
    %c0_i32 = arith.constant 0 : i32
    %c0_i32_0 = arith.constant 0 : i32
    return %arg0, %c0_i32 : i32, i32
  }
  func.func @transform_1(%arg0: i32) -> (i32, i32) {
    %c0_i32 = arith.constant 0 : i32
    %c0_i32_0 = arith.constant 0 : i32
    return %arg0, %c0_i32 : i32, i32
  }
  func.func @transform_2(%arg0: i32) -> (i32, i32) {
    %c0_i32 = arith.constant 0 : i32
    %c0_i32_0 = arith.constant 0 : i32
    %c0_i32_1 = arith.constant 0 : i32
    return %c0_i32, %c0_i32_0 : i32, i32
  }
  func.func @transform_3(%arg0: i32) -> (i32, i32) {
    %c0_i32 = arith.constant 0 : i32
    %c0_i32_0 = arith.constant 0 : i32
    %c0_i32_1 = arith.constant 0 : i32
    return %c0_i32, %c0_i32_0 : i32, i32
  }
  func.func @transform_4(%arg0: i32) -> (i32, i32) {
    %c0_i32 = arith.constant 0 : i32
    %c0_i32_0 = arith.constant 0 : i32
    %c0_i32_1 = arith.constant 0 : i32
    return %c0_i32, %c0_i32_0 : i32, i32
  }
  func.func @transform_5(%arg0: i32) -> (i32, i32) {
    %c0_i32 = arith.constant 0 : i32
    %c0_i32_0 = arith.constant 0 : i32
    %c0_i32_1 = arith.constant 0 : i32
    return %c0_i32, %c0_i32_0 : i32, i32
  }
  func.func @transform_6(%arg0: i32) -> i32 {
    %c0_i32 = arith.constant 0 : i32
    %c0_i32_0 = arith.constant 0 : i32
    return %c0_i32 : i32
  }
  func.func @transform_7(%arg0: i32) -> i32 {
    %c0_i32 = arith.constant 0 : i32
    %c0_i32_0 = arith.constant 0 : i32
    return %c0_i32 : i32
  }
  func.func @transform_8(%arg0: i32) -> (i32, i32) {
    %c0_i32 = arith.constant 0 : i32
    %c0_i32_0 = arith.constant 0 : i32
    return %c0_i32, %arg0 : i32, i32
  }
}

</mosaic_0001>

<bundles_post_ra>
// kernel: fwd.1
= control target key start
LH: loop header
LB: loop body
LE: loop exit
PB: predicated region body
PF: predicated region fallthrough
CT: control target
= control target key end

     0   :  { %15 = vsyncpa [#allocation5], 0  ;;  %s5391_s0 = inlined_call_operand.vmem [shape: f32[2,24], index: 0, kind: input, shape index: {}]   ;;  %s5392_s1 = inlined_call_operand.hbm [shape: f32[2,8], index: 1, kind: input, shape index: {}]   ;;  %s5393_s2 = inlined_call_operand.hbm [shape: f32[24,24], index: 2, kind: input, shape index: {}]   ;;  %s5394_s3 = inlined_call_operand.vmem [shape: f32[8,8], index: 3, kind: input, shape index: {}]   ;;  %s5395_s4 = inlined_call_operand.vmem [shape: f32[40,32], index: 4, kind: input, shape index: {}]   ;;  %s5396_s5 = inlined_call_operand.vmem [shape: f32[40,32], index: 5, kind: input, shape index: {}]   ;;  %s5397_s6 = inlined_call_operand.<no memory space> [shape: f32[1], index: 6, kind: input, shape index: {}]   ;;  %s5398_s7 = inlined_call_operand.<no memory space> [shape: f32[1], index: 7, kind: input, shape index: {}]   ;;  %s5399_s8 = inlined_call_operand.vmem [shape: f32[8,128], index: 8, kind: output, shape index: {}]  }
   0x1   :  { %16 = vsyncpa [#allocation7], 0 }
   0x2   :  { %23 = vsyncadd [#allocation5], 2016  ;;  %s3428_s27 = smov [#allocation4]  }
   0x3   :  { %s24_s28 = sshll.u32 %s3428_s27, 4  ;;  %s25_s28 = int_to_ptr.vmem [resolvable:$true] %s24_s28 }
   0x4   :  { %s3392_s29 = scalar_lea.vmem %s25_s28, 32  ;;  %s3396_s30 = scalar_lea.vmem %s25_s28, 2048 }
   0x5   :  { %p3393_p0 = scmp.ne.s32.totalorder %s25_s28, %s3392_s29  ;;  %p3397_p1 = scmp.lt.s32.totalorder %s25_s28, %s25_s28 }
   0x6   :  { %p3398_p2 = scmp.lt.s32.totalorder %s3396_s30, %s3392_s29 }
   0x8   :  { %p3399_p3 = por %p3398_p2, %p3397_p1 }
   0xa   :  { %p3400_p4 = pnand %p3399_p3, %p3393_p0 }
   0xc   :  { %3403 = shalt.err (!%p3400_p4)
}
   0xd   :  { %s3429_s9 = smov 32   ;;  %s3430_s10 = smov 2  }
   0xe   :  { %30 = dma.hbm_to_vmem [thread:$0]  %s5392_s1, 32, %s25_s28, [#allocation5], %s3429_s9, %s3429_s9, %s3430_s10  }
   0xf   :  { %s3431_s13 = smov [#allocation6]  }
  0x10   :  { %s36_s14 = sshll.u32 %s3431_s13, 4  ;;  %s37_s14 = int_to_ptr.vmem [resolvable:$true] %s36_s14 }
  0x11   :  { %s3412_s15 = scalar_lea.vmem %s37_s14, 384  ;;  %p3417_p6 = scmp.lt.s32.totalorder %s37_s14, %s37_s14 }
  0x12   :  { %p3413_p5 = scmp.ne.s32.totalorder %s37_s14, %s3412_s15  ;;  %p3418_p7 = scmp.lt.s32.totalorder %s3412_s15, %s3412_s15 }
  0x14   :  { %p3419_p8 = por %p3418_p7, %p3417_p6 }
  0x16   :  { %p3420_p9 = pnand %p3419_p8, %p3413_p5 }
  0x18   :  { %3423 = shalt.err (!%p3420_p9)
}
  0x19   :  { %s3432_s16 = smov 128   ;;  %s3433_s17 = smov 8  }
  0x1a   :  { %42 = dma.hbm_to_vmem [thread:$0]  %s5393_s2, 384, %s37_s14, [#allocation7], %s3432_s16, %s3432_s16, %s3433_s17  }
  0x1b   :  { %3424 = dma.done.wait [#allocation5], 2048  }
  0x1c   :  { %3425 = vsyncadd [#allocation5], 4294965248 }
  0x1d   :  { %3426 = dma.done.wait [#allocation7], 384  }
  0x1e   :  { %3427 = vsyncadd [#allocation7], 4294966912  ;;  %v3434_v0 = vmov 0   ;;  %v5400_v1 = vmov 0.0   ;;  %vm3436_vm0 = vmmov 0   ;;  %vm78_vm1 = vcmask 195584  }
  0x1f   :  { %2950 = vset.pattern.permute.xlu1 %v3434_v0  ;;  %2833 = vmatprep.subr.mxu0 %v5400_v1  ;;  %v3528_v2 = vld [vmem:[%s5395_s4 + $0x10] sm:$0xff]  ;;  %v77_v3 = vld [vmem:[%s5391_s0 + $0x78] sm:$0xff]  ;;  %v3538_v4 = vld [vmem:[%s5395_s4] sm:$0xff]  ;;  %v3437_v18 = vmov 1   ;;  %v3438_v24 = vmov 2   ;;  %v3439_v30 = vmov 3  }
  0x20   :  { %2949 = vset.pattern.permute.xlu0 %v3434_v0  ;;  %2865 = vmatprep.mubr.msk.f32.mxu0 %vm3436_vm0, %v5400_v1  ;;  %v3544_v5 = vld [vmem:[%s5395_s4 + $0x18] sm:$0xff]  ;;  %v76_v6 = vld [vmem:[%s5391_s0 + $0x70] sm:$0xff]  ;;  %v3553_v7 = vld [vmem:[%s5395_s4 + $0x8] sm:$0xff]  ;;  %v3440_v33 = vmov 4   ;;  %v3441_v34 = vmov 5   ;;  %v3442_v35 = vmov 6  }
  0x21   :  { %2874 = vmatprep.subr.mxu1 %v5400_v1  ;;  %2906 = vmatprep.mubr.msk.f32.mxu1 %vm3436_vm0, %v5400_v1  ;;  %v3561_v8 = vld [vmem:[%s5396_s5] sm:$0xff]  ;;  %v75_v9 = vld [vmem:[%s5391_s0 + $0x68] sm:$0xff]  ;;  %v3578_v11 = vld [vmem:[%s5396_s5 + $0x10] sm:$0xff]  ;;  %v3443_v43 = vmov 7   ;;  %v3444_v54 = vmov 8   ;;  %v3445_v63 = vmov 9  }
  0x22   :  { %377 = vperm.xlu1 %2950, %v3528_v2   ;;  %2834 = vmatpush3.xpose.msk.msra.mxu0 %vm78_vm1, %v77_v3  ;;  %v3570_v10 = vld [vmem:[%s5395_s4 + $0x20] sm:$0xff]  ;;  %v3587_v13 = vld [vmem:[%s5396_s5 + $0x8] sm:$0xff]  ;;  %v73_v15 = vld [vmem:[%s5391_s0 + $0x58] sm:$0xff]  ;;  %vm233_vm2 = vcmask 64512  }
  0x23   :  { %2835 = vmatprep.subr.mxu0 %v5400_v1  ;;  %367 = vperm.xlu0 %2949, %v3538_v4   ;;  %v74_v12 = vld [vmem:[%s5391_s0 + $0x60] sm:$0xff]  ;;  %v3604_v16 = vld [vmem:[%s5396_s5 + $0x18] sm:$0xff]  ;;  %v72_v17 = vld [vmem:[%s5391_s0 + $0x50] sm:$0xff] }
  0x24   :  { %v3595_v14 = vld [vmem:[%s5396_s5 + $0x20] sm:$0xff]  ;;  %v71_v19 = vld [vmem:[%s5391_s0 + $0x48] sm:$0xff]  ;;  %v69_v21 = vld [vmem:[%s5391_s0 + $0x38] sm:$0xff] }
  0x25   :  { %v70_v20 = vld [vmem:[%s5391_s0 + $0x40] sm:$0xff]  ;;  %v68_v22 = vld [vmem:[%s5391_s0 + $0x30] sm:$0xff]  ;;  %v67_v23 = vld [vmem:[%s5391_s0 + $0x28] sm:$0xff] }
  0x26   :  { %382 = vperm.xlu1 %2950, %v3544_v5   ;;  %2836 = vmatpush3.xpose.msk.msra.mxu0 %vm78_vm1, %v76_v6  ;;  %v66_v25 = vld [vmem:[%s5391_s0 + $0x20] sm:$0xff]  ;;  %v65_v26 = vld [vmem:[%s5391_s0 + $0x18] sm:$0xff]  ;;  %v64_v27 = vld [vmem:[%s5391_s0 + $0x10] sm:$0xff] }
  0x27   :  { %2837 = vmatprep.subr.mxu0 %v5400_v1  ;;  %372 = vperm.xlu0 %2949, %v3553_v7   ;;  %v63_v28 = vld [vmem:[%s5391_s0 + $0x8] sm:$0xff]  ;;  %v62_v29 = vld [vmem:[%s5391_s0] sm:$0xff]  ;;  %v61_v3 = vld [vmem:[#allocation6 + $0x10] sm:$0xff] }
  0x28   :  { %v59_v31 = vld [vmem:[#allocation6] sm:$0xff]  ;;  %v60_v32 = vld [vmem:[#allocation6 + $0x8] sm:$0xff] }
  0x2a   :  { %401 = vperm.xlu1 %2950, %v3561_v8   ;;  %2838 = vmatpush3.xpose.msk.msra.mxu0 %vm78_vm1, %v75_v9 }
  0x2b   :  { %2839 = vmatprep.subr.mxu0 %v5400_v1  ;;  %387 = vperm.xlu0 %2949, %v3570_v10  }
  0x2e   :  { %411 = vperm.xlu1 %2950, %v3578_v11   ;;  %2840 = vmatpush3.xpose.msk.msra.mxu0 %vm78_vm1, %v74_v12 }
  0x2f   :  { %2841 = vmatprep.subr.mxu0 %v5400_v1  ;;  %406 = vperm.xlu0 %2949, %v3587_v13  }
  0x32   :  { %421 = vperm.xlu1 %2950, %v3595_v14   ;;  %2842 = vmatpush3.xpose.msk.msra.mxu0 %vm78_vm1, %v73_v15 }
  0x33   :  { %2843 = vmatprep.subr.mxu0 %v5400_v1  ;;  %416 = vperm.xlu0 %2949, %v3604_v16  }
  0x36   :  { %2952 = vset.pattern.permute.xlu1 %v3437_v18  ;;  %2844 = vmatpush3.xpose.msk.msra.mxu0 %vm78_vm1, %v72_v17 }
  0x37   :  { %449 = vperm.xlu1 %2952, %v3553_v7   ;;  %2845 = vmatprep.subr.mxu0 %v5400_v1 }
  0x38   :  { %2951 = vset.pattern.permute.xlu0 %v3437_v18 }
  0x39   :  { %445 = vperm.xlu0 %2951, %v3538_v4  }
  0x3a   :  { %2846 = vmatpush3.xpose.msk.msra.mxu0 %vm78_vm1, %v71_v19 }
  0x3b   :  { %453 = vperm.xlu1 %2952, %v3528_v2   ;;  %2847 = vmatprep.subr.mxu0 %v5400_v1 }
  0x3d   :  { %457 = vperm.xlu0 %2951, %v3544_v5  }
  0x3e   :  { %2848 = vmatpush3.xpose.msk.msra.mxu0 %vm78_vm1, %v70_v20 }
  0x3f   :  { %461 = vperm.xlu1 %2952, %v3570_v10   ;;  %2849 = vmatprep.subr.mxu0 %v5400_v1 }
  0x41   :  { %474 = vperm.xlu0 %2951, %v3561_v8  }
  0x42   :  { %2850 = vmatpush3.xpose.msk.msra.mxu0 %vm78_vm1, %v69_v21 }
  0x43   :  { %478 = vperm.xlu1 %2952, %v3587_v13   ;;  %2851 = vmatprep.subr.mxu0 %v5400_v1 }
  0x45   :  { %482 = vperm.xlu0 %2951, %v3578_v11  }
  0x46   :  { %2852 = vmatpush3.xpose.msk.msra.mxu0 %vm78_vm1, %v68_v22  ;;  %v3446_v22 = vmov 10  }
  0x47   :  { %486 = vperm.xlu1 %2952, %v3604_v16   ;;  %2853 = vmatprep.subr.mxu0 %v5400_v1 }
  0x49   :  { %490 = vperm.xlu0 %2951, %v3595_v14  }
  0x4a   :  { %2854 = vmatpush3.xpose.msk.msra.mxu0 %vm78_vm1, %v67_v23 }
  0x4b   :  { %2953 = vset.pattern.permute.xlu1 %v3438_v24  ;;  %2855 = vmatprep.subr.mxu0 %v5400_v1 }
  0x4c   :  { %519 = vperm.xlu1 %2953, %v3538_v4  }
  0x4d   :  { %2954 = vset.pattern.permute.xlu0 %v3438_v24 }
  0x4e   :  { %2856 = vmatpush3.xpose.msk.msra.mxu0 %vm78_vm1, %v66_v25  ;;  %523 = vperm.xlu0 %2954, %v3553_v7  }
  0x4f   :  { %2857 = vmatprep.subr.mxu0 %v5400_v1 }
  0x50   :  { %527 = vperm.xlu1 %2953, %v3528_v2  }
  0x52   :  { %2858 = vmatpush3.xpose.msk.msra.mxu0 %vm78_vm1, %v65_v26  ;;  %535 = vperm.xlu0 %2954, %v3570_v10  }
  0x53   :  { %2859 = vmatprep.subr.mxu0 %v5400_v1 }
  0x54   :  { %531 = vperm.xlu1 %2953, %v3544_v5  }
  0x56   :  { %2860 = vmatpush3.xpose.msk.msra.mxu0 %vm78_vm1, %v64_v27  ;;  %552 = vperm.xlu0 %2954, %v3587_v13  }
  0x57   :  { %2861 = vmatprep.subr.mxu0 %v5400_v1 }
  0x58   :  { %548 = vperm.xlu1 %2953, %v3561_v8  }
  0x5a   :  { %2862 = vmatpush3.xpose.msk.msra.mxu0 %vm78_vm1, %v63_v28  ;;  %560 = vperm.xlu0 %2954, %v3604_v16  }
  0x5b   :  { %2863 = vmatprep.subr.mxu0 %v5400_v1 }
  0x5c   :  { %556 = vperm.xlu1 %2953, %v3578_v11  }
  0x5e   :  { %2864 = vmatpush3.xpose.msk.msra.mxu0 %vm78_vm1, %v62_v29  ;;  %2955 = vset.pattern.permute.xlu0 %v3439_v30 }
  0x5f   :  { %593 = vperm.xlu0 %2955, %v3538_v4  }
  0x60   :  { %564 = vperm.xlu1 %2953, %v3595_v14  }
  0x61   :  { %2866 = vmatmul.mubr.msk.f32.vlgmr.msra.gmra.mxu0 %vm78_vm1, %v59_v31  ;;  %v3447_v31 = vmov 11  }
  0x62   :  { %2868 = vmatprep.mubr.msk.f32.mxu0 %vm3436_vm0, %v5400_v1 }
  0x63   :  { %605 = vperm.xlu0 %2955, %v3544_v5  }
  0x64   :  { %2956 = vset.pattern.permute.xlu1 %v3439_v30 }
  0x65   :  { %597 = vperm.xlu1 %2956, %v3553_v7   ;;  %2869 = vmatmul.mubr.msk.f32.gmra.mxu0 %vm78_vm1, %v60_v32 }
  0x66   :  { %2871 = vmatprep.mubr.msk.f32.mxu0 %vm3436_vm0, %v5400_v1 }
  0x67   :  { %622 = vperm.xlu0 %2955, %v3561_v8  }
  0x69   :  { %601 = vperm.xlu1 %2956, %v3528_v2   ;;  %2872 = vmatmul.mubr.msk.f32.gmra.mxu0 %vm78_vm1, %v61_v3 }
  0x6b   :  { %630 = vperm.xlu0 %2955, %v3578_v11  }
  0x6d   :  { %609 = vperm.xlu1 %2956, %v3570_v10  }
  0x6f   :  { %638 = vperm.xlu0 %2955, %v3595_v14  }
  0x71   :  { %626 = vperm.xlu1 %2956, %v3587_v13  }
  0x73   :  { %2958 = vset.pattern.permute.xlu0 %v3440_v33 }
  0x74   :  { %671 = vperm.xlu0 %2958, %v3553_v7  }
  0x75   :  { %634 = vperm.xlu1 %2956, %v3604_v16  }
  0x78   :  { %683 = vperm.xlu0 %2958, %v3570_v10  }
  0x79   :  { %2957 = vset.pattern.permute.xlu1 %v3440_v33 }
  0x7a   :  { %667 = vperm.xlu1 %2957, %v3538_v4  }
  0x7c   :  { %700 = vperm.xlu0 %2958, %v3587_v13  }
  0x7e   :  { %675 = vperm.xlu1 %2957, %v3528_v2  }
  0x80   :  { %708 = vperm.xlu0 %2958, %v3604_v16  }
  0x82   :  { %679 = vperm.xlu1 %2957, %v3544_v5  }
  0x84   :  { %2959 = vset.pattern.permute.xlu0 %v3441_v34 }
  0x85   :  { %741 = vperm.xlu0 %2959, %v3538_v4  }
  0x86   :  { %696 = vperm.xlu1 %2957, %v3561_v8  }
  0x89   :  { %753 = vperm.xlu0 %2959, %v3544_v5  }
  0x8a   :  { %704 = vperm.xlu1 %2957, %v3578_v11  }
  0x8d   :  { %770 = vperm.xlu0 %2959, %v3561_v8  }
  0x8e   :  { %712 = vperm.xlu1 %2957, %v3595_v14  }
  0x91   :  { %778 = vperm.xlu0 %2959, %v3578_v11  }
  0x92   :  { %2960 = vset.pattern.permute.xlu1 %v3441_v34 }
  0x93   :  { %745 = vperm.xlu1 %2960, %v3553_v7  }
  0x95   :  { %786 = vperm.xlu0 %2959, %v3595_v14  }
  0x97   :  { %749 = vperm.xlu1 %2960, %v3528_v2  }
  0x99   :  { %2962 = vset.pattern.permute.xlu0 %v3442_v35 }
  0x9a   :  { %819 = vperm.xlu0 %2962, %v3553_v7  }
  0x9b   :  { %757 = vperm.xlu1 %2960, %v3570_v10  }
  0x9d   :  { %v3719_v36 = vpop.permute.xlu1 %377 }
  0x9e   :  { %5478 = vst [vmem:[#allocation10_spill] sm:$0xff] %v3719_v36  ;;  %831 = vperm.xlu0 %2962, %v3570_v10   ;;  %v3722_v37 = vpop.permute.xlu0 %367 }
  0x9f   :  { %774 = vperm.xlu1 %2960, %v3587_v13  }
  0xa1   :  { %v3725_v38 = vpop.permute.xlu1 %382 }
  0xa2   :  { %848 = vperm.xlu0 %2962, %v3587_v13   ;;  %v3728_v39 = vpop.permute.xlu0 %372 }
  0xa3   :  { %782 = vperm.xlu1 %2960, %v3604_v16  }
  0xa5   :  { %v3731_v40 = vpop.permute.xlu1 %401 }
  0xa6   :  { %856 = vperm.xlu0 %2962, %v3604_v16   ;;  %v3734_v41 = vpop.permute.xlu0 %387 }
  0xa7   :  { %5479 = vst [vmem:[#allocation11_spill] sm:$0xff] %v3734_v41  ;;  %2961 = vset.pattern.permute.xlu1 %v3442_v35 }
  0xa8   :  { %815 = vperm.xlu1 %2961, %v3538_v4  }
  0xa9   :  { %v3737_v42 = vpop.permute.xlu1 %411 }
  0xaa   :  { %5480 = vst [vmem:[#allocation12_spill] sm:$0xff] %v3737_v42  ;;  %2963 = vset.pattern.permute.xlu0 %v3443_v43  ;;  %v3739_v44 = vpop.permute.xlu0 %406 }
  0xab   :  { %889 = vperm.xlu0 %2963, %v3538_v4  }
  0xac   :  { %823 = vperm.xlu1 %2961, %v3528_v2  }
  0xad   :  { %v3743_v45 = vpop.permute.xlu1 %421 }
  0xae   :  { %5481 = vst [vmem:[#allocation13_spill] sm:$0xff] %v3743_v45  ;;  %v3745_v46 = vpop.permute.xlu0 %416 }
  0xaf   :  { %901 = vperm.xlu0 %2963, %v3544_v5  }
  0xb0   :  { %827 = vperm.xlu1 %2961, %v3544_v5  }
  0xb2   :  { %v3749_v47 = vpop.permute.xlu1 %449 }
  0xb3   :  { %918 = vperm.xlu0 %2963, %v3561_v8  }
  0xb4   :  { %844 = vperm.xlu1 %2961, %v3561_v8   ;;  %v3753_v48 = vpop.permute.xlu0 %445 }
  0xb6   :  { %v3755_v49 = vpop.permute.xlu1 %453 }
  0xb7   :  { %5482 = vst [vmem:[#allocation14_spill] sm:$0xff] %v3755_v49  ;;  %926 = vperm.xlu0 %2963, %v3578_v11  }
  0xb8   :  { %852 = vperm.xlu1 %2961, %v3578_v11   ;;  %v3759_v50 = vpop.permute.xlu0 %457 }
  0xba   :  { %v3761_v51 = vpop.permute.xlu1 %461 }
  0xbb   :  { %5483 = vst [vmem:[#allocation15_spill] sm:$0xff] %v3761_v51  ;;  %934 = vperm.xlu0 %2963, %v3595_v14  }
  0xbc   :  { %860 = vperm.xlu1 %2961, %v3595_v14   ;;  %v3765_v52 = vpop.permute.xlu0 %474 }
  0xbe   :  { %v3767_v53 = vpop.permute.xlu1 %478 }
  0xbf   :  { %2966 = vset.pattern.permute.xlu0 %v3444_v54 }
  0xc0   :  { %2964 = vset.pattern.permute.xlu1 %v3443_v43  ;;  %967 = vperm.xlu0 %2966, %v3553_v7   ;;  %v3770_v55 = vpop.permute.xlu0 %482 }
  0xc1   :  { %5484 = vst [vmem:[#allocation16_spill] sm:$0xff] %v3770_v55  ;;  %893 = vperm.xlu1 %2964, %v3553_v7  }
  0xc2   :  { %v3773_v56 = vpop.permute.xlu1 %486 }
  0xc4   :  { %979 = vperm.xlu0 %2966, %v3570_v10   ;;  %v3776_v57 = vpop.permute.xlu0 %490 }
  0xc5   :  { %5485 = vst [vmem:[#allocation17_spill] sm:$0xff] %v3776_v57  ;;  %897 = vperm.xlu1 %2964, %v3528_v2  }
  0xc7   :  { %v3779_v58 = vpop.permute.xlu1 %519 }
  0xc8   :  { %996 = vperm.xlu0 %2966, %v3587_v13  }
  0xc9   :  { %905 = vperm.xlu1 %2964, %v3570_v10   ;;  %v3783_v59 = vpop.permute.xlu0 %523 }
  0xcb   :  { %v3785_v60 = vpop.permute.xlu1 %527 }
  0xcc   :  { %5486 = vst [vmem:[#allocation18_spill] sm:$0xff] %v3785_v60  ;;  %1004 = vperm.xlu0 %2966, %v3604_v16  }
  0xcd   :  { %922 = vperm.xlu1 %2964, %v3587_v13   ;;  %v3789_v61 = vpop.permute.xlu0 %535 }
  0xce   :  { %5487 = vst [vmem:[#allocation19_spill] sm:$0xff] %v3789_v61 }
  0xcf   :  { %v3791_v62 = vpop.permute.xlu1 %531 }
  0xd0   :  { %2967 = vset.pattern.permute.xlu0 %v3445_v63 }
  0xd1   :  { %930 = vperm.xlu1 %2964, %v3604_v16   ;;  %v3794_v0 = vpop.permute.xlu0 %552  ;;  %1037 = vperm.xlu0 %2967, %v3538_v4  }
  0xd3   :  { %v3797_v6 = vpop.permute.xlu1 %548 }
  0xd5   :  { %2965 = vset.pattern.permute.xlu1 %v3444_v54  ;;  %v3800_v9 = vpop.permute.xlu0 %560  ;;  %1049 = vperm.xlu0 %2967, %v3544_v5  }
  0xd6   :  { %963 = vperm.xlu1 %2965, %v3538_v4  }
  0xd7   :  { %v3804_v12 = vpop.permute.xlu1 %556 }
  0xd8   :  { %5488 = vst [vmem:[#allocation20_spill] sm:$0xff] %v3804_v12  ;;  %v3448_v12 = vmov 12  }
  0xd9   :  { %1066 = vperm.xlu0 %2967, %v3561_v8  }
  0xda   :  { %971 = vperm.xlu1 %2965, %v3528_v2   ;;  %v3808_v15 = vpop.permute.xlu0 %593 }
  0xdb   :  { %v3810_v17 = vpop.permute.xlu1 %564 }
  0xdc   :  { %5489 = vst [vmem:[#allocation21_spill] sm:$0xff] %v3810_v17 }
  0xdd   :  { %1074 = vperm.xlu0 %2967, %v3578_v11  }
  0xde   :  { %975 = vperm.xlu1 %2965, %v3544_v5   ;;  %v3814_v18 = vpop.permute.xlu0 %605 }
  0xe0   :  { %v3816_v19 = vpop.permute.xlu1 %597 }
  0xe1   :  { %1082 = vperm.xlu0 %2967, %v3595_v14  }
  0xe2   :  { %992 = vperm.xlu1 %2965, %v3561_v8   ;;  %v3820_v20 = vpop.permute.xlu0 %622 }
  0xe4   :  { %v3822_v21 = vpop.permute.xlu1 %601 }
  0xe5   :  { %5490 = vst [vmem:[#allocation22_spill] sm:$0xff] %v3822_v21  ;;  %2970 = vset.pattern.permute.xlu0 %v3446_v22 }
  0xe6   :  { %1000 = vperm.xlu1 %2965, %v3578_v11   ;;  %v3825_v23 = vpop.permute.xlu0 %630  ;;  %1115 = vperm.xlu0 %2970, %v3553_v7  }
  0xe7   :  { %5491 = vst [vmem:[#allocation23_spill] sm:$0xff] %v3825_v23 }
  0xe8   :  { %v3828_v24 = vpop.permute.xlu1 %609 }
  0xe9   :  { %5492 = vst [vmem:[#allocation24_spill] sm:$0xff] %v3828_v24 }
  0xea   :  { %1008 = vperm.xlu1 %2965, %v3595_v14   ;;  %v3831_v25 = vpop.permute.xlu0 %638  ;;  %1127 = vperm.xlu0 %2970, %v3570_v10  }
  0xeb   :  { %5493 = vst [vmem:[#allocation25_spill] sm:$0xff] %v3831_v25 }
  0xec   :  { %v3834_v26 = vpop.permute.xlu1 %626 }
  0xee   :  { %2968 = vset.pattern.permute.xlu1 %v3445_v63  ;;  %1144 = vperm.xlu0 %2970, %v3587_v13  }
  0xef   :  { %1041 = vperm.xlu1 %2968, %v3553_v7   ;;  %v3838_v27 = vpop.permute.xlu0 %671 }
  0xf0   :  { %v3840_v28 = vpop.permute.xlu1 %634 }
  0xf2   :  { %1152 = vperm.xlu0 %2970, %v3604_v16  }
  0xf3   :  { %1045 = vperm.xlu1 %2968, %v3528_v2   ;;  %v3844_v29 = vpop.permute.xlu0 %683 }
  0xf4   :  { %5494 = vst [vmem:[#allocation26_spill] sm:$0xff] %v3844_v29 }
  0xf5   :  { %v3846_v30 = vpop.permute.xlu1 %667 }
  0xf6   :  { %2971 = vset.pattern.permute.xlu0 %v3447_v31 }
  0xf7   :  { %1053 = vperm.xlu1 %2968, %v3570_v10   ;;  %v3849_v32 = vpop.permute.xlu0 %700  ;;  %1185 = vperm.xlu0 %2971, %v3538_v4  }
  0xf9   :  { %v3852_v33 = vpop.permute.xlu1 %675 }
  0xfa   :  { %5495 = vst [vmem:[#allocation27_spill] sm:$0xff] %v3852_v33 }
  0xfb   :  { %1070 = vperm.xlu1 %2968, %v3587_v13   ;;  %v3855_v34 = vpop.permute.xlu0 %708  ;;  %1197 = vperm.xlu0 %2971, %v3544_v5  }
  0xfc   :  { %5496 = vst [vmem:[#allocation28_spill] sm:$0xff] %v3855_v34 }
  0xfd   :  { %v3858_v35 = vpop.permute.xlu1 %679 }
  0xff   :  { %1078 = vperm.xlu1 %2968, %v3604_v16   ;;  %1214 = vperm.xlu0 %2971, %v3561_v8  }
 0x100   :  { %v3862_v43 = vpop.permute.xlu0 %741 }
 0x101   :  { %v3864_v54 = vpop.permute.xlu1 %696 }
 0x103   :  { %2969 = vset.pattern.permute.xlu1 %v3446_v22  ;;  %1222 = vperm.xlu0 %2971, %v3578_v11  }
 0x104   :  { %1111 = vperm.xlu1 %2969, %v3538_v4   ;;  %v3868_v63 = vpop.permute.xlu0 %753 }
 0x105   :  { %5497 = vst [vmem:[#allocation29_spill] sm:$0xff] %v3868_v63  ;;  %v3870_v3 = vpop.permute.xlu1 %704 }
 0x106   :  { %5498 = vst [vmem:[#allocation30_spill] sm:$0xff] %v3870_v3 }
 0x107   :  { %1230 = vperm.xlu0 %2971, %v3595_v14  }
 0x108   :  { %1119 = vperm.xlu1 %2969, %v3528_v2   ;;  %v3874_v1 = vpop.permute.xlu0 %770 }
 0x109   :  { %v3876_v23 = vpop.permute.xlu1 %712 }
 0x10a   :  { %5499 = vst [vmem:[#allocation31_spill] sm:$0xff] %v3876_v23 }
 0x10b   :  { %2974 = vset.pattern.permute.xlu0 %v3448_v12 }
 0x10c   :  { %1123 = vperm.xlu1 %2969, %v3544_v5   ;;  %v3879_v22 = vpop.permute.xlu0 %778  ;;  %1263 = vperm.xlu0 %2974, %v3553_v7  }
 0x10d   :  { %5500 = vst [vmem:[#allocation32_spill] sm:$0xff] %v3879_v22 }
 0x10e   :  { %v3882_v33 = vpop.permute.xlu1 %745 }
 0x110   :  { %1140 = vperm.xlu1 %2969, %v3561_v8   ;;  %v3885_v3 = vpop.permute.xlu0 %786  ;;  %1275 = vperm.xlu0 %2974, %v3570_v10  }
 0x111   :  { %5501 = vst [vmem:[#allocation33_spill] sm:$0xff] %v3885_v3  ;;  %v3449_v3 = vmov 13  }
 0x112   :  { %v3888_v21 = vpop.permute.xlu1 %749 }
 0x113   :  { %5502 = vst [vmem:[#allocation34_spill] sm:$0xff] %v3888_v21 }
 0x114   :  { %1148 = vperm.xlu1 %2969, %v3578_v11   ;;  %1292 = vperm.xlu0 %2974, %v3587_v13  }
 0x115   :  { %v3892_v55 = vpop.permute.xlu0 %819 }
 0x116   :  { %v3894_v60 = vpop.permute.xlu1 %757 }
 0x117   :  { %5503 = vst [vmem:[#allocation35_spill] sm:$0xff] %v3894_v60 }
 0x118   :  { %1156 = vperm.xlu1 %2969, %v3595_v14   ;;  %1300 = vperm.xlu0 %2974, %v3604_v16  }
 0x119   :  { %v3898_v22 = vpop.permute.xlu0 %831 }
 0x11a   :  { %5504 = vst [vmem:[#allocation36_spill] sm:$0xff] %v3898_v22  ;;  %v3900_v49 = vpop.permute.xlu1 %774 }
 0x11c   :  { %2972 = vset.pattern.permute.xlu1 %v3447_v31  ;;  %2975 = vset.pattern.permute.xlu0 %v3449_v3 }
 0x11d   :  { %1189 = vperm.xlu1 %2972, %v3553_v7   ;;  %v3903_v21 = vpop.permute.xlu0 %848  ;;  %1333 = vperm.xlu0 %2975, %v3538_v4  }
 0x11e   :  { %5505 = vst [vmem:[#allocation37_spill] sm:$0xff] %v3903_v21  ;;  %v3906_v42 = vpop.permute.xlu1 %782 }
 0x11f   :  { %5506 = vst [vmem:[#allocation38_spill] sm:$0xff] %v3906_v42 }
 0x121   :  { %1193 = vperm.xlu1 %2972, %v3528_v2   ;;  %v3909_v60 = vpop.f32.mrf.mxu0  ;;  %v3911_v23 = vpop.permute.xlu0 %856  ;;  %1345 = vperm.xlu0 %2975, %v3544_v5  }
 0x123   :  { %v3914_v22 = vpop.permute.xlu1 %815  ;;  %v2867_v31 = vpop.f32.mrf.mxu0 }
 0x125   :  { %1201 = vperm.xlu1 %2972, %v3570_v10   ;;  %v3917_v36 = vpop.f32.mrf.mxu0  ;;  %1362 = vperm.xlu0 %2975, %v3561_v8  }
 0x126   :  { %v3919_v25 = vpop.permute.xlu0 %889 }
 0x127   :  { %v3922_v29 = vpop.permute.xlu1 %823  ;;  %v2870_v17 = vpop.f32.mrf.mxu0 }
 0x128   :  { %5507 = vst [vmem:[#allocation39_spill] sm:$0xff] %v3922_v29  ;;  %v3450_v29 = vmov 14  }
 0x129   :  { %1218 = vperm.xlu1 %2972, %v3587_v13   ;;  %1370 = vperm.xlu0 %2975, %v3578_v11  }
 0x12a   :  { %v3925_v24 = vpop.permute.xlu0 %901 }
 0x12b   :  { %5508 = vst [vmem:[#allocation40_spill] sm:$0xff] %v3925_v24  ;;  %v3928_v61 = vpop.permute.xlu1 %827 }
 0x12d   :  { %1226 = vperm.xlu1 %2972, %v3604_v16   ;;  %1378 = vperm.xlu0 %2975, %v3595_v14  }
 0x12e   :  { %v3931_v31 = vpop.permute.xlu0 %918 }
 0x12f   :  { %5509 = vst [vmem:[#allocation41_spill] sm:$0xff] %v3931_v31  ;;  %v3934_v57 = vpop.permute.xlu1 %844 }
 0x131   :  { %2973 = vset.pattern.permute.xlu1 %v3448_v12  ;;  %2978 = vset.pattern.permute.xlu0 %v3450_v29 }
 0x132   :  { %1259 = vperm.xlu1 %2973, %v3538_v4   ;;  %v3937_v17 = vpop.permute.xlu0 %926  ;;  %1411 = vperm.xlu0 %2978, %v3553_v7  }
 0x133   :  { %5510 = vst [vmem:[#allocation42_spill] sm:$0xff] %v3937_v17  ;;  %v3939_v45 = vpop.permute.xlu1 %852 }
 0x134   :  { %5511 = vst [vmem:[#allocation43_spill] sm:$0xff] %v3939_v45 }
 0x136   :  { %1267 = vperm.xlu1 %2973, %v3528_v2   ;;  %v3943_v51 = vpop.permute.xlu0 %934  ;;  %1423 = vperm.xlu0 %2978, %v3570_v10  }
 0x137   :  { %5512 = vst [vmem:[#allocation44_spill] sm:$0xff] %v3943_v51  ;;  %v3945_v41 = vpop.permute.xlu1 %860 }
 0x138   :  { %5513 = vst [vmem:[#allocation45_spill] sm:$0xff] %v3945_v41  ;;  %v5404_v41 = vmov 15  }
 0x13a   :  { %1271 = vperm.xlu1 %2973, %v3544_v5   ;;  %1440 = vperm.xlu0 %2978, %v3587_v13  }
 0x13b   :  { %v3949_v12 = vpop.permute.xlu0 %967 }
 0x13c   :  { %5514 = vst [vmem:[#allocation46_spill] sm:$0xff] %v3949_v12  ;;  %v3952_v17 = vpop.permute.xlu1 %893 }
 0x13d   :  { %5515 = vst [vmem:[#allocation47_spill] sm:$0xff] %v3952_v17 }
 0x13e   :  { %1288 = vperm.xlu1 %2973, %v3561_v8   ;;  %1448 = vperm.xlu0 %2978, %v3604_v16  }
 0x13f   :  { %v3955_v45 = vpop.permute.xlu0 %979 }
 0x140   :  { %5516 = vst [vmem:[#allocation48_spill] sm:$0xff] %v3955_v45  ;;  %v3958_v42 = vpop.permute.xlu1 %897 }
 0x141   :  { %5517 = vst [vmem:[#allocation49_spill] sm:$0xff] %v3958_v42 }
 0x142   :  { %1296 = vperm.xlu1 %2973, %v3578_v11   ;;  %2979 = vset.pattern.permute.xlu0 %v5404_v41 }
 0x143   :  { %v3961_v51 = vpop.permute.xlu0 %996  ;;  %1481 = vperm.xlu0 %2979, %v3538_v4  }
 0x144   :  { %5518 = vst [vmem:[#allocation50_spill] sm:$0xff] %v3961_v51  ;;  %v3964_v24 = vpop.permute.xlu1 %905 }
 0x145   :  { %5519 = vst [vmem:[#allocation51_spill] sm:$0xff] %v3964_v24 }
 0x146   :  { %1304 = vperm.xlu1 %2973, %v3595_v14  }
 0x147   :  { %v3968_v63 = vpop.permute.xlu0 %1004  ;;  %1493 = vperm.xlu0 %2979, %v3544_v5  }
 0x148   :  { %5520 = vst [vmem:[#allocation52_spill] sm:$0xff] %v3968_v63  ;;  %v3970_v45 = vpop.permute.xlu1 %922 }
 0x149   :  { %5521 = vst [vmem:[#allocation53_spill] sm:$0xff] %v3970_v45 }
 0x14a   :  { %2976 = vset.pattern.permute.xlu1 %v3449_v3 }
 0x14b   :  { %1337 = vperm.xlu1 %2976, %v3553_v7   ;;  %1510 = vperm.xlu0 %2979, %v3561_v8  }
 0x14c   :  { %v3974_v42 = vpop.permute.xlu1 %930  ;;  %v3976_v51 = vpop.permute.xlu0 %1037 }
 0x14d   :  { %5522 = vst [vmem:[#allocation54_spill] sm:$0xff] %v3974_v42  ;;  %5523 = vst [vmem:[#allocation55_spill] sm:$0xff] %v3976_v51  ;;  %v5405_v51 = vmov 16  }
 0x14f   :  { %1341 = vperm.xlu1 %2976, %v3528_v2   ;;  %1518 = vperm.xlu0 %2979, %v3578_v11  }
 0x150   :  { %v3980_v41 = vpop.permute.xlu0 %1049 }
 0x151   :  { %5524 = vst [vmem:[#allocation56_spill] sm:$0xff] %v3980_v41  ;;  %v3983_v24 = vpop.permute.xlu1 %963 }
 0x152   :  { %5525 = vst [vmem:[#allocation57_spill] sm:$0xff] %v3983_v24 }
 0x153   :  { %1349 = vperm.xlu1 %2976, %v3570_v10   ;;  %1526 = vperm.xlu0 %2979, %v3595_v14  }
 0x154   :  { %v3986_v63 = vpop.permute.xlu0 %1066 }
 0x155   :  { %5526 = vst [vmem:[#allocation58_spill] sm:$0xff] %v3986_v63  ;;  %v3989_v3 = vpop.permute.xlu1 %971 }
 0x156   :  { %5527 = vst [vmem:[#allocation59_spill] sm:$0xff] %v3989_v3  ;;  %v232_v3 = vld [vmem:[#allocation4 + $0x78] sm:$0xff] }
 0x157   :  { %1366 = vperm.xlu1 %2976, %v3587_v13   ;;  %2982 = vset.pattern.permute.xlu0 %v5405_v51  ;;  %v5534_v51 = vmov 0.0  }
 0x158   :  { %v3992_v42 = vpop.permute.xlu0 %1074  ;;  %1559 = vperm.xlu0 %2982, %v3553_v7   ;;  %2875 = vmatpush3.xpose.msk.msra.mxu1 %vm233_vm2, %v232_v3  ;;  %v5406_v3 = vmov 17  }
 0x159   :  { %5528 = vst [vmem:[#allocation60_spill] sm:$0xff] %v3992_v42  ;;  %v3995_v41 = vpop.permute.xlu1 %975  ;;  %2876 = vmatprep.subr.mxu1 %v5534_v51 }
 0x15a   :  { %5529 = vst [vmem:[#allocation61_spill] sm:$0xff] %v3995_v41 }
 0x15b   :  { %1374 = vperm.xlu1 %2976, %v3604_v16  }
 0x15c   :  { %v3999_v24 = vpop.permute.xlu0 %1082  ;;  %1571 = vperm.xlu0 %2982, %v3570_v10  }
 0x15d   :  { %5530 = vst [vmem:[#allocation62_spill] sm:$0xff] %v3999_v24  ;;  %v4001_v63 = vpop.permute.xlu1 %992  ;;  %v231_v24 = vld [vmem:[#allocation4 + $0x70] sm:$0xff] }
 0x15e   :  { %5531 = vst [vmem:[#allocation63_spill] sm:$0xff] %v4001_v63  ;;  %2877 = vmatpush3.xpose.msk.msra.mxu1 %vm233_vm2, %v231_v24 }
 0x15f   :  { %2977 = vset.pattern.permute.xlu1 %v3450_v29  ;;  %2878 = vmatprep.subr.mxu1 %v5534_v51 }
 0x160   :  { %1407 = vperm.xlu1 %2977, %v3538_v4   ;;  %1588 = vperm.xlu0 %2982, %v3587_v13  }
 0x161   :  { %v4005_v42 = vpop.permute.xlu1 %1000  ;;  %v4007_v34 = vpop.permute.xlu0 %1115 }
 0x162   :  { %5532 = vst [vmem:[#allocation64_spill] sm:$0xff] %v4005_v42  ;;  %5533 = vst [vmem:[#allocation65_spill] sm:$0xff] %v4007_v34  ;;  %v230_v42 = vld [vmem:[#allocation4 + $0x68] sm:$0xff] }
 0x163   :  { %2879 = vmatpush3.xpose.msk.msra.mxu1 %vm233_vm2, %v230_v42 }
 0x164   :  { %1415 = vperm.xlu1 %2977, %v3528_v2   ;;  %1596 = vperm.xlu0 %2982, %v3604_v16  }
 0x165   :  { %v4013_v63 = vpop.permute.xlu1 %1008  ;;  %v4015_v29 = vpop.permute.xlu0 %1127  ;;  %2880 = vmatprep.subr.mxu1 %v5534_v51 }
 0x166   :  { %5535 = vst [vmem:[#allocation66_spill] sm:$0xff] %v4013_v63  ;;  %5536 = vst [vmem:[#allocation67_spill] sm:$0xff] %v4015_v29  ;;  %v229_v29 = vld [vmem:[#allocation4 + $0x60] sm:$0xff] }
 0x167   :  { %2881 = vmatpush3.xpose.msk.msra.mxu1 %vm233_vm2, %v229_v29 }
 0x168   :  { %1419 = vperm.xlu1 %2977, %v3544_v5   ;;  %2983 = vset.pattern.permute.xlu0 %v5406_v3  ;;  %v228_v3 = vld [vmem:[#allocation4 + $0x58] sm:$0xff] }
 0x169   :  { %v4021_v34 = vpop.permute.xlu0 %1144  ;;  %1629 = vperm.xlu0 %2983, %v3538_v4   ;;  %2882 = vmatprep.subr.mxu1 %v5534_v51 }
 0x16a   :  { %5537 = vst [vmem:[#allocation68_spill] sm:$0xff] %v4021_v34  ;;  %v4024_v41 = vpop.permute.xlu1 %1041 }
 0x16b   :  { %5538 = vst [vmem:[#allocation69_spill] sm:$0xff] %v4024_v41  ;;  %2883 = vmatpush3.xpose.msk.msra.mxu1 %vm233_vm2, %v228_v3 }
 0x16c   :  { %1436 = vperm.xlu1 %2977, %v3561_v8   ;;  %2884 = vmatprep.subr.mxu1 %v5534_v51 }
 0x16d   :  { %v4030_v24 = vpop.permute.xlu0 %1152  ;;  %1641 = vperm.xlu0 %2983, %v3544_v5  }
 0x16e   :  { %5539 = vst [vmem:[#allocation70_spill] sm:$0xff] %v4030_v24  ;;  %v4032_v63 = vpop.permute.xlu1 %1045 }
 0x16f   :  { %5540 = vst [vmem:[#allocation71_spill] sm:$0xff] %v4032_v63  ;;  %v227_v63 = vld [vmem:[#allocation4 + $0x50] sm:$0xff] }
 0x170   :  { %1444 = vperm.xlu1 %2977, %v3578_v11   ;;  %2885 = vmatpush3.xpose.msk.msra.mxu1 %vm233_vm2, %v227_v63 }
 0x171   :  { %1658 = vperm.xlu0 %2983, %v3561_v8   ;;  %2886 = vmatprep.subr.mxu1 %v5534_v51 }
 0x172   :  { %v4038_v34 = vpop.permute.xlu1 %1053  ;;  %v4040_v42 = vpop.permute.xlu0 %1185 }
 0x173   :  { %5541 = vst [vmem:[#allocation72_spill] sm:$0xff] %v4038_v34  ;;  %5542 = vst [vmem:[#allocation73_spill] sm:$0xff] %v4040_v42  ;;  %v226_v34 = vld [vmem:[#allocation4 + $0x48] sm:$0xff]  ;;  %v5545_v42 = vmov 15  }
 0x174   :  { %1452 = vperm.xlu1 %2977, %v3595_v14   ;;  %2887 = vmatpush3.xpose.msk.msra.mxu1 %vm233_vm2, %v226_v34 }
 0x175   :  { %1666 = vperm.xlu0 %2983, %v3578_v11   ;;  %2888 = vmatprep.subr.mxu1 %v5534_v51 }
 0x176   :  { %v4046_v24 = vpop.permute.xlu1 %1070  ;;  %v4048_v29 = vpop.permute.xlu0 %1197 }
 0x177   :  { %5543 = vst [vmem:[#allocation74_spill] sm:$0xff] %v4046_v24  ;;  %5544 = vst [vmem:[#allocation75_spill] sm:$0xff] %v4048_v29  ;;  %v225_v29 = vld [vmem:[#allocation4 + $0x40] sm:$0xff]  ;;  %v5407_v24 = vmov 18  }
 0x178   :  { %2980 = vset.pattern.permute.xlu1 %v5545_v42  ;;  %2889 = vmatpush3.xpose.msk.msra.mxu1 %vm233_vm2, %v225_v29  ;;  %v223_v29 = vld [vmem:[#allocation4 + $0x30] sm:$0xff] }
 0x179   :  { %1485 = vperm.xlu1 %2980, %v3553_v7   ;;  %1674 = vperm.xlu0 %2983, %v3595_v14  }
 0x17a   :  { %v4055_v3 = vpop.permute.xlu1 %1078  ;;  %v4057_v41 = vpop.permute.xlu0 %1214  ;;  %2890 = vmatprep.subr.mxu1 %v5534_v51 }
 0x17b   :  { %5546 = vst [vmem:[#allocation76_spill] sm:$0xff] %v4055_v3  ;;  %5547 = vst [vmem:[#allocation77_spill] sm:$0xff] %v4057_v41  ;;  %v224_v41 = vld [vmem:[#allocation4 + $0x38] sm:$0xff] }
 0x17c   :  { %2891 = vmatpush3.xpose.msk.msra.mxu1 %vm233_vm2, %v224_v41  ;;  %v222_v41 = vld [vmem:[#allocation4 + $0x28] sm:$0xff] }
 0x17d   :  { %1489 = vperm.xlu1 %2980, %v3528_v2   ;;  %2986 = vset.pattern.permute.xlu0 %v5407_v24 }
 0x17e   :  { %v4063_v63 = vpop.permute.xlu0 %1222  ;;  %1707 = vperm.xlu0 %2986, %v3553_v7   ;;  %2892 = vmatprep.subr.mxu1 %v5534_v51 }
 0x17f   :  { %5548 = vst [vmem:[#allocation78_spill] sm:$0xff] %v4063_v63  ;;  %v4067_v42 = vpop.permute.xlu1 %1111 }
 0x180   :  { %5549 = vst [vmem:[#allocation79_spill] sm:$0xff] %v4067_v42  ;;  %2893 = vmatpush3.xpose.msk.msra.mxu1 %vm233_vm2, %v223_v29  ;;  %v221_v29 = vld [vmem:[#allocation4 + $0x20] sm:$0xff]  ;;  %v5556_v42 = vmov 16  }
 0x181   :  { %1497 = vperm.xlu1 %2980, %v3570_v10   ;;  %2894 = vmatprep.subr.mxu1 %v5534_v51 }
 0x182   :  { %v4072_v34 = vpop.permute.xlu0 %1230  ;;  %1719 = vperm.xlu0 %2986, %v3570_v10  }
 0x183   :  { %5550 = vst [vmem:[#allocation80_spill] sm:$0xff] %v4072_v34  ;;  %v4075_v3 = vpop.permute.xlu1 %1119 }
 0x184   :  { %5551 = vst [vmem:[#allocation81_spill] sm:$0xff] %v4075_v3  ;;  %2895 = vmatpush3.xpose.msk.msra.mxu1 %vm233_vm2, %v222_v41  ;;  %v5408_v41 = vmov 19  }
 0x185   :  { %1514 = vperm.xlu1 %2980, %v3587_v13   ;;  %2896 = vmatprep.subr.mxu1 %v5534_v51 }
 0x186   :  { %1736 = vperm.xlu0 %2986, %v3587_v13  }
 0x187   :  { %v4081_v24 = vpop.permute.xlu1 %1123  ;;  %v4083_v63 = vpop.permute.xlu0 %1263 }
 0x188   :  { %5552 = vst [vmem:[#allocation82_spill] sm:$0xff] %v4081_v24  ;;  %5553 = vst [vmem:[#allocation83_spill] sm:$0xff] %v4083_v63  ;;  %2897 = vmatpush3.xpose.msk.msra.mxu1 %vm233_vm2, %v221_v29  ;;  %v219_v29 = vld [vmem:[#allocation4 + $0x10] sm:$0xff] }
 0x189   :  { %1522 = vperm.xlu1 %2980, %v3604_v16   ;;  %2898 = vmatprep.subr.mxu1 %v5534_v51 }
 0x18a   :  { %1744 = vperm.xlu0 %2986, %v3604_v16  }
 0x18b   :  { %v4089_v3 = vpop.permute.xlu1 %1140  ;;  %v4091_v34 = vpop.permute.xlu0 %1275 }
 0x18c   :  { %5554 = vst [vmem:[#allocation84_spill] sm:$0xff] %v4089_v3  ;;  %5555 = vst [vmem:[#allocation85_spill] sm:$0xff] %v4091_v34  ;;  %v220_v34 = vld [vmem:[#allocation4 + $0x18] sm:$0xff] }
 0x18d   :  { %2981 = vset.pattern.permute.xlu1 %v5556_v42  ;;  %2899 = vmatpush3.xpose.msk.msra.mxu1 %vm233_vm2, %v220_v34 }
 0x18e   :  { %1555 = vperm.xlu1 %2981, %v3538_v4   ;;  %2987 = vset.pattern.permute.xlu0 %v5408_v41 }
 0x18f   :  { %v4098_v24 = vpop.permute.xlu1 %1148  ;;  %v4100_v63 = vpop.permute.xlu0 %1292  ;;  %1777 = vperm.xlu0 %2987, %v3538_v4   ;;  %2900 = vmatprep.subr.mxu1 %v5534_v51 }
 0x190   :  { %5557 = vst [vmem:[#allocation86_spill] sm:$0xff] %v4098_v24  ;;  %5558 = vst [vmem:[#allocation87_spill] sm:$0xff] %v4100_v63  ;;  %v4113_v24 = vpop.f32.mrf.mxu0  ;;  %v218_v63 = vld [vmem:[#allocation4 + $0x8] sm:$0xff] }
 0x191   :  { %5561 = vst [vmem:[#allocation90_spill] sm:$0xff] %v4113_v24  ;;  %2901 = vmatpush3.xpose.msk.msra.mxu1 %vm233_vm2, %v219_v29 }
 0x192   :  { %1563 = vperm.xlu1 %2981, %v3528_v2   ;;  %v2873_v41 = vpop.f32.mrf.mxu0  ;;  %2902 = vmatprep.subr.mxu1 %v5534_v51 }
 0x193   :  { %v4107_v42 = vpop.permute.xlu1 %1156  ;;  %v4109_v3 = vpop.permute.xlu0 %1300  ;;  %1789 = vperm.xlu0 %2987, %v3544_v5   ;;  %v216_v41 = vld [vmem:[%s5394_s3] sm:$0xff] }
 0x194   :  { %5559 = vst [vmem:[#allocation88_spill] sm:$0xff] %v4107_v42  ;;  %5560 = vst [vmem:[#allocation89_spill] sm:$0xff] %v4109_v3  ;;  %v217_v3 = vld [vmem:[#allocation4] sm:$0xff] }
 0x195   :  { %2903 = vmatpush3.xpose.msk.msra.mxu1 %vm233_vm2, %v218_v63 }
 0x196   :  { %1567 = vperm.xlu1 %2981, %v3544_v5   ;;  %2904 = vmatprep.subr.mxu1 %v5534_v51 }
 0x197   :  { %1806 = vperm.xlu0 %2987, %v3561_v8  }
 0x198   :  { %v4118_v34 = vpop.permute.xlu1 %1189  ;;  %v4120_v42 = vpop.permute.xlu0 %1333 }
 0x199   :  { %5562 = vst [vmem:[#allocation91_spill] sm:$0xff] %v4118_v34  ;;  %5563 = vst [vmem:[#allocation92_spill] sm:$0xff] %v4120_v42  ;;  %2905 = vmatpush3.xpose.msk.msra.mxu1 %vm233_vm2, %v217_v3  ;;  %v5415_v34 = vmov 25  }
 0x19a   :  { %1584 = vperm.xlu1 %2981, %v3561_v8  }
 0x19b   :  { %1814 = vperm.xlu0 %2987, %v3578_v11  }
 0x19c   :  { %v4126_v24 = vpop.permute.xlu1 %1193  ;;  %v4128_v29 = vpop.permute.xlu0 %1345  ;;  %2907 = vmatmul.mubr.msk.f32.vlgmr.msra.gmra.mxu1 %vm233_vm2, %v216_v41 }
 0x19d   :  { %5564 = vst [vmem:[#allocation93_spill] sm:$0xff] %v4126_v24  ;;  %5565 = vst [vmem:[#allocation94_spill] sm:$0xff] %v4128_v29  ;;  %v5410_v24 = vmov 20   ;;  %v5570_v29 = vmov 17  }
 0x19e   :  { %1592 = vperm.xlu1 %2981, %v3578_v11  }
 0x19f   :  { %1822 = vperm.xlu0 %2987, %v3595_v14  }
 0x1a0   :  { %v4136_v42 = vpop.permute.xlu1 %1201  ;;  %v4139_v51 = vpop.permute.xlu0 %1362 }
 0x1a1   :  { %5566 = vst [vmem:[#allocation95_spill] sm:$0xff] %v4136_v42  ;;  %5567 = vst [vmem:[#allocation96_spill] sm:$0xff] %v4139_v51 }
 0x1a2   :  { %1600 = vperm.xlu1 %2981, %v3595_v14  }
 0x1a3   :  { %2990 = vset.pattern.permute.xlu0 %v5410_v24 }
 0x1a4   :  { %v4143_v63 = vpop.permute.xlu1 %1218  ;;  %v4146_v3 = vpop.permute.xlu0 %1370  ;;  %1855 = vperm.xlu0 %2990, %v3553_v7  }
 0x1a5   :  { %5568 = vst [vmem:[#allocation97_spill] sm:$0xff] %v4143_v63  ;;  %5569 = vst [vmem:[#allocation98_spill] sm:$0xff] %v4146_v3 }
 0x1a6   :  { %2984 = vset.pattern.permute.xlu1 %v5570_v29 }
 0x1a7   :  { %1633 = vperm.xlu1 %2984, %v3553_v7  }
 0x1a8   :  { %v4151_v42 = vpop.permute.xlu1 %1226  ;;  %v4153_v51 = vpop.permute.xlu0 %1378  ;;  %1867 = vperm.xlu0 %2990, %v3570_v10  }
 0x1a9   :  { %5571 = vst [vmem:[#allocation99_spill] sm:$0xff] %v4151_v42  ;;  %5572 = vst [vmem:[#allocation100_spill] sm:$0xff] %v4153_v51  ;;  %v5411_v51 = vmov 21  }
 0x1ab   :  { %1637 = vperm.xlu1 %2984, %v3528_v2  }
 0x1ac   :  { %1884 = vperm.xlu0 %2990, %v3587_v13  }
 0x1ad   :  { %v4157_v41 = vpop.permute.xlu1 %1259  ;;  %v4160_v24 = vpop.permute.xlu0 %1411 }
 0x1ae   :  { %5573 = vst [vmem:[#allocation101_spill] sm:$0xff] %v4157_v41  ;;  %5574 = vst [vmem:[#allocation102_spill] sm:$0xff] %v4160_v24 }
 0x1af   :  { %1645 = vperm.xlu1 %2984, %v3570_v10  }
 0x1b0   :  { %1892 = vperm.xlu0 %2990, %v3604_v16  }
 0x1b1   :  { %v4163_v3 = vpop.permute.xlu1 %1267  ;;  %v4166_v7 = vpop.permute.xlu0 %1423 }
 0x1b2   :  { %5575 = vst [vmem:[#allocation103_spill] sm:$0xff] %v4163_v3  ;;  %5576 = vst [vmem:[#allocation104_spill] sm:$0xff] %v4166_v7  ;;  %v5581_v7 = vmov 18  }
 0x1b3   :  { %1662 = vperm.xlu1 %2984, %v3587_v13  }
 0x1b4   :  { %2991 = vset.pattern.permute.xlu0 %v5411_v51 }
 0x1b5   :  { %v4169_v29 = vpop.permute.xlu1 %1271  ;;  %v4172_v2 = vpop.permute.xlu0 %1440  ;;  %1925 = vperm.xlu0 %2991, %v3538_v4  }
 0x1b6   :  { %5577 = vst [vmem:[#allocation105_spill] sm:$0xff] %v4169_v29  ;;  %5578 = vst [vmem:[#allocation106_spill] sm:$0xff] %v4172_v2 }
 0x1b7   :  { %1670 = vperm.xlu1 %2984, %v3604_v16   ;;  %v4191_v16 = vld [vmem:[%s5395_s4 + $0x10] sm:$0xff] }
 0x1b9   :  { %v4176_v10 = vpop.permute.xlu1 %1288  ;;  %v4178_v3 = vpop.permute.xlu0 %1448  ;;  %1937 = vperm.xlu0 %2991, %v3544_v5  }
 0x1ba   :  { %5579 = vst [vmem:[#allocation107_spill] sm:$0xff] %v4176_v10  ;;  %5580 = vst [vmem:[#allocation108_spill] sm:$0xff] %v4178_v3  ;;  %v4224_v10 = vld [vmem:[%s5395_s4 + $0x8] sm:$0xff] }
 0x1bb   :  { %2985 = vset.pattern.permute.xlu1 %v5581_v7 }
 0x1bc   :  { %1703 = vperm.xlu1 %2985, %v3538_v4   ;;  %v4202_v4 = vld [vmem:[%s5395_s4 + $0x18] sm:$0xff] }
 0x1bd   :  { %v4183_v13 = vpop.permute.xlu1 %1296  ;;  %1954 = vperm.xlu0 %2991, %v3561_v8  }
 0x1be   :  { %5582 = vst [vmem:[#allocation109_spill] sm:$0xff] %v4183_v13  ;;  %v4186_v51 = vpop.permute.xlu0 %1481  ;;  %v4213_v13 = vld [vmem:[%s5396_s5] sm:$0xff] }
 0x1bf   :  { %5583 = vst [vmem:[#allocation110_spill] sm:$0xff] %v4186_v51  ;;  %5588 = vst [vmem:[#allocation115_spill] sm:$0xff] %v4213_v13 }
 0x1c0   :  { %1711 = vperm.xlu1 %2985, %v4191_v16  }
 0x1c1   :  { %v4194_v3 = vpop.permute.xlu1 %1304  ;;  %1962 = vperm.xlu0 %2991, %v3578_v11  }
 0x1c2   :  { %5584 = vst [vmem:[#allocation111_spill] sm:$0xff] %v4194_v3  ;;  %v4197_v5 = vpop.permute.xlu0 %1493 }
 0x1c3   :  { %5585 = vst [vmem:[#allocation112_spill] sm:$0xff] %v4197_v5  ;;  %v5412_v5 = vmov 22  }
 0x1c4   :  { %1715 = vperm.xlu1 %2985, %v4202_v4  }
 0x1c5   :  { %1970 = vperm.xlu0 %2991, %v3595_v14  }
 0x1c6   :  { %v4205_v8 = vpop.permute.xlu1 %1337  ;;  %v4208_v7 = vpop.permute.xlu0 %1510 }
 0x1c7   :  { %5586 = vst [vmem:[#allocation113_spill] sm:$0xff] %v4205_v8  ;;  %5587 = vst [vmem:[#allocation114_spill] sm:$0xff] %v4208_v7 }
 0x1c8   :  { %1732 = vperm.xlu1 %2985, %v4213_v13  }
 0x1c9   :  { %2994 = vset.pattern.permute.xlu0 %v5412_v5 }
 0x1ca   :  { %v4216_v3 = vpop.permute.xlu1 %1341  ;;  %v4219_v51 = vpop.permute.xlu0 %1518  ;;  %2003 = vperm.xlu0 %2994, %v4224_v10  }
 0x1cb   :  { %5589 = vst [vmem:[#allocation116_spill] sm:$0xff] %v4216_v3  ;;  %5590 = vst [vmem:[#allocation117_spill] sm:$0xff] %v4219_v51  ;;  %v4235_v3 = vld [vmem:[%s5395_s4 + $0x20] sm:$0xff]  ;;  %v4244_v51 = vld [vmem:[%s5396_s5 + $0x8] sm:$0xff] }
 0x1cc   :  { %1740 = vperm.xlu1 %2985, %v3578_v11   ;;  %v5594_v11 = vmov 19  }
 0x1ce   :  { %v4228_v7 = vpop.permute.xlu1 %1349  ;;  %v4230_v41 = vpop.permute.xlu0 %1526  ;;  %2015 = vperm.xlu0 %2994, %v4235_v3  }
 0x1cf   :  { %5591 = vst [vmem:[#allocation118_spill] sm:$0xff] %v4228_v7  ;;  %5592 = vst [vmem:[#allocation119_spill] sm:$0xff] %v4230_v41 }
 0x1d0   :  { %1748 = vperm.xlu1 %2985, %v3595_v14   ;;  %v4256_v14 = vld [vmem:[%s5396_s5 + $0x18] sm:$0xff] }
 0x1d2   :  { %v4239_v5 = vpop.permute.xlu1 %1366  ;;  %2032 = vperm.xlu0 %2994, %v4244_v51  }
 0x1d3   :  { %5593 = vst [vmem:[#allocation120_spill] sm:$0xff] %v4239_v5  ;;  %v4248_v41 = vpop.permute.xlu0 %1559 }
 0x1d4   :  { %2988 = vset.pattern.permute.xlu1 %v5594_v11  ;;  %5595 = vst [vmem:[#allocation121_spill] sm:$0xff] %v4248_v41  ;;  %v5413_v11 = vmov 23  }
 0x1d5   :  { %1781 = vperm.xlu1 %2988, %v4224_v10  }
 0x1d6   :  { %v4251_v7 = vpop.permute.xlu1 %1374  ;;  %2040 = vperm.xlu0 %2994, %v4256_v14  }
 0x1d7   :  { %5596 = vst [vmem:[#allocation122_spill] sm:$0xff] %v4251_v7  ;;  %v4259_v42 = vpop.permute.xlu0 %1571  ;;  %v4270_v7 = vld [vmem:[%s5395_s4] sm:$0xff] }
 0x1d8   :  { %5597 = vst [vmem:[#allocation123_spill] sm:$0xff] %v4259_v42 }
 0x1d9   :  { %1785 = vperm.xlu1 %2988, %v4191_v16  }
 0x1da   :  { %2995 = vset.pattern.permute.xlu0 %v5413_v11 }
 0x1db   :  { %v4262_v29 = vpop.permute.xlu1 %1407  ;;  %v4265_v41 = vpop.permute.xlu0 %1588  ;;  %2073 = vperm.xlu0 %2995, %v4270_v7  }
 0x1dc   :  { %5598 = vst [vmem:[#allocation124_spill] sm:$0xff] %v4262_v29  ;;  %5599 = vst [vmem:[#allocation125_spill] sm:$0xff] %v4265_v41 }
 0x1dd   :  { %1793 = vperm.xlu1 %2988, %v4235_v3  }
 0x1df   :  { %v4274_v2 = vpop.permute.xlu1 %1415  ;;  %v4276_v42 = vpop.permute.xlu0 %1596  ;;  %2085 = vperm.xlu0 %2995, %v4202_v4  }
 0x1e0   :  { %5600 = vst [vmem:[#allocation126_spill] sm:$0xff] %v4274_v2  ;;  %5601 = vst [vmem:[#allocation127_spill] sm:$0xff] %v4276_v42  ;;  %v4291_v2 = vld [vmem:[%s5396_s5 + $0x10] sm:$0xff]  ;;  %v5605_v42 = vmov 20  }
 0x1e1   :  { %1810 = vperm.xlu1 %2988, %v4244_v51  }
 0x1e3   :  { %v4280_v11 = vpop.permute.xlu1 %1419  ;;  %2102 = vperm.xlu0 %2995, %v4213_v13  }
 0x1e4   :  { %5602 = vst [vmem:[#allocation128_spill] sm:$0xff] %v4280_v11  ;;  %v4284_v29 = vpop.permute.xlu0 %1629 }
 0x1e5   :  { %1818 = vperm.xlu1 %2988, %v4256_v14   ;;  %5603 = vst [vmem:[#allocation129_spill] sm:$0xff] %v4284_v29  ;;  %v4303_v29 = vld [vmem:[%s5396_s5 + $0x20] sm:$0xff] }
 0x1e7   :  { %v4286_v41 = vpop.permute.xlu1 %1436  ;;  %2110 = vperm.xlu0 %2995, %v4291_v2  }
 0x1e8   :  { %5604 = vst [vmem:[#allocation130_spill] sm:$0xff] %v4286_v41  ;;  %v4295_v5 = vpop.permute.xlu0 %1641 }
 0x1e9   :  { %2989 = vset.pattern.permute.xlu1 %v5605_v42  ;;  %5606 = vst [vmem:[#allocation131_spill] sm:$0xff] %v4295_v5  ;;  %v5414_v42 = vmov 24  }
 0x1ea   :  { %1851 = vperm.xlu1 %2989, %v4270_v7  }
 0x1eb   :  { %v4298_v11 = vpop.permute.xlu1 %1444  ;;  %2118 = vperm.xlu0 %2995, %v4303_v29  }
 0x1ec   :  { %5607 = vst [vmem:[#allocation132_spill] sm:$0xff] %v4298_v11  ;;  %v4306_v41 = vpop.permute.xlu0 %1658 }
 0x1ed   :  { %5608 = vst [vmem:[#allocation133_spill] sm:$0xff] %v4306_v41  ;;  %v390_v41 = vlaneseq }
 0x1ee   :  { %1859 = vperm.xlu1 %2989, %v4191_v16  }
 0x1ef   :  { %v4309_v24 = vpop.permute.xlu1 %1452  ;;  %2998 = vset.pattern.permute.xlu0 %v5414_v42  ;;  %v4325_v42 = vshrl.u32 %v390_v41, 7 }
 0x1f0   :  { %5609 = vst [vmem:[#allocation134_spill] sm:$0xff] %v4309_v24  ;;  %v4312_v5 = vpop.permute.xlu0 %1666  ;;  %2151 = vperm.xlu0 %2998, %v4224_v10  }
 0x1f1   :  { %5610 = vst [vmem:[#allocation135_spill] sm:$0xff] %v4312_v5 }
 0x1f2   :  { %1863 = vperm.xlu1 %2989, %v4202_v4  }
 0x1f4   :  { %v4316_v11 = vpop.permute.xlu1 %1485  ;;  %v4318_v8 = vpop.permute.xlu0 %1674  ;;  %2163 = vperm.xlu0 %2998, %v4235_v3  }
 0x1f5   :  { %5611 = vst [vmem:[#allocation136_spill] sm:$0xff] %v4316_v11  ;;  %5612 = vst [vmem:[#allocation137_spill] sm:$0xff] %v4318_v8  ;;  %v4334_v8 = vsub.s32 0, %v4325_v42 }
 0x1f6   :  { %1880 = vperm.xlu1 %2989, %v4213_v13  }
 0x1f8   :  { %v4322_v63 = vpop.permute.xlu1 %1489  ;;  %2180 = vperm.xlu0 %2998, %v4244_v51  }
 0x1f9   :  { %5613 = vst [vmem:[#allocation138_spill] sm:$0xff] %v4322_v63  ;;  %v4328_v5 = vpop.permute.xlu0 %1707  ;;  %v4340_v63 = vsub.s32 1, %v4325_v42 }
 0x1fa   :  { %1888 = vperm.xlu1 %2989, %v4291_v2   ;;  %5614 = vst [vmem:[#allocation139_spill] sm:$0xff] %v4328_v5  ;;  %v5620_v5 = vmov 21  }
 0x1fb   :  { %5617 = vst [vmem:[#allocation142_spill] sm:$0xff] %v4340_v63 }
 0x1fc   :  { %v4330_v24 = vpop.permute.xlu1 %1497  ;;  %2188 = vperm.xlu0 %2998, %v4256_v14  }
 0x1fd   :  { %5615 = vst [vmem:[#allocation140_spill] sm:$0xff] %v4330_v24  ;;  %v4337_v11 = vpop.permute.xlu0 %1719  ;;  %v4347_v24 = vrot.slane %v3909_v60, %v4334_v8 }
 0x1fe   :  { %1896 = vperm.xlu1 %2989, %v4303_v29   ;;  %5616 = vst [vmem:[#allocation141_spill] sm:$0xff] %v4337_v11  ;;  %v4355_v11 = vrot.slane %v3909_v60, %v4340_v63  ;;  %v4372_v63 = vsub.s32 4, %v4325_v42 }
 0x1ff   :  { %5619 = vst [vmem:[#allocation144_spill] sm:$0xff] %v4347_v24 }
 0x200   :  { %v4342_v41 = vpop.permute.xlu1 %1514  ;;  %2999 = vset.pattern.permute.xlu0 %v5415_v34  ;;  %5622 = vst [vmem:[#allocation146_spill] sm:$0xff] %v4355_v11  ;;  %v394_v34 = vmul.f32 %v4347_v24, %v3722_v37  ;;  %5626 = vst [vmem:[#allocation150_spill] sm:$0xff] %v4372_v63  ;;  %v4379_v37 = vsub.s32 3, %v4325_v42  ;;  %v469_v21 = vmul.f32 %v4355_v11, %v3749_v47 }
 0x201   :  { %5618 = vst [vmem:[#allocation143_spill] sm:$0xff] %v4342_v41  ;;  %v4350_v12 = vpop.permute.xlu0 %1736  ;;  %2221 = vperm.xlu0 %2999, %v4270_v7  }
 0x202   :  { %2992 = vset.pattern.permute.xlu1 %v5620_v5  ;;  %5621 = vst [vmem:[#allocation145_spill] sm:$0xff] %v4350_v12  ;;  %v4366_v5 = vsub.s32 2, %v4325_v42  ;;  %v468_v12 = vmul.f32 %v4355_v11, %v3753_v48  ;;  %5628 = vst [vmem:[#allocation152_spill] sm:$0xff] %v4379_v37  ;;  %v4402_v47 = vrot.slane %v3909_v60, %v4379_v37 }
 0x203   :  { %1929 = vperm.xlu1 %2992, %v4224_v10  }
 0x204   :  { %v4358_v41 = vpop.permute.xlu1 %1522  ;;  %5625 = vst [vmem:[#allocation149_spill] sm:$0xff] %v4366_v5  ;;  %v4387_v48 = vrot.slane %v3909_v60, %v4366_v5  ;;  %v493_v17 = vsub.f32 %v3765_v52, %v468_v12  ;;  %5633 = vst [vmem:[#allocation157_spill] sm:$0xff] %v4402_v47 }
 0x205   :  { %5623 = vst [vmem:[#allocation147_spill] sm:$0xff] %v4358_v41  ;;  %v4362_v45 = vpop.permute.xlu0 %1744  ;;  %2233 = vperm.xlu0 %2999, %v4202_v4   ;;  %v395_v41 = vmul.f32 %v4347_v24, %v3728_v39 }
 0x206   :  { %5624 = vst [vmem:[#allocation148_spill] sm:$0xff] %v4362_v45  ;;  %v424_v45 = vsub.f32 %v3731_v40, %v394_v34  ;;  %5629 = vst [vmem:[#allocation153_spill] sm:$0xff] %v4387_v48  ;;  %v543_v52 = vmul.f32 %v4387_v48, %v3783_v59  ;;  %v498_v12 = vmul.f32 1.442695, %v493_v17 }
 0x207   :  { %1933 = vperm.xlu1 %2992, %v4191_v16   ;;  %v425_v40 = vsub.f32 %v3739_v44, %v395_v41  ;;  %v4414_v41 = vsub.s32 5, %v4325_v42 }
 0x208   :  { %v429_v5 = vmul.f32 1.442695, %v424_v45  ;;  %v616_v45 = vmul.f32 %v4402_v47, %v3808_v15  ;;  %v471_v15 = vmul.f32 %v4355_v11, %v3759_v50 }
 0x209   :  { %v4376_v31 = vpop.permute.xlu1 %1555  ;;  %2250 = vperm.xlu0 %2999, %v4213_v13   ;;  %v494_v13 = vsub.f32 %v3767_v53, %v469_v21  ;;  %5635 = vst [vmem:[#allocation159_spill] sm:$0xff] %v4414_v41  ;;  %v431_v59 = vmul.f32 1.442695, %v425_v40 }
 0x20a   :  { %5627 = vst [vmem:[#allocation151_spill] sm:$0xff] %v4376_v31  ;;  %v4391_v39 = vpop.permute.xlu0 %1777  ;;  %v4395_v31 = vrot.slane %v3909_v60, %v4372_v63  ;;  %3024 = vpow2.f32 %v429_v5  ;;  %v617_v5 = vmul.f32 %v4402_v47, %v3816_v19  ;;  %v4452_v19 = vsub.s32 7, %v4325_v42 }
 0x20b   :  { %1941 = vperm.xlu1 %2992, %v4235_v3   ;;  %5630 = vst [vmem:[#allocation154_spill] sm:$0xff] %v4391_v39  ;;  %v542_v39 = vmul.f32 %v4387_v48, %v3779_v58  ;;  %v500_v17 = vmul.f32 1.442695, %v494_v13  ;;  %v568_v58 = vsub.f32 %v3794_v0, %v543_v52  ;;  %3026 = vpow2.f32 %v498_v12 }
 0x20c   :  { %5631 = vst [vmem:[#allocation155_spill] sm:$0xff] %v4395_v31  ;;  %v690_v53 = vmul.f32 %v4395_v31, %v3846_v30  ;;  %v4434_v13 = vrot.slane %v3909_v60, %v4414_v41  ;;  %v4437_v0 = vsub.s32 6, %v4325_v42  ;;  %3028 = vpow2.f32 %v431_v59  ;;  %5641 = vst [vmem:[#allocation165_spill] sm:$0xff] %v4452_v19 }
 0x20d   :  { %v4398_v34 = vpop.permute.xlu1 %1563  ;;  %2258 = vperm.xlu0 %2999, %v4291_v2   ;;  %v691_v50 = vmul.f32 %v4395_v31, %v3838_v27  ;;  %3030 = vpow2.f32 %v500_v17  ;;  %v574_v52 = vmul.f32 1.442695, %v568_v58  ;;  %v4473_v58 = vrot.slane %v3909_v60, %v4452_v19 }
 0x20e   :  { %5632 = vst [vmem:[#allocation156_spill] sm:$0xff] %v4398_v34  ;;  %v4411_v44 = vpop.permute.xlu0 %1789  ;;  %v397_v34 = vmul.f32 %v4347_v24, %v3725_v38  ;;  %5638 = vst [vmem:[#allocation162_spill] sm:$0xff] %v4434_v13  ;;  %v641_v38 = vsub.f32 %v3820_v20, %v616_v45  ;;  %v764_v40 = vmul.f32 %v4434_v13, %v3862_v43  ;;  %v5642_v45 = vmov 22  }
 0x20f   :  { %1958 = vperm.xlu1 %2992, %v4244_v51   ;;  %5634 = vst [vmem:[#allocation158_spill] sm:$0xff] %v4411_v44  ;;  %v567_v44 = vsub.f32 %v3797_v6, %v542_v39  ;;  %5639 = vst [vmem:[#allocation163_spill] sm:$0xff] %v4437_v0  ;;  %v715_v6 = vsub.f32 %v3864_v54, %v690_v53  ;;  %v496_v54 = vsub.f32 %v3773_v56, %v471_v15 }
 0x210   :  { %v427_v12 = vsub.f32 %v3745_v46, %v397_v34  ;;  %v4461_v43 = vrot.slane %v3909_v60, %v4437_v0  ;;  %v646_v46 = vmul.f32 1.442695, %v641_v38  ;;  %v642_v34 = vsub.f32 %v3834_v26, %v617_v5  ;;  %5646 = vst [vmem:[#allocation169_spill] sm:$0xff] %v4473_v58 }
 0x211   :  { %v4420_v21 = vpop.permute.xlu1 %1567  ;;  %2266 = vperm.xlu0 %2999, %v4303_v29   ;;  %v572_v20 = vmul.f32 1.442695, %v567_v44  ;;  %v720_v42 = vmul.f32 1.442695, %v715_v6  ;;  %v716_v44 = vsub.f32 %v3849_v32, %v691_v50  ;;  %v545_v56 = vmul.f32 %v4387_v48, %v3791_v62 }
 0x212   :  { %5636 = vst [vmem:[#allocation160_spill] sm:$0xff] %v4420_v21  ;;  %v4430_v30 = vpop.permute.xlu0 %1806  ;;  %5644 = vst [vmem:[#allocation167_spill] sm:$0xff] %v4461_v43  ;;  %v789_v59 = vsub.f32 %v3874_v1, %v764_v40  ;;  %3032 = vpow2.f32 %v574_v52  ;;  %v435_v17 = vmul.f32 1.442695, %v427_v12  ;;  %v504_v26 = vmul.f32 1.442695, %v496_v54 }
 0x213   :  { %1966 = vperm.xlu1 %2992, %v4256_v14   ;;  %5637 = vst [vmem:[#allocation161_spill] sm:$0xff] %v4430_v30  ;;  %v5422_v30 = vmov 26   ;;  %3034 = vpow2.f32 %v572_v20  ;;  %v838_v32 = vmul.f32 %v4461_v43, %v3914_v22  ;;  %v648_v62 = vmul.f32 1.442695, %v642_v34  ;;  %v5651_v34 = vld [vmem:[#allocation37_spill] sm:$0xff] }
 0x214   :  { %3036 = vpow2.f32 %v646_v46  ;;  %v765_v1 = vmul.f32 %v4434_v13, %v3882_v33  ;;  %v722_v38 = vmul.f32 1.442695, %v716_v44  ;;  %v570_v60 = vsub.f32 %v3800_v9, %v545_v56 }
 0x215   :  { %v4445_v39 = vpop.permute.xlu1 %1584  ;;  %3002 = vset.pattern.permute.xlu0 %v5422_v30  ;;  %3038 = vpow2.f32 %v720_v42  ;;  %v619_v5 = vmul.f32 %v4402_v47, %v3814_v18  ;;  %v841_v50 = vmul.f32 %v4461_v43, %v3928_v61  ;;  %v794_v22 = vmul.f32 1.442695, %v789_v59  ;;  %v5664_v30 = vld [vmem:[#allocation38_spill] sm:$0xff] }
 0x216   :  { %5640 = vst [vmem:[#allocation164_spill] sm:$0xff] %v4445_v39  ;;  %v4456_v27 = vpop.permute.xlu0 %1814  ;;  %2299 = vperm.xlu0 %3002, %v4224_v10   ;;  %v839_v40 = vmul.f32 %v4461_v43, %v3892_v55  ;;  %3040 = vpow2.f32 %v435_v17  ;;  %v912_v52 = vmul.f32 %v4473_v58, %v3919_v25  ;;  %v863_v12 = vsub.f32 %v3934_v57, %v838_v32  ;;  %v5652_v32 = vld [vmem:[#allocation41_spill] sm:$0xff] }
 0x217   :  { %2993 = vset.pattern.permute.xlu1 %v5642_v45  ;;  %5643 = vst [vmem:[#allocation166_spill] sm:$0xff] %v4456_v27  ;;  %v3025_v33 = vpop.eup %3024  ;;  %3042 = vpow2.f32 %v504_v26  ;;  %v790_v18 = vsub.f32 %v3900_v49, %v765_v1  ;;  %v4499_v61 = vrot.slane %v3917_v36, %v4334_v8  ;;  %v578_v20 = vmul.f32 1.442695, %v570_v60  ;;  %v5650_v49 = vld [vmem:[#allocation47_spill] sm:$0xff]  ;;  %v5674_v43 = vld [vmem:[#allocation65_spill] sm:$0xff] }
 0x218   :  { %1999 = vperm.xlu1 %2993, %v4270_v7   ;;  %v3027_v9 = vpop.eup %3026  ;;  %3044 = vpow2.f32 %v648_v62  ;;  %v644_v25 = vsub.f32 %v3840_v28, %v619_v5  ;;  %v693_v57 = vmul.f32 %v4395_v31, %v3858_v35  ;;  %v866_v45 = vsub.f32 %v3911_v23, %v841_v50  ;;  %v5653_v62 = vld [vmem:[#allocation53_spill] sm:$0xff]  ;;  %v5654_v23 = vld [vmem:[#allocation46_spill] sm:$0xff]  ;;  %v5655_v60 = vld [vmem:[#allocation115_spill] sm:$0xff] }
 0x219   :  { %v4468_v53 = vpop.permute.xlu1 %1592  ;;  %5649 = vst [vmem:[#allocation172_spill] sm:$0xff] %v4499_v61  ;;  %3046 = vpow2.f32 %v722_v38  ;;  %v3029_v54 = vpop.eup %3028  ;;  %v913_v46 = vmul.f32 %v4473_v58, %v5650_v49  ;;  %v864_v42 = vsub.f32 %v5651_v34, %v839_v40  ;;  %v439_v59 = vadd.f32 1.0, %v3025_v33  ;;  %v5658_v33 = vld [vmem:[#allocation29_spill] sm:$0xff] }
 0x21a   :  { %5645 = vst [vmem:[#allocation168_spill] sm:$0xff] %v4468_v53  ;;  %v4475_v15 = vpop.permute.xlu0 %1822  ;;  %2311 = vperm.xlu0 %3002, %v4235_v3   ;;  %3048 = vpow2.f32 %v794_v22  ;;  %v3031_v56 = vpop.eup %3030  ;;  %v508_v17 = vadd.f32 1.0, %v3027_v9  ;;  %v868_v26 = vmul.f32 1.442695, %v863_v12  ;;  %v937_v28 = vsub.f32 %v5652_v32, %v912_v52  ;;  %v5657_v22 = vld [vmem:[#allocation28_spill] sm:$0xff] }
 0x21b   :  { %5647 = vst [vmem:[#allocation170_spill] sm:$0xff] %v4475_v15  ;;  %v796_v35 = vmul.f32 1.442695, %v790_v18  ;;  %v938_v1 = vsub.f32 %v5653_v62, %v913_v46  ;;  %v987_v38 = vmul.f32 %v4499_v61, %v5654_v23  ;;  %3050 = vpow2.f32 %v578_v20  ;;  %v5660_v32 = vld [vmem:[#allocation40_spill] sm:$0xff]  ;;  %v5661_v23 = vld [vmem:[#allocation142_spill] sm:$0xff]  ;;  %v5667_v15 = vld [vmem:[#allocation55_spill] sm:$0xff] }
 0x21c   :  { %2007 = vperm.xlu1 %2993, %v4191_v16   ;;  %v652_v50 = vmul.f32 1.442695, %v644_v25  ;;  %v718_v40 = vsub.f32 %v5657_v22, %v693_v57  ;;  %v767_v12 = vmul.f32 %v4434_v13, %v5658_v33  ;;  %v440_v52 = vadd.f32 1.0, %v3029_v54 }
 0x21d   :  { %v4486_v6 = vpop.permute.xlu1 %1600  ;;  %v509_v9 = vadd.f32 1.0, %v3031_v56  ;;  %v870_v49 = vmul.f32 1.442695, %v864_v42  ;;  %v874_v34 = vmul.f32 1.442695, %v866_v45  ;;  %v915_v62 = vmul.f32 %v4473_v58, %v5660_v32  ;;  %v5663_v42 = vld [vmem:[#allocation50_spill] sm:$0xff] }
 0x21e   :  { %5648 = vst [vmem:[#allocation171_spill] sm:$0xff] %v4486_v6  ;;  %2328 = vperm.xlu0 %3002, %v4244_v51   ;;  %3052 = vpow2.f32 %v868_v26  ;;  %v4530_v20 = vrot.slane %v3917_v36, %v5661_v23  ;;  %v5423_v25 = vmov 27   ;;  %v942_v22 = vmul.f32 1.442695, %v937_v28  ;;  %v5665_v28 = vld [vmem:[#allocation61_spill] sm:$0xff] }
 0x21f   :  { %v4502_v55 = vpop.permute.xlu0 %1855  ;;  %v3033_v46 = vpop.eup %3032  ;;  %3054 = vpow2.f32 %v796_v35  ;;  %v944_v54 = vmul.f32 1.442695, %v938_v1  ;;  %v1012_v56 = vsub.f32 %v5663_v42, %v987_v38  ;;  %v513_v33 = vmul.f32 %v508_v17, %v439_v59  ;;  %v5668_v59 = vld [vmem:[#allocation149_spill] sm:$0xff] }
 0x220   :  { %2011 = vperm.xlu1 %2993, %v4202_v4   ;;  %5662 = vst [vmem:[#allocation41_spill] sm:$0xff] %v4530_v20  ;;  %v3035_v57 = vpop.eup %3034  ;;  %3056 = vpow2.f32 %v652_v50  ;;  %v726_v32 = vmul.f32 1.442695, %v718_v40  ;;  %v792_v27 = vsub.f32 %v5664_v30, %v767_v12  ;;  %v989_v35 = vmul.f32 %v4499_v61, %v5665_v28  ;;  %v5670_v40 = vld [vmem:[#allocation54_spill] sm:$0xff]  ;;  %v5672_v28 = vld [vmem:[#allocation52_spill] sm:$0xff] }
 0x221   :  { %v3037_v26 = vpop.eup %3036  ;;  %3058 = vpow2.f32 %v870_v49  ;;  %v582_v42 = vadd.f32 1.0, %v3035_v57  ;;  %v4547_v17 = vrot.slane %v3917_v36, %v5668_v59  ;;  %v1018_v50 = vmul.f32 1.442695, %v1012_v56 }
 0x222   :  { %v4511_v44 = vpop.permute.xlu1 %1633  ;;  %2336 = vperm.xlu0 %3002, %v4256_v14   ;;  %v3039_v53 = vpop.eup %3038  ;;  %3060 = vpow2.f32 %v874_v34  ;;  %v940_v12 = vsub.f32 %v5670_v40, %v915_v62  ;;  %v1014_v6 = vsub.f32 %v5672_v28, %v989_v35 }
 0x223   :  { %v4519_v5 = vpop.permute.xlu0 %1867  ;;  %v3041_v38 = vpop.eup %3040  ;;  %5669 = vst [vmem:[#allocation46_spill] sm:$0xff] %v4547_v17  ;;  %3062 = vpow2.f32 %v944_v54  ;;  %v587_v49 = vmul.f32 %v582_v42, %v513_v33  ;;  %v1135_v13 = vmul.f32 %v4547_v17, %v5674_v43  ;;  %v5675_v33 = vld [vmem:[#allocation69_spill] sm:$0xff]  ;;  %v5677_v43 = vld [vmem:[#allocation74_spill] sm:$0xff] }
 0x224   :  { %2028 = vperm.xlu1 %2993, %v5655_v60   ;;  %5656 = vst [vmem:[#allocation47_spill] sm:$0xff] %v4519_v5  ;;  %v1060_v5 = vmul.f32 %v4530_v20, %v5667_v15  ;;  %v3043_v30 = vpop.eup %3042  ;;  %3064 = vpow2.f32 %v726_v32  ;;  %v800_v15 = vmul.f32 1.442695, %v792_v27  ;;  %v442_v62 = vadd.f32 1.0, %v3041_v38 }
 0x225   :  { %3066 = vpow2.f32 %v942_v22  ;;  %v511_v40 = vadd.f32 1.0, %v3043_v30  ;;  %v1061_v27 = vmul.f32 %v4530_v20, %v5675_v33  ;;  %v5676_v22 = vmov 23   ;;  %v5679_v30 = vld [vmem:[#allocation90_spill] sm:$0xff]  ;;  %v5682_v33 = vld [vmem:[#allocation11_spill] sm:$0xff] }
 0x226   :  { %v4524_v18 = vpop.permute.xlu1 %1637  ;;  %3003 = vset.pattern.permute.xlu0 %v5423_v25  ;;  %v514_v25 = vmul.f32 %v509_v9, %v440_v52  ;;  %v3045_v9 = vpop.eup %3044  ;;  %3068 = vpow2.f32 %v1018_v50  ;;  %v4570_v50 = vrot.slane %v5679_v30, %v4414_v41 }
 0x227   :  { %5659 = vst [vmem:[#allocation37_spill] sm:$0xff] %v4524_v18  ;;  %v4535_v45 = vpop.permute.xlu0 %1884  ;;  %2369 = vperm.xlu0 %3003, %v4270_v7   ;;  %v583_v18 = vadd.f32 1.0, %v3033_v46  ;;  %v656_v46 = vadd.f32 1.0, %v3037_v26  ;;  %v3047_v34 = vpop.eup %3046  ;;  %v948_v26 = vmul.f32 1.442695, %v940_v12  ;;  %3070 = vpow2.f32 %v800_v15 }
 0x228   :  { %2036 = vperm.xlu1 %2993, %v4291_v2   ;;  %v3049_v56 = vpop.eup %3048  ;;  %v1086_v38 = vsub.f32 %v5677_v43, %v1061_v27  ;;  %5680 = vst [vmem:[#allocation29_spill] sm:$0xff] %v4570_v50  ;;  %v730_v12 = vadd.f32 1.0, %v3039_v53  ;;  %v4582_v53 = vrot.slane %v3917_v36, %v4379_v37 }
 0x229   :  { %v588_v57 = vmul.f32 %v583_v18, %v514_v25  ;;  %v661_v18 = vmul.f32 %v656_v46, %v587_v49  ;;  %v731_v25 = vadd.f32 1.0, %v3047_v34  ;;  %v5681_v49 = vld [vmem:[#allocation68_spill] sm:$0xff]  ;;  %v804_v34 = vadd.f32 1.0, %v3049_v56 }
 0x22a   :  { %v4541_v1 = vpop.permute.xlu1 %1645  ;;  %v1160_v46 = vsub.f32 %v5681_v49, %v1135_v13  ;;  %3072 = vpow2.f32 %v948_v26  ;;  %5684 = vst [vmem:[#allocation40_spill] sm:$0xff] %v4582_v53  ;;  %v4586_v13 = vrot.slane %v3917_v36, %v4372_v63  ;;  %v5686_v49 = vld [vmem:[#allocation91_spill] sm:$0xff] }
 0x22b   :  { %5666 = vst [vmem:[#allocation53_spill] sm:$0xff] %v4541_v1  ;;  %v4551_v52 = vpop.permute.xlu0 %1892  ;;  %2381 = vperm.xlu0 %3003, %v4202_v4   ;;  %v5673_v1 = vld [vmem:[#allocation58_spill] sm:$0xff]  ;;  %v735_v27 = vmul.f32 %v730_v12, %v661_v18 }
 0x22c   :  { %2044 = vperm.xlu1 %2993, %v4303_v29   ;;  %5671 = vst [vmem:[#allocation115_spill] sm:$0xff] %v4551_v52  ;;  %v1085_v58 = vsub.f32 %v5673_v1, %v1060_v5  ;;  %v657_v52 = vadd.f32 1.0, %v3045_v9  ;;  %v3051_v5 = vpop.eup %3050  ;;  %v1022_v1 = vmul.f32 1.442695, %v1014_v6  ;;  %v516_v9 = vmul.f32 %v511_v40, %v442_v62 }
 0x22d   :  { %v3053_v15 = vpop.eup %3052  ;;  %v585_v43 = vadd.f32 1.0, %v3051_v5  ;;  %v1092_v40 = vmul.f32 1.442695, %v1086_v38  ;;  %v1166_v12 = vmul.f32 1.442695, %v1160_v46  ;;  %v5690_v38 = vld [vmem:[#allocation83_spill] sm:$0xff] }
 0x22e   :  { %v4555_v54 = vpop.permute.xlu1 %1662  ;;  %v662_v35 = vmul.f32 %v657_v52, %v588_v57  ;;  %v1090_v28 = vmul.f32 1.442695, %v1085_v58  ;;  %v5683_v52 = vld [vmem:[#allocation15_spill] sm:$0xff]  ;;  %v3055_v57 = vpop.eup %3054  ;;  %3074 = vpow2.f32 %v1022_v1 }
 0x22f   :  { %2398 = vperm.xlu0 %3003, %v5655_v60   ;;  %v4577_v6 = vmul.f32 %v4355_v11, %v5683_v52  ;;  %v3057_v56 = vpop.eup %3056  ;;  %v590_v5 = vmul.f32 %v585_v43, %v516_v9  ;;  %v805_v39 = vadd.f32 1.0, %v3055_v57  ;;  %v1283_v9 = vmul.f32 %v4586_v13, %v5690_v38 }
 0x230   :  { %2996 = vset.pattern.permute.xlu1 %v5676_v22  ;;  %v1926_v32 = vpop.permute.xlu0 %1925  ;;  %v398_v22 = vmul.f32 %v4347_v24, %v5682_v33  ;;  %v736_v62 = vmul.f32 %v731_v25, %v662_v35  ;;  %v3059_v18 = vpop.eup %3058  ;;  %3076 = vpow2.f32 %v1090_v28  ;;  %v1209_v33 = vmul.f32 %v4582_v53, %v5686_v49  ;;  %v5689_v25 = vld [vmem:[#allocation57_spill] sm:$0xff] }
 0x231   :  { %2077 = vperm.xlu1 %2996, %v4224_v10   ;;  %v4592_v26 = vmul.f32 %v4570_v50, %v1926_v32  ;;  %v3061_v11 = vpop.eup %3060  ;;  %v878_v24 = vadd.f32 1.0, %v3053_v15  ;;  %v986_v35 = vmul.f32 %v4499_v61, %v5689_v25  ;;  %v659_v1 = vadd.f32 1.0, %v3057_v56  ;;  %v5691_v28 = vld [vmem:[#allocation97_spill] sm:$0xff]  ;;  %v5692_v56 = vld [vmem:[#allocation63_spill] sm:$0xff] }
 0x232   :  { %v4566_v42 = vpop.permute.xlu1 %1670  ;;  %v3063_v32 = vpop.eup %3062  ;;  %v1234_v46 = vsub.f32 %v5691_v28, %v1209_v33  ;;  %v810_v49 = vmul.f32 %v805_v39, %v736_v62  ;;  %3078 = vpow2.f32 %v1092_v40  ;;  %v809_v25 = vmul.f32 %v804_v34, %v735_v27  ;;  %v5694_v33 = vld [vmem:[#allocation17_spill] sm:$0xff]  ;;  %v5696_v27 = vld [vmem:[#allocation87_spill] sm:$0xff] }
 0x233   :  { %5678 = vst [vmem:[#allocation28_spill] sm:$0xff] %v4566_v42  ;;  %2406 = vperm.xlu0 %3003, %v4291_v2   ;;  %v5688_v42 = vld [vmem:[#allocation13_spill] sm:$0xff]  ;;  %v3065_v15 = vpop.eup %3064  ;;  %v664_v50 = vmul.f32 %v659_v1, %v590_v5  ;;  %v1011_v61 = vsub.f32 %v5692_v56, %v986_v35  ;;  %3080 = vpow2.f32 %v1166_v12  ;;  %v953_v39 = vadd.f32 1.0, %v3063_v32  ;;  %v5698_v1 = vld [vmem:[#allocation24_spill] sm:$0xff] }
 0x234   :  { %v4589_v58 = vpop.permute.xlu0 %1937  ;;  %v3067_v57 = vpop.eup %3066  ;;  %v5436_v62 = vmov 28   ;;  %v1240_v34 = vmul.f32 1.442695, %v1234_v46  ;;  %v1308_v5 = vsub.f32 %v5696_v27, %v1283_v9  ;;  %v4623_v12 = vrot.slane %v3917_v36, %v4437_v0 }
 0x235   :  { %2081 = vperm.xlu1 %2996, %v4191_v16   ;;  %5685 = vst [vmem:[#allocation142_spill] sm:$0xff] %v4589_v58  ;;  %v428_v58 = vsub.f32 %v5688_v42, %v398_v22  ;;  %v879_v42 = vadd.f32 1.0, %v3059_v18  ;;  %v3069_v40 = vpop.eup %3068  ;;  %v733_v18 = vadd.f32 1.0, %v3065_v15  ;;  %v4631_v56 = vmul.f32 %v4402_v47, %v5698_v1 }
 0x236   :  { %v4635_v9 = vrot.slane %v3917_v36, %v4414_v41  ;;  %v883_v46 = vmul.f32 %v878_v24, %v809_v25  ;;  %v952_v27 = vadd.f32 1.0, %v3067_v57  ;;  %v1016_v22 = vmul.f32 1.442695, %v1011_v61  ;;  %v5701_v41 = vld [vmem:[#allocation102_spill] sm:$0xff]  ;;  %v5708_v57 = vld [vmem:[#allocation73_spill] sm:$0xff] }
 0x237   :  { %v4596_v52 = vpop.permute.xlu1 %1703  ;;  %2414 = vperm.xlu0 %3003, %v4303_v29   ;;  %v437_v32 = vmul.f32 1.442695, %v428_v58  ;;  %v884_v15 = vmul.f32 %v879_v42, %v810_v49  ;;  %3082 = vpow2.f32 %v1240_v34  ;;  %v1314_v42 = vmul.f32 1.442695, %v1308_v5  ;;  %v5704_v25 = vld [vmem:[#allocation26_spill] sm:$0xff] }
 0x238   :  { %5687 = vst [vmem:[#allocation50_spill] sm:$0xff] %v4596_v52  ;;  %v4606_v43 = vpop.permute.xlu0 %1954  ;;  %v5695_v52 = vld [vmem:[#allocation19_spill] sm:$0xff]  ;;  %v1431_v24 = vmul.f32 %v4623_v12, %v5701_v41  ;;  %v881_v34 = vadd.f32 1.0, %v3061_v11  ;;  %v4656_v5 = vmul.f32 %v952_v27, %v883_v46  ;;  %v4668_v11 = vrot.slane %v3917_v36, %v4452_v19 }
 0x239   :  { %2089 = vperm.xlu1 %2996, %v4235_v3   ;;  %v4617_v21 = vmul.f32 %v4387_v48, %v5695_v52  ;;  %v3071_v52 = vpop.eup %3070  ;;  %v5700_v48 = vld [vmem:[#allocation113_spill] sm:$0xff]  ;;  %3084 = vpow2.f32 %v437_v32 }
 0x23a   :  { %v1357_v1 = vmul.f32 %v4635_v9, %v5700_v48  ;;  %v3073_v47 = vpop.eup %3072  ;;  %v807_v49 = vadd.f32 1.0, %v3071_v52  ;;  %v4653_v48 = vmul.f32 %v4395_v31, %v5704_v25  ;;  %3086 = vpow2.f32 %v1016_v22 }
 0x23b   :  { %v4611_v38 = vpop.permute.xlu1 %1711  ;;  %3006 = vset.pattern.permute.xlu0 %v5436_v62  ;;  %v738_v62 = vmul.f32 %v733_v18, %v664_v50  ;;  %v5703_v50 = vld [vmem:[#allocation21_spill] sm:$0xff]  ;;  %v3075_v18 = vpop.eup %3074  ;;  %v4660_v32 = vadd.f32 1.0, %v3073_v47  ;;  %v1208_v25 = vmul.f32 %v4582_v53, %v5708_v57  ;;  %3088 = vpow2.f32 %v1314_v42  ;;  %v5712_v42 = vld [vmem:[#allocation136_spill] sm:$0xff] }
 0x23c   :  { %5693 = vst [vmem:[#allocation38_spill] sm:$0xff] %v4611_v38  ;;  %v4626_v35 = vpop.permute.xlu0 %1962  ;;  %2447 = vperm.xlu0 %3006, %v4224_v10   ;;  %v1027_v38 = vadd.f32 1.0, %v3069_v40  ;;  %v5699_v10 = vld [vmem:[#allocation56_spill] sm:$0xff]  ;;  %5705 = vst [vmem:[#allocation54_spill] sm:$0xff] %v4653_v48  ;;  %v4672_v22 = vrot.slane %v5679_v30, %v4334_v8  ;;  %v4676_v47 = vadd.f32 1.0, %v3075_v18  ;;  %v5447_v48 = vmov 30  }
 0x23d   :  { %2106 = vperm.xlu1 %2996, %v4244_v51   ;;  %5697 = vst [vmem:[#allocation61_spill] sm:$0xff] %v4626_v35  ;;  %v958_v35 = vmul.f32 %v953_v39, %v884_v15  ;;  %v1063_v58 = vmul.f32 %v4530_v20, %v5699_v10  ;;  %v5706_v39 = vld [vmem:[#allocation120_spill] sm:$0xff]  ;;  %v812_v41 = vmul.f32 %v807_v49, %v738_v62  ;;  %v3077_v52 = vpop.eup %3076  ;;  %v5710_v62 = vmov 24   ;;  %v5720_v20 = vld [vmem:[#allocation121_spill] sm:$0xff] }
 0x23e   :  { %v1382_v40 = vsub.f32 %v5706_v39, %v1357_v1  ;;  %v5707_v15 = vld [vmem:[#allocation76_spill] sm:$0xff]  ;;  %v4683_v49 = vadd.f32 1.0, %v3077_v52  ;;  %v5718_v52 = vld [vmem:[#allocation75_spill] sm:$0xff] }
 0x23f   :  { %v4637_v28 = vpop.permute.xlu1 %1715  ;;  %v1088_v10 = vsub.f32 %v5707_v15, %v1063_v58  ;;  %v3079_v58 = vpop.eup %3078  ;;  %v4681_v36 = vmul.f32 %v881_v34, %v812_v41  ;;  %v5716_v15 = vld [vmem:[#allocation77_spill] sm:$0xff]  ;;  %v5717_v34 = vld [vmem:[#allocation92_spill] sm:$0xff] }
 0x240   :  { %v4646_v61 = vpop.permute.xlu0 %1970  ;;  %2459 = vperm.xlu0 %3006, %v4235_v3   ;;  %v1032_v3 = vmul.f32 %v1027_v38, %v958_v35  ;;  %v5711_v38 = vld [vmem:[#allocation82_spill] sm:$0xff]  ;;  %v1388_v46 = vmul.f32 1.442695, %v1382_v40  ;;  %v3081_v57 = vpop.eup %3080  ;;  %v5715_v40 = vld [vmem:[#allocation79_spill] sm:$0xff]  ;;  %v1356_v41 = vmul.f32 %v4635_v9, %v5717_v34 }
 0x241   :  { %2114 = vperm.xlu1 %2996, %v4256_v14   ;;  %5702 = vst [vmem:[#allocation55_spill] sm:$0xff] %v4646_v61  ;;  %v5709_v61 = vld [vmem:[#allocation106_spill] sm:$0xff]  ;;  %v1137_v35 = vmul.f32 %v4547_v17, %v5711_v38  ;;  %v1096_v39 = vmul.f32 1.442695, %v1088_v10  ;;  %v1134_v18 = vmul.f32 %v4547_v17, %v5715_v40  ;;  %v4700_v38 = vmul.f32 %v4582_v53, %v5718_v52 }
 0x242   :  { %v1456_v1 = vsub.f32 %v5709_v61, %v1431_v24  ;;  %v1505_v24 = vmul.f32 %v4668_v11, %v5712_v42  ;;  %v1101_v10 = vadd.f32 1.0, %v3079_v58  ;;  %v5721_v40 = vld [vmem:[#allocation70_spill] sm:$0xff]  ;;  %3090 = vpow2.f32 %v1388_v46  ;;  %v5726_v46 = vld [vmem:[#allocation105_spill] sm:$0xff] }
 0x243   :  { %v4658_v14 = vpop.permute.xlu1 %1732  ;;  %v1162_v17 = vsub.f32 %v5721_v40, %v1137_v35  ;;  %3092 = vpow2.f32 %v1096_v39  ;;  %v5728_v40 = vld [vmem:[#allocation125_spill] sm:$0xff] }
 0x244   :  { %2476 = vperm.xlu0 %3006, %v4244_v51   ;;  %v4691_v51 = vrot.slane %v5679_v30, %v4437_v0  ;;  %v1462_v42 = vmul.f32 1.442695, %v1456_v1  ;;  %v1579_v0 = vmul.f32 %v4672_v22, %v5720_v20  ;;  %v1175_v1 = vadd.f32 1.0, %v3081_v57 }
 0x245   :  { %2997 = vset.pattern.permute.xlu1 %v5710_v62  ;;  %v2004_v27 = vpop.permute.xlu0 %2003  ;;  %v1233_v62 = vsub.f32 %v5716_v15, %v1208_v25  ;;  %v5722_v25 = vld [vmem:[#allocation84_spill] sm:$0xff]  ;;  %v4718_v20 = vrot.slane %v5679_v30, %v5668_v59  ;;  %v1106_v59 = vmul.f32 %v1101_v10, %v1032_v3  ;;  %v5732_v10 = vld [vmem:[#allocation101_spill] sm:$0xff] }
 0x246   :  { %2147 = vperm.xlu1 %2997, %v4270_v7   ;;  %5714 = vst [vmem:[#allocation58_spill] sm:$0xff] %v4691_v51  ;;  %v1159_v15 = vsub.f32 %v5722_v25, %v1134_v18  ;;  %v4723_v35 = vmul.f32 %v4691_v51, %v2004_v27  ;;  %v5727_v18 = vld [vmem:[#allocation96_spill] sm:$0xff]  ;;  %3094 = vpow2.f32 %v1462_v42  ;;  %v1604_v25 = vsub.f32 %v5728_v40, %v1579_v0  ;;  %v5730_v0 = vld [vmem:[#allocation139_spill] sm:$0xff] }
 0x247   :  { %v4687_v61 = vpop.permute.xlu1 %1740  ;;  %v1381_v57 = vsub.f32 %v5727_v18, %v1356_v41  ;;  %v4734_v27 = vrot.slane %v5679_v30, %v4372_v63  ;;  %v5731_v41 = vld [vmem:[#allocation99_spill] sm:$0xff]  ;;  %v5733_v63 = vld [vmem:[#allocation89_spill] sm:$0xff] }
 0x248   :  { %5713 = vst [vmem:[#allocation52_spill] sm:$0xff] %v4687_v61  ;;  %v5719_v61 = vld [vmem:[#allocation143_spill] sm:$0xff]  ;;  %3008 = vset.pattern.permute.xlu0 %v5447_v48  ;;  %5725 = vst [vmem:[#allocation74_spill] sm:$0xff] %v4723_v35  ;;  %v1164_v53 = vmul.f32 1.442695, %v1159_v15  ;;  %v1236_v42 = vsub.f32 %v5731_v41, %v4700_v38  ;;  %v1282_v15 = vmul.f32 %v4586_v13, %v5732_v10  ;;  %v5456_v41 = vmov 29  }
 0x249   :  { %v1530_v31 = vsub.f32 %v5719_v61, %v1505_v24  ;;  %v4709_v34 = vpop.permute.xlu0 %2015  ;;  %2591 = vperm.xlu0 %3008, %v4270_v7   ;;  %v4714_v24 = vrot.slane %v5679_v30, %v5661_v23  ;;  %v1285_v61 = vmul.f32 %v4586_v13, %v5726_v46  ;;  %v1386_v46 = vmul.f32 1.442695, %v1381_v57 }
 0x24a   :  { %2155 = vperm.xlu1 %2997, %v4191_v16   ;;  %5723 = vst [vmem:[#allocation65_spill] sm:$0xff] %v4709_v34  ;;  %v1238_v16 = vmul.f32 1.442695, %v1233_v62  ;;  %v3083_v34 = vpop.eup %3082  ;;  %v1727_v62 = vmul.f32 %v4718_v20, %v5730_v0  ;;  %v1610_v0 = vmul.f32 1.442695, %v1604_v25 }
 0x24b   :  { %v4720_v58 = vpop.permute.xlu1 %1748  ;;  %v1536_v52 = vmul.f32 1.442695, %v1530_v31  ;;  %v1653_v48 = vmul.f32 %v4714_v24, %v4511_v44  ;;  %v4739_v31 = vpop.eup %3084  ;;  %v1249_v40 = vadd.f32 1.0, %v3083_v34  ;;  %v1310_v51 = vsub.f32 %v5733_v63, %v1285_v61  ;;  %v5737_v63 = vld [vmem:[#allocation145_spill] sm:$0xff] }
 0x24c   :  { %5724 = vst [vmem:[#allocation69_spill] sm:$0xff] %v4720_v58  ;;  %v1170_v58 = vmul.f32 1.442695, %v1162_v17  ;;  %5729 = vst [vmem:[#allocation90_spill] sm:$0xff] %v4739_v31  ;;  %v3087_v3 = vpop.eup %3086  ;;  %3096 = vpow2.f32 %v1238_v16  ;;  %v5735_v16 = vld [vmem:[#allocation107_spill] sm:$0xff]  ;;  %v1752_v61 = vsub.f32 %v5737_v63, %v1727_v62  ;;  %v5739_v62 = vld [vmem:[#allocation122_spill] sm:$0xff] }
 0x24d   :  { %v4736_v39 = vpop.permute.xlu0 %2032  ;;  %2620 = vperm.xlu0 %3008, %v5655_v60   ;;  %v1678_v44 = vsub.f32 %v4555_v54, %v1653_v48  ;;  %3098 = vpow2.f32 %v1536_v52  ;;  %v3089_v31 = vpop.eup %3088  ;;  %v1180_v54 = vmul.f32 %v1175_v1, %v1106_v59  ;;  %v5734_v48 = vld [vmem:[#allocation94_spill] sm:$0xff]  ;;  %v1307_v35 = vsub.f32 %v5735_v16, %v1282_v15 }
 0x24e   :  { %2159 = vperm.xlu1 %2997, %v4202_v4   ;;  %3100 = vpow2.f32 %v1170_v58  ;;  %v1359_v17 = vmul.f32 %v4635_v9, %v5734_v48  ;;  %v1875_v59 = vmul.f32 %v4734_v27, %v4502_v55  ;;  %v4764_v1 = vmul.f32 %v4660_v32, %v4681_v36  ;;  %v5740_v48 = vld [vmem:[#allocation124_spill] sm:$0xff] }
 0x24f   :  { %3102 = vpow2.f32 %v1164_v53  ;;  %v1684_v34 = vmul.f32 1.442695, %v1678_v44  ;;  %v1026_v58 = vadd.f32 1.0, %v3087_v3  ;;  %v1244_v57 = vmul.f32 1.442695, %v1236_v42  ;;  %v3091_v32 = vpop.eup %3090  ;;  %v5742_v36 = vld [vmem:[#allocation128_spill] sm:$0xff] }
 0x250   :  { %v1782_v18 = vpop.permute.xlu1 %1781  ;;  %3104 = vpow2.f32 %v1386_v46  ;;  %v1254_v25 = vmul.f32 %v1249_v40, %v1180_v54  ;;  %v1323_v10 = vadd.f32 1.0, %v3089_v31  ;;  %v1318_v53 = vmul.f32 1.442695, %v1310_v51 }
 0x251   :  { %v4755_v38 = vpop.permute.xlu0 %2040  ;;  %3013 = vset.pattern.permute.xlu0 %v5456_v41  ;;  %3106 = vpow2.f32 %v1610_v0  ;;  %v1312_v44 = vmul.f32 1.442695, %v1307_v35  ;;  %v1384_v15 = vsub.f32 %v5739_v62, %v1359_v17  ;;  %v1430_v55 = vmul.f32 %v4623_v12, %v5740_v48  ;;  %v5743_v17 = vld [vmem:[#allocation130_spill] sm:$0xff]  ;;  %v4788_v0 = vpop.eup %3092  ;;  %v5749_v48 = vld [vmem:[#allocation151_spill] sm:$0xff] }
 0x252   :  { %2176 = vperm.xlu1 %2997, %v5655_v60   ;;  %5736 = vst [vmem:[#allocation68_spill] sm:$0xff] %v4755_v38  ;;  %2517 = vperm.xlu0 %3013, %v4270_v7   ;;  %v5741_v7 = vld [vmem:[#allocation110_spill] sm:$0xff]  ;;  %v1433_v3 = vmul.f32 %v4623_v12, %v5742_v36  ;;  %3108 = vpow2.f32 %v1684_v34  ;;  %v1758_v42 = vmul.f32 1.442695, %v1752_v61  ;;  %v1900_v51 = vsub.f32 %v4535_v45, %v1875_v59  ;;  %v5745_v45 = vld [vmem:[#allocation112_spill] sm:$0xff] }
 0x253   :  { %v1504_v16 = vmul.f32 %v4668_v11, %v5741_v7  ;;  %v4779_v35 = vmul.f32 %v1026_v58, %v4656_v5  ;;  %3110 = vpow2.f32 %v1244_v57  ;;  %v1455_v46 = vsub.f32 %v5743_v17, %v1430_v55  ;;  %v3095_v5 = vpop.eup %3094  ;;  %v5746_v59 = vld [vmem:[#allocation114_spill] sm:$0xff]  ;;  %v5747_v57 = vld [vmem:[#allocation108_spill] sm:$0xff] }
 0x254   :  { %v4766_v52 = vpop.permute.xlu1 %1785  ;;  %v1328_v54 = vmul.f32 %v1323_v10, %v1254_v25  ;;  %3112 = vpow2.f32 %v1318_v53  ;;  %v1507_v34 = vmul.f32 %v4668_v11, %v5745_v45  ;;  %v1397_v63 = vadd.f32 1.0, %v3091_v32  ;;  %v5750_v55 = vld [vmem:[#allocation160_spill] sm:$0xff] }
 0x255   :  { %5738 = vst [vmem:[#allocation11_spill] sm:$0xff] %v4766_v52  ;;  %3114 = vpow2.f32 %v1312_v44  ;;  %v1392_v61 = vmul.f32 1.442695, %v1384_v15  ;;  %v1529_v58 = vsub.f32 %v5746_v59, %v1504_v16  ;;  %v1458_v62 = vsub.f32 %v5747_v57, %v1433_v3  ;;  %v5753_v3 = vld [vmem:[#allocation129_spill] sm:$0xff]  ;;  %v5755_v59 = vld [vmem:[#allocation164_spill] sm:$0xff] }
 0x256   :  { %2184 = vperm.xlu1 %2997, %v4291_v2   ;;  %v2074_v31 = vpop.permute.xlu0 %2073  ;;  %2546 = vperm.xlu0 %3013, %v5655_v60   ;;  %v4786_v2 = vrot.slane %v5679_v30, %v4452_v19  ;;  %v4794_v60 = vrot.slane %v5679_v30, %v4379_v37  ;;  %3116 = vpow2.f32 %v1758_v42  ;;  %v1906_v10 = vmul.f32 1.442695, %v1900_v51  ;;  %v5760_v37 = vld [vmem:[#allocation28_spill] sm:$0xff] }
 0x257   :  { %v1460_v30 = vmul.f32 1.442695, %v1455_v46  ;;  %v1578_v44 = vmul.f32 %v4672_v22, %v5749_v48  ;;  %v1581_v15 = vmul.f32 %v4672_v22, %v5750_v55  ;;  %v1471_v32 = vadd.f32 1.0, %v3095_v5  ;;  %v5754_v46 = vld [vmem:[#allocation131_spill] sm:$0xff] }
 0x258   :  { %v4782_v40 = vpop.permute.xlu1 %1793  ;;  %5744 = vst [vmem:[#allocation15_spill] sm:$0xff] %v4786_v2  ;;  %v1801_v25 = vmul.f32 %v4794_v60, %v1782_v18  ;;  %v5752_v18 = vld [vmem:[#allocation147_spill] sm:$0xff]  ;;  %v1652_v42 = vmul.f32 %v4714_v24, %v5753_v3  ;;  %3118 = vpow2.f32 %v1392_v61  ;;  %v1534_v17 = vmul.f32 1.442695, %v1529_v58  ;;  %v4826_v61 = vld [vmem:[%s5395_s4 + $0x8] sm:$0xff] }
 0x259   :  { %v4810_v16 = vpop.eup %3096  ;;  %v1532_v36 = vsub.f32 %v5752_v18, %v1507_v34  ;;  %v1655_v45 = vmul.f32 %v4714_v24, %v5754_v46  ;;  %v1603_v57 = vsub.f32 %v5755_v59, %v1578_v44  ;;  %v5756_v48 = vmov 25   ;;  %v5758_v46 = vld [vmem:[#allocation133_spill] sm:$0xff] }
 0x25a   :  { %2192 = vperm.xlu1 %2997, %v4303_v29   ;;  %v4800_v53 = vpop.permute.xlu0 %2085  ;;  %2529 = vperm.xlu0 %3013, %v4202_v4   ;;  %v4808_v29 = vmul.f32 %v4786_v2, %v2074_v31  ;;  %v3099_v51 = vpop.eup %3098  ;;  %v1402_v55 = vmul.f32 %v1397_v63, %v1328_v54  ;;  %v1729_v34 = vmul.f32 %v4718_v20, %v4637_v28  ;;  %3120 = vpow2.f32 %v1906_v10  ;;  %v5757_v63 = vld [vmem:[#allocation127_spill] sm:$0xff] }
 0x25b   :  { %5748 = vst [vmem:[#allocation91_spill] sm:$0xff] %v4800_v53  ;;  %v4819_v31 = vpop.eup %3100  ;;  %v1466_v28 = vmul.f32 1.442695, %v1458_v62  ;;  %3122 = vpow2.f32 %v1460_v30  ;;  %v1606_v10 = vsub.f32 %v5757_v63, %v1581_v15  ;;  %v1545_v3 = vadd.f32 1.0, %v3099_v51  ;;  %v5761_v30 = vld [vmem:[#allocation50_spill] sm:$0xff]  ;;  %v5763_v51 = vld [vmem:[#allocation148_spill] sm:$0xff] }
 0x25c   :  { %v1811_v7 = vpop.permute.xlu1 %1810  ;;  %5751 = vst [vmem:[#allocation13_spill] sm:$0xff] %v4808_v29  ;;  %v3103_v54 = vpop.eup %3102  ;;  %v1677_v59 = vsub.f32 %v5758_v46, %v1652_v42  ;;  %v1608_v19 = vmul.f32 1.442695, %v1603_v57  ;;  %v1680_v62 = vsub.f32 %v5760_v37, %v1655_v45  ;;  %v1726_v15 = vmul.f32 %v4718_v20, %v5761_v30  ;;  %v5762_v63 = vld [vmem:[#allocation158_spill] sm:$0xff]  ;;  %v4854_v42 = vld [vmem:[%s5395_s4 + $0x10] sm:$0xff]  ;;  %v4862_v37 = vld [vmem:[%s5396_s5 + $0x20] sm:$0xff] }
 0x25d   :  { %v1826_v4 = vsub.f32 %v1811_v7, %v1801_v25  ;;  %v4834_v25 = vld [vmem:[%s5396_s5 + $0x18] sm:$0xff]  ;;  %v4840_v18 = vpop.eup %3104  ;;  %v1803_v52 = vmul.f32 %v4794_v60, %v5762_v63  ;;  %v1174_v7 = vadd.f32 1.0, %v3103_v54  ;;  %v1476_v53 = vmul.f32 %v1471_v32, %v1402_v55 }
 0x25e   :  { %3000 = vset.pattern.permute.xlu1 %v5756_v48  ;;  %v4829_v58 = vpop.permute.xlu0 %2102  ;;  %2558 = vperm.xlu0 %3013, %v4834_v25   ;;  %v4843_v48 = vpop.f32.mrf.mxu1  ;;  %v1614_v45 = vmul.f32 1.442695, %v1606_v10  ;;  %v5765_v55 = vld [vmem:[#allocation154_spill] sm:$0xff]  ;;  %v1682_v63 = vmul.f32 1.442695, %v1677_v59  ;;  %v1105_v2 = vmul.f32 %v4683_v49, %v4779_v35  ;;  %v1103_v10 = vadd.f32 1.0, %v4788_v0 }
 0x25f   :  { %v1832_v5 = vmul.f32 1.442695, %v1826_v4  ;;  %2225 = vperm.xlu1 %3000, %v4826_v61   ;;  %v1540_v4 = vmul.f32 1.442695, %v1532_v36  ;;  %5759 = vst [vmem:[#allocation57_spill] sm:$0xff] %v4843_v48  ;;  %v3107_v41 = vpop.eup %3106  ;;  %v1754_v36 = vsub.f32 %v5763_v51, %v1729_v34  ;;  %v1800_v34 = vmul.f32 %v4794_v60, %v5765_v55  ;;  %v5767_v35 = vld [vmem:[#allocation161_spill] sm:$0xff] }
 0x260   :  { %v1819_v44 = vpop.permute.xlu1 %1818  ;;  %v2908_v32 = vpop.f32.mrf.mxu1  ;;  %v1550_v46 = vmul.f32 %v1545_v3, %v1476_v53  ;;  %v1619_v30 = vadd.f32 1.0, %v3107_v41  ;;  %v1248_v55 = vadd.f32 1.0, %v4810_v16  ;;  %v4875_v41 = vld [vmem:[%s5395_s4 + $0x20] sm:$0xff]  ;;  %v1034_v0 = vmul.f32 %v4676_v47, %v4764_v1 }
 0x261   :  { %3124 = vpow2.f32 %v1832_v5  ;;  %v1751_v5 = vsub.f32 %v4658_v14, %v1726_v15  ;;  %v1688_v32 = vmul.f32 1.442695, %v1680_v62  ;;  %v1828_v38 = vsub.f32 %v1819_v44, %v1803_v52 }
 0x262   :  { %3126 = vpow2.f32 %v1534_v17  ;;  %v4857_v57 = vpop.permute.xlu0 %2110  ;;  %2562 = vperm.xlu0 %3013, %v4862_v37   ;;  %v3109_v17 = vpop.eup %3108  ;;  %v1762_v14 = vmul.f32 1.442695, %v1754_v36  ;;  %v1825_v44 = vsub.f32 %v5767_v35, %v1800_v34  ;;  %v1177_v16 = vadd.f32 1.0, %v4819_v31 }
 0x263   :  { %2229 = vperm.xlu1 %3000, %v4854_v42   ;;  %5764 = vst [vmem:[#allocation83_spill] sm:$0xff] %v4857_v57  ;;  %3128 = vpow2.f32 %v1466_v28  ;;  %v3111_v54 = vpop.eup %3110  ;;  %v1693_v29 = vadd.f32 1.0, %v3109_v17  ;;  %v1756_v52 = vmul.f32 1.442695, %v1751_v5  ;;  %v1624_v3 = vmul.f32 %v1619_v30, %v1550_v46 }
 0x264   :  { %3130 = vpow2.f32 %v1540_v4  ;;  %v3113_v57 = vpop.eup %3112  ;;  %v1836_v62 = vmul.f32 1.442695, %v1828_v38  ;;  %v1108_v36 = vmul.f32 %v1103_v10, %v1034_v0  ;;  %v5463_v47 = vmov 31  }
 0x265   :  { %v1852_v51 = vpop.permute.xlu1 %1851  ;;  %3132 = vpow2.f32 %v1608_v19  ;;  %v3115_v28 = vpop.eup %3114  ;;  %v1179_v19 = vmul.f32 %v1174_v7, %v1105_v2  ;;  %v1698_v17 = vmul.f32 %v1693_v29, %v1624_v3  ;;  %v4889_v7 = vld [vmem:[%s5396_s5 + $0x8] sm:$0xff]  ;;  %v5769_v31 = vsub.f32 %v5694_v33, %v4577_v6 }
 0x266   :  { %v4878_v53 = vpop.permute.xlu0 %2118  ;;  %v3117_v49 = vpop.eup %3116  ;;  %3134 = vpow2.f32 %v1614_v45  ;;  %v1322_v59 = vadd.f32 1.0, %v3115_v28  ;;  %3019 = vset.pattern.permute.xlu0 %v5463_v47  ;;  %v1830_v29 = vmul.f32 1.442695, %v1825_v44  ;;  %v1182_v46 = vmul.f32 %v1177_v16, %v1108_v36  ;;  %v5772_v44 = vld [vmem:[#allocation115_spill] sm:$0xff]  ;;  %v5794_v47 = vld [vmem:[#allocation146_spill] sm:$0xff] }
 0x267   :  { %2237 = vperm.xlu1 %3000, %v4875_v41   ;;  %5766 = vst [vmem:[#allocation97_spill] sm:$0xff] %v4878_v53  ;;  %3136 = vpow2.f32 %v1682_v63  ;;  %v3119_v15 = vpop.eup %3118  ;;  %v1767_v2 = vadd.f32 1.0, %v3117_v49  ;;  %v506_v38 = vmul.f32 1.442695, %v5769_v31  ;;  %v1253_v45 = vmul.f32 %v1248_v55, %v1179_v19  ;;  %2669 = vperm.xlu0 %3019, %v4826_v61   ;;  %v5803_v53 = vld [vmem:[#allocation18_spill] sm:$0xff] }
 0x268   :  { %3138 = vpow2.f32 %v1688_v32  ;;  %v3121_v1 = vpop.eup %3120  ;;  %v1251_v30 = vadd.f32 1.0, %v3111_v54  ;;  %v1396_v63 = vadd.f32 1.0, %v4840_v18  ;;  %v4900_v28 = vrot.slane %v4843_v48, %v4334_v8 }
 0x269   :  { %v4884_v4 = vpop.permute.xlu1 %1859  ;;  %3140 = vpow2.f32 %v1762_v14  ;;  %v3123_v5 = vpop.eup %3122  ;;  %v1325_v14 = vadd.f32 1.0, %v3113_v57  ;;  %v1327_v6 = vmul.f32 %v1322_v59, %v1253_v45  ;;  %v1772_v55 = vmul.f32 %v1767_v2, %v1698_v17 }
 0x26a   :  { %5768 = vst [vmem:[#allocation63_spill] sm:$0xff] %v4884_v4  ;;  %3142 = vpow2.f32 %v1756_v52  ;;  %5770 = vst [vmem:[#allocation17_spill] sm:$0xff] %v4900_v28  ;;  %v1915_v19 = vadd.f32 1.0, %v3121_v1  ;;  %v5771_v54 = vsub.f32 %v4606_v43, %v4592_v26  ;;  %v1470_v35 = vadd.f32 1.0, %v3123_v5 }
 0x26b   :  { %2254 = vperm.xlu1 %3000, %v4889_v7   ;;  %v2152_v34 = vpop.permute.xlu0 %2151  ;;  %3144 = vpow2.f32 %v1836_v62  ;;  %v1874_v8 = vmul.f32 %v4734_v27, %v1852_v51  ;;  %2673 = vperm.xlu0 %3019, %v4854_v42   ;;  %v1256_v3 = vmul.f32 %v1251_v30, %v1182_v46  ;;  %v1401_v43 = vmul.f32 %v1396_v63, %v1327_v6  ;;  %v4929_v63 = vld [vmem:[%s5395_s4 + $0x18] sm:$0xff]  ;;  %v5778_v6 = vld [vmem:[#allocation25_spill] sm:$0xff] }
 0x26c   :  { %v1978_v18 = vmul.f32 1.442695, %v5771_v54  ;;  %3146 = vpow2.f32 %v1830_v29  ;;  %v4913_v36 = vmul.f32 %v4900_v28, %v2152_v34  ;;  %v1399_v17 = vadd.f32 1.0, %v3119_v15  ;;  %v4921_v34 = vld [vmem:[%s5395_s4] sm:$0xff] }
 0x26d   :  { %v1864_v32 = vpop.permute.xlu1 %1863  ;;  %3148 = vpow2.f32 %v506_v38  ;;  %v1330_v31 = vmul.f32 %v1325_v14, %v1256_v3  ;;  %v5775_v5 = vmov 26   ;;  %v1475_v46 = vmul.f32 %v1470_v35, %v1401_v43 }
 0x26e   :  { %v3125_v10 = vpop.eup %3124  ;;  %v1877_v33 = vmul.f32 %v4734_v27, %v1864_v32  ;;  %5774 = vst [vmem:[#allocation87_spill] sm:$0xff] %v4913_v36  ;;  %3150 = vpow2.f32 %v1978_v18  ;;  %v5811_v36 = vld [vmem:[#allocation62_spill] sm:$0xff] }
 0x26f   :  { %v1841_v49 = vadd.f32 1.0, %v3125_v10  ;;  %2262 = vperm.xlu1 %3000, %v4834_v25   ;;  %v3127_v52 = vpop.eup %3126  ;;  %v4909_v0 = vpop.permute.xlu0 %2163  ;;  %2677 = vperm.xlu0 %3019, %v4929_v63   ;;  %v5777_v10 = vsub.f32 %v5703_v50, %v4617_v21  ;;  %v1404_v54 = vmul.f32 %v1399_v17, %v1330_v31  ;;  %v5782_v21 = vld [vmem:[#allocation54_spill] sm:$0xff]  ;;  %v5783_v50 = vld [vmem:[#allocation31_spill] sm:$0xff]  ;;  %v5787_v31 = vld [vmem:[#allocation36_spill] sm:$0xff] }
 0x270   :  { %v1902_v57 = vsub.f32 %v5772_v44, %v1877_v33  ;;  %5773 = vst [vmem:[#allocation19_spill] sm:$0xff] %v4909_v0  ;;  %v3129_v16 = vpop.eup %3128  ;;  %v1544_v45 = vadd.f32 1.0, %v3127_v52  ;;  %v645_v33 = vsub.f32 %v5778_v6, %v4631_v56  ;;  %v5781_v44 = vld [vmem:[#allocation144_spill] sm:$0xff]  ;;  %v719_v3 = vsub.f32 %v5783_v50, %v5782_v21  ;;  %v5792_v21 = vld [vmem:[#allocation169_spill] sm:$0xff] }
 0x271   :  { %v1846_v59 = vmul.f32 %v1841_v49, %v1772_v55  ;;  %v1881_v62 = vpop.permute.xlu1 %1880  ;;  %v3131_v26 = vpop.eup %3130  ;;  %v1473_v38 = vadd.f32 1.0, %v3129_v16  ;;  %v580_v14 = vmul.f32 1.442695, %v5777_v10 }
 0x272   :  { %v1910_v2 = vmul.f32 1.442695, %v1902_v57  ;;  %v1899_v1 = vsub.f32 %v1881_v62, %v1874_v8  ;;  %v3133_v51 = vpop.eup %3132  ;;  %v1547_v18 = vadd.f32 1.0, %v3131_v26  ;;  %v5780_v8 = vld [vmem:[#allocation10_spill] sm:$0xff]  ;;  %v654_v17 = vmul.f32 1.442695, %v645_v33 }
 0x273   :  { %v4915_v29 = vmul.f32 %v1915_v19, %v1846_v59  ;;  %3001 = vset.pattern.permute.xlu1 %v5775_v5  ;;  %v4924_v15 = vpop.permute.xlu0 %2180  ;;  %v3135_v32 = vpop.eup %3134  ;;  %v1618_v52 = vadd.f32 1.0, %v3133_v51  ;;  %v396_v57 = vmul.f32 %v5781_v44, %v5780_v8  ;;  %v1549_v59 = vmul.f32 %v1544_v45, %v1475_v46  ;;  %2681 = vperm.xlu0 %3019, %v4875_v41   ;;  %v5788_v5 = vld [vmem:[#allocation167_spill] sm:$0xff]  ;;  %v5790_v44 = vld [vmem:[#allocation12_spill] sm:$0xff] }
 0x274   :  { %3152 = vpow2.f32 %v1910_v2  ;;  %v1904_v30 = vmul.f32 1.442695, %v1899_v1  ;;  %2295 = vperm.xlu1 %3001, %v4921_v34   ;;  %5776 = vst [vmem:[#allocation24_spill] sm:$0xff] %v4924_v15  ;;  %v3137_v19 = vpop.eup %3136  ;;  %v1478_v56 = vmul.f32 %v1473_v38, %v1404_v54  ;;  %v1621_v62 = vadd.f32 1.0, %v3135_v32  ;;  %v5785_v2 = vld [vmem:[#allocation35_spill] sm:$0xff]  ;;  %v5786_v1 = vld [vmem:[#allocation162_spill] sm:$0xff] }
 0x275   :  { %v4937_v55 = vpop.permute.xlu1 %1888  ;;  %v3139_v35 = vpop.eup %3138  ;;  %v768_v51 = vmul.f32 %v5786_v1, %v5785_v2  ;;  %v1623_v38 = vmul.f32 %v1618_v52, %v1549_v59  ;;  %v1692_v46 = vadd.f32 1.0, %v3137_v19  ;;  %v5789_v54 = vld [vmem:[#allocation39_spill] sm:$0xff]  ;;  %v5793_v2 = vld [vmem:[#allocation14_spill] sm:$0xff]  ;;  %v728_v52 = vmul.f32 1.442695, %v719_v3  ;;  %v5800_v3 = vld [vmem:[#allocation172_spill] sm:$0xff] }
 0x276   :  { %5779 = vst [vmem:[#allocation56_spill] sm:$0xff] %v4937_v55  ;;  %3154 = vpow2.f32 %v1904_v30  ;;  %v3141_v16 = vpop.eup %3140  ;;  %v842_v30 = vmul.f32 %v5788_v5, %v5787_v31  ;;  %v1552_v45 = vmul.f32 %v1547_v18, %v1478_v56  ;;  %v1695_v32 = vadd.f32 1.0, %v3139_v35  ;;  %v5791_v33 = vld [vmem:[#allocation51_spill] sm:$0xff]  ;;  %v5795_v35 = vld [vmem:[#allocation33_spill] sm:$0xff]  ;;  %v5810_v55 = vld [vmem:[#allocation66_spill] sm:$0xff] }
 0x277   :  { %v4946_v43 = vpop.permute.xlu0 %2188  ;;  %v3143_v26 = vpop.eup %3142  ;;  %3156 = vpow2.f32 %v580_v14  ;;  %v4957_v8 = vmul.f32 %v5788_v5, %v5789_v54  ;;  %v426_v14 = vsub.f32 %v5790_v44, %v396_v57  ;;  %v916_v50 = vmul.f32 %v5792_v21, %v5791_v33  ;;  %2710 = vperm.xlu0 %3019, %v4862_v37   ;;  %v5796_v57 = vld [vmem:[#allocation45_spill] sm:$0xff] }
 0x278   :  { %2303 = vperm.xlu1 %3001, %v4854_v42   ;;  %5784 = vst [vmem:[#allocation113_spill] sm:$0xff] %v4946_v43  ;;  %v3145_v6 = vpop.eup %3144  ;;  %v4964_v49 = vmul.f32 %v5794_v47, %v5793_v2  ;;  %v1626_v31 = vmul.f32 %v1621_v62, %v1552_v45  ;;  %v1769_v0 = vadd.f32 1.0, %v3141_v16  ;;  %v1766_v18 = vadd.f32 1.0, %v3143_v26  ;;  %v5798_v26 = vld [vmem:[#allocation44_spill] sm:$0xff] }
 0x279   :  { %v4953_v10 = vpop.permute.xlu1 %1896  ;;  %v3147_v19 = vpop.eup %3146  ;;  %3158 = vpow2.f32 %v654_v17  ;;  %v793_v59 = vsub.f32 %v5795_v35, %v768_v51  ;;  %v867_v56 = vsub.f32 %v5796_v57, %v842_v30  ;;  %v1697_v44 = vmul.f32 %v1692_v46, %v1623_v38  ;;  %v5799_v17 = vld [vmem:[#allocation48_spill] sm:$0xff]  ;;  %v5802_v35 = vld [vmem:[#allocation41_spill] sm:$0xff] }
 0x27a   :  { %v3149_v54 = vpop.eup %3148  ;;  %v1700_v33 = vmul.f32 %v1695_v32, %v1626_v31  ;;  %v1843_v47 = vadd.f32 1.0, %v3145_v6  ;;  %v4972_v16 = vrot.slane %v4843_v48, %v5661_v23  ;;  %v4974_v62 = vmul.f32 1.442695, %v426_v14  ;;  %v5801_v51 = vld [vmem:[#allocation72_spill] sm:$0xff]  ;;  %v5804_v38 = vld [vmem:[#allocation153_spill] sm:$0xff]  ;;  %v4988_v23 = vld [vmem:[%s5396_s5] sm:$0xff] }
 0x27b   :  { %v941_v45 = vsub.f32 %v5798_v26, %v916_v50  ;;  %v990_v43 = vmul.f32 %v5800_v3, %v5799_v17  ;;  %v1064_v30 = vmul.f32 %v5802_v35, %v5801_v51  ;;  %v3151_v57 = vpop.eup %3150  ;;  %v4983_v46 = vmul.f32 %v5804_v38, %v5803_v53  ;;  %5805 = vst [vmem:[#allocation21_spill] sm:$0xff] %v4988_v23  ;;  %v5806_v50 = vld [vmem:[#allocation90_spill] sm:$0xff] }
 0x27c   :  { %2307 = vperm.xlu1 %3001, %v4929_v63   ;;  %v2222_v5 = vpop.permute.xlu0 %2221  ;;  %5797 = vst [vmem:[#allocation102_spill] sm:$0xff] %v4972_v16  ;;  %v1771_v32 = vmul.f32 %v1766_v18, %v1697_v44  ;;  %v1840_v6 = vadd.f32 1.0, %v3147_v19  ;;  %v1774_v31 = vmul.f32 %v1769_v0, %v1700_v33  ;;  %v443_v26 = vadd.f32 1.0, %v5806_v50  ;;  %v5812_v50 = vld [vmem:[#allocation67_spill] sm:$0xff] }
 0x27d   :  { %3160 = vpow2.f32 %v728_v52  ;;  %v802_v17 = vmul.f32 1.442695, %v793_v59  ;;  %v876_v51 = vmul.f32 1.442695, %v867_v56  ;;  %v512_v53 = vadd.f32 1.0, %v3149_v54  ;;  %v5813_v52 = vld [vmem:[#allocation46_spill] sm:$0xff] }
 0x27e   :  { %v1930_v2 = vpop.permute.xlu1 %1929  ;;  %v1848_v38 = vmul.f32 %v1843_v47, %v1774_v31  ;;  %v4997_v0 = vmul.f32 %v4972_v16, %v2222_v5  ;;  %v950_v33 = vmul.f32 1.442695, %v941_v45  ;;  %v1015_v4 = vsub.f32 %v5810_v55, %v990_v43  ;;  %v5006_v54 = vld [vmem:[%s5396_s5 + $0x10] sm:$0xff]  ;;  %v5815_v47 = vld [vmem:[#allocation16_spill] sm:$0xff]  ;;  %v5816_v43 = vld [vmem:[#allocation22_spill] sm:$0xff] }
 0x27f   :  { %v1089_v15 = vsub.f32 %v5811_v36, %v1064_v30  ;;  %v1138_v59 = vmul.f32 %v5813_v52, %v5812_v50  ;;  %v1845_v56 = vmul.f32 %v1840_v6, %v1771_v32  ;;  %5814 = vst [vmem:[#allocation73_spill] sm:$0xff] %v5006_v54  ;;  %v495_v55 = vsub.f32 %v5815_v47, %v4964_v49  ;;  %v5817_v36 = vld [vmem:[#allocation157_spill] sm:$0xff]  ;;  %v5818_v30 = vld [vmem:[#allocation27_spill] sm:$0xff] }
 0x280   :  { %2324 = vperm.xlu1 %3001, %v4988_v23   ;;  %v4992_v28 = vpop.permute.xlu0 %2233  ;;  %5809 = vst [vmem:[#allocation76_spill] sm:$0xff] %v4997_v0  ;;  %v618_v45 = vmul.f32 %v5817_v36, %v5816_v43  ;;  %v5819_v31 = vld [vmem:[#allocation155_spill] sm:$0xff]  ;;  %3162 = vpow2.f32 %v802_v17  ;;  %v517_v43 = vmul.f32 %v512_v53, %v443_v26  ;;  %v1024_v36 = vmul.f32 1.442695, %v1015_v4  ;;  %v5826_v49 = vld [vmem:[#allocation29_spill] sm:$0xff] }
 0x281   :  { %v3153_v14 = vpop.eup %3152  ;;  %5807 = vst [vmem:[#allocation26_spill] sm:$0xff] %v4992_v28  ;;  %v1988_v28 = vadd.f32 1.0, %v3151_v57  ;;  %v692_v32 = vmul.f32 %v5819_v31, %v5818_v30  ;;  %3164 = vpow2.f32 %v876_v51  ;;  %v1098_v17 = vmul.f32 1.442695, %v1089_v15  ;;  %v5823_v30 = vld [vmem:[#allocation88_spill] sm:$0xff] }
 0x282   :  { %v1917_v18 = vadd.f32 1.0, %v3153_v14  ;;  %v4994_v19 = vpop.permute.xlu1 %1933  ;;  %v5820_v14 = vld [vmem:[#allocation95_spill] sm:$0xff]  ;;  %3166 = vpow2.f32 %v950_v33  ;;  %v1163_v31 = vsub.f32 %v5823_v30, %v1138_v59  ;;  %v1949_v0 = vmul.f32 %v5826_v49, %v1930_v2  ;;  %v5830_v59 = vld [vmem:[#allocation30_spill] sm:$0xff] }
 0x283   :  { %5808 = vst [vmem:[#allocation120_spill] sm:$0xff] %v4994_v19  ;;  %v3155_v44 = vpop.eup %3154  ;;  %v5824_v19 = vld [vmem:[#allocation85_spill] sm:$0xff]  ;;  %v502_v33 = vmul.f32 1.442695, %v495_v55  ;;  %3168 = vpow2.f32 %v1024_v36 }
 0x284   :  { %v1914_v23 = vadd.f32 1.0, %v3155_v44  ;;  %2332 = vperm.xlu1 %3001, %v5006_v54   ;;  %v5009_v5 = vmul.f32 %v1917_v18, %v1848_v38  ;;  %v5017_v57 = vpop.permute.xlu0 %2250  ;;  %v3157_v6 = vpop.eup %3156  ;;  %v5821_v44 = vld [vmem:[#allocation40_spill] sm:$0xff]  ;;  %v1286_v51 = vmul.f32 %v4586_v13, %v5824_v19  ;;  %3170 = vpow2.f32 %v1098_v17 }
 0x285   :  { %v1212_v50 = vmul.f32 %v5821_v44, %v5820_v14  ;;  %v5822_v18 = vld [vmem:[#allocation20_spill] sm:$0xff]  ;;  %v586_v14 = vadd.f32 1.0, %v3157_v6  ;;  %v5833_v6 = vld [vmem:[#allocation142_spill] sm:$0xff] }
 0x286   :  { %v1919_v16 = vmul.f32 %v1914_v23, %v1845_v56  ;;  %v5021_v38 = vpop.permute.xlu1 %1941  ;;  %v569_v47 = vsub.f32 %v5822_v18, %v4983_v46  ;;  %v5825_v23 = vld [vmem:[#allocation23_spill] sm:$0xff]  ;;  %v5827_v46 = vld [vmem:[#allocation74_spill] sm:$0xff]  ;;  %v3159_v15 = vpop.eup %3158  ;;  %v717_v18 = vsub.f32 %v5830_v59, %v692_v32  ;;  %v5831_v19 = vld [vmem:[#allocation80_spill] sm:$0xff]  ;;  %v1951_v2 = vmul.f32 %v5826_v49, %v5833_v6 }
 0x287   :  { %v643_v56 = vsub.f32 %v5825_v23, %v618_v45  ;;  %v5828_v26 = vsub.f32 %v4736_v39, %v5827_v46  ;;  %v591_v45 = vmul.f32 %v586_v14, %v517_v43  ;;  %v1172_v39 = vmul.f32 1.442695, %v1163_v31  ;;  %v5834_v46 = vld [vmem:[#allocation111_spill] sm:$0xff] }
 0x288   :  { %v5030_v54 = vmul.f32 %v1988_v28, %v1919_v16  ;;  %2340 = vperm.xlu1 %3001, %v4862_v37   ;;  %v5038_v4 = vpop.permute.xlu0 %2258  ;;  %v1237_v28 = vsub.f32 %v5831_v19, %v1212_v50  ;;  %v5832_v16 = vld [vmem:[#allocation118_spill] sm:$0xff]  ;;  %v5836_v32 = vmov 27   ;;  %v660_v19 = vadd.f32 1.0, %v3159_v15 }
 0x289   :  { %v2054_v53 = vmul.f32 1.442695, %v5828_v26  ;;  %5829 = vst [vmem:[#allocation106_spill] sm:$0xff] %v5038_v4  ;;  %v1360_v37 = vmul.f32 %v4635_v9, %v5832_v16  ;;  %v1311_v26 = vsub.f32 %v5834_v46, %v1286_v51  ;;  %v5835_v4 = vld [vmem:[#allocation104_spill] sm:$0xff]  ;;  %v5837_v50 = vld [vmem:[#allocation34_spill] sm:$0xff] }
 0x28a   :  { %v1959_v30 = vpop.permute.xlu1 %1958  ;;  %v1434_v55 = vmul.f32 %v4623_v12, %v5835_v4  ;;  %v5052_v59 = vmul.f32 %v5786_v1, %v5837_v50  ;;  %v576_v17 = vmul.f32 1.442695, %v569_v47  ;;  %v1246_v31 = vmul.f32 1.442695, %v1237_v28  ;;  %v5838_v51 = vld [vmem:[#allocation100_spill] sm:$0xff] }
 0x28b   :  { %v1974_v23 = vsub.f32 %v1959_v30, %v1949_v0  ;;  %3172 = vpow2.f32 %v2054_v53  ;;  %v3161_v0 = vpop.eup %3160  ;;  %v1385_v14 = vsub.f32 %v5838_v51, %v1360_v37  ;;  %v5839_v16 = vld [vmem:[#allocation140_spill] sm:$0xff]  ;;  %v650_v6 = vmul.f32 1.442695, %v643_v56  ;;  %v5840_v53 = vld [vmem:[#allocation134_spill] sm:$0xff] }
 0x28c   :  { %3004 = vset.pattern.permute.xlu1 %v5836_v32  ;;  %v5055_v36 = vpop.permute.xlu0 %2266  ;;  %v1508_v4 = vmul.f32 %v4668_v11, %v5839_v16  ;;  %v665_v46 = vmul.f32 %v660_v19, %v591_v45  ;;  %v1320_v15 = vmul.f32 1.442695, %v1311_v26  ;;  %v5841_v32 = vld [vmem:[#allocation123_spill] sm:$0xff]  ;;  %v724_v47 = vmul.f32 1.442695, %v717_v18  ;;  %v5845_v18 = vld [vmem:[#allocation149_spill] sm:$0xff] }
 0x28d   :  { %v1980_v43 = vmul.f32 1.442695, %v1974_v23  ;;  %2373 = vperm.xlu1 %3004, %v4826_v61   ;;  %v1459_v23 = vsub.f32 %v5840_v53, %v1434_v55  ;;  %v1582_v50 = vmul.f32 %v4672_v22, %v5841_v32  ;;  %v734_v28 = vadd.f32 1.0, %v3161_v0  ;;  %v3163_v51 = vpop.eup %3162  ;;  %v5842_v45 = vld [vmem:[#allocation119_spill] sm:$0xff]  ;;  %v5847_v53 = vld [vmem:[#allocation141_spill] sm:$0xff] }
 0x28e   :  { %v1967_v30 = vpop.permute.xlu1 %1966  ;;  %v1394_v56 = vmul.f32 1.442695, %v1385_v14  ;;  %v1533_v19 = vsub.f32 %v5842_v45, %v1508_v4  ;;  %v3165_v55 = vpop.eup %3164  ;;  %v5072_v0 = vrot.slane %v4843_v48, %v5845_v18  ;;  %v5846_v14 = vld [vmem:[#allocation171_spill] sm:$0xff]  ;;  %v1730_v32 = vmul.f32 %v4718_v20, %v5847_v53 }
 0x28f   :  { %3174 = vpow2.f32 %v1980_v43  ;;  %v1976_v1 = vsub.f32 %v1967_v30, %v1951_v2  ;;  %v5843_v2 = vld [vmem:[#allocation53_spill] sm:$0xff]  ;;  %v5844_v43 = vld [vmem:[#allocation32_spill] sm:$0xff]  ;;  %v739_v30 = vmul.f32 %v734_v28, %v665_v46  ;;  %v1607_v4 = vsub.f32 %v5846_v14, %v1582_v50  ;;  %v5848_v45 = vld [vmem:[#allocation43_spill] sm:$0xff] }
 0x290   :  { %3176 = vpow2.f32 %v1172_v39  ;;  %v1656_v39 = vmul.f32 %v4714_v24, %v5843_v2  ;;  %v791_v16 = vsub.f32 %v5844_v43, %v5052_v59  ;;  %v865_v2 = vsub.f32 %v5848_v45, %v4957_v8  ;;  %v5850_v18 = vld [vmem:[#allocation47_spill] sm:$0xff] }
 0x291   :  { %3178 = vpow2.f32 %v4974_v62  ;;  %v1984_v37 = vmul.f32 1.442695, %v1976_v1  ;;  %2377 = vperm.xlu1 %3004, %v4854_v42   ;;  %v2300_v26 = vpop.permute.xlu0 %2299  ;;  %v3167_v1 = vpop.eup %3166  ;;  %v808_v59 = vadd.f32 1.0, %v3163_v51  ;;  %v1804_v46 = vmul.f32 %v4794_v60, %v4782_v40 }
 0x292   :  { %3180 = vpow2.f32 %v1246_v31  ;;  %v1468_v31 = vmul.f32 1.442695, %v1459_v23  ;;  %v882_v28 = vadd.f32 1.0, %v3165_v55  ;;  %v5090_v8 = vmul.f32 %v5072_v0, %v2300_v26  ;;  %v3169_v40 = vpop.eup %3168 }
 0x293   :  { %3182 = vpow2.f32 %v1984_v37  ;;  %v2000_v62 = vpop.permute.xlu1 %1999  ;;  %v1542_v37 = vmul.f32 1.442695, %v1533_v19  ;;  %v813_v50 = vmul.f32 %v808_v59, %v739_v30  ;;  %v956_v51 = vadd.f32 1.0, %v3167_v1  ;;  %v3171_v55 = vpop.eup %3170 }
 0x294   :  { %3184 = vpow2.f32 %v1320_v15  ;;  %v5849_v15 = vld [vmem:[#allocation137_spill] sm:$0xff]  ;;  %v5093_v53 = vmul.f32 1.442695, %v865_v2  ;;  %v1952_v1 = vmul.f32 %v5826_v49, %v5021_v38  ;;  %v1104_v38 = vadd.f32 1.0, %v3171_v55 }
 0x295   :  { %3186 = vpow2.f32 %v502_v33  ;;  %2385 = vperm.xlu1 %3004, %v4875_v41   ;;  %v1681_v23 = vsub.f32 %v5849_v15, %v1656_v39  ;;  %v5083_v43 = vpop.permute.xlu0 %2311  ;;  %v1878_v33 = vmul.f32 %v4734_v27, %v5850_v18  ;;  %v1616_v41 = vmul.f32 1.442695, %v1607_v4 }
 0x296   :  { %3188 = vpow2.f32 %v1394_v56  ;;  %v5851_v56 = vld [vmem:[#allocation69_spill] sm:$0xff]  ;;  %v798_v39 = vmul.f32 1.442695, %v791_v16  ;;  %v887_v59 = vmul.f32 %v882_v28, %v813_v50  ;;  %v1030_v4 = vadd.f32 1.0, %v3169_v40 }
 0x297   :  { %3190 = vpow2.f32 %v576_v17  ;;  %v5087_v14 = vpop.permute.xlu1 %2007  ;;  %v1755_v19 = vsub.f32 %v5851_v56, %v1730_v32  ;;  %v5852_v17 = vld [vmem:[#allocation170_spill] sm:$0xff]  ;;  %v1690_v26 = vmul.f32 1.442695, %v1681_v23  ;;  %v5856_v32 = vld [vmem:[#allocation13_spill] sm:$0xff] }
 0x298   :  { %3192 = vpow2.f32 %v1468_v31  ;;  %v1829_v30 = vsub.f32 %v5852_v17, %v1804_v46  ;;  %v3173_v45 = vpop.eup %3172  ;;  %v5853_v46 = vld [vmem:[#allocation49_spill] sm:$0xff]  ;;  %v5855_v56 = vld [vmem:[#allocation58_spill] sm:$0xff]  ;;  %v5857_v48 = vsub.f32 %v4829_v58, %v5856_v32 }
 0x299   :  { %3194 = vpow2.f32 %v650_v6  ;;  %2402 = vperm.xlu1 %3004, %v4889_v7   ;;  %v5099_v31 = vpop.permute.xlu0 %2328  ;;  %v1903_v6 = vsub.f32 %v4953_v10, %v1878_v33  ;;  %v914_v28 = vmul.f32 %v5792_v21, %v5853_v46  ;;  %v1764_v15 = vmul.f32 1.442695, %v1755_v19  ;;  %v5854_v33 = vld [vmem:[#allocation55_spill] sm:$0xff] }
 0x29a   :  { %3196 = vpow2.f32 %v1542_v37  ;;  %v961_v37 = vmul.f32 %v956_v51, %v887_v59  ;;  %v1838_v50 = vmul.f32 1.442695, %v1829_v30  ;;  %v1977_v40 = vsub.f32 %v5854_v33, %v1952_v1  ;;  %v5858_v59 = vld [vmem:[#allocation42_spill] sm:$0xff] }
 0x29b   :  { %3198 = vpow2.f32 %v724_v47  ;;  %v5102_v16 = vpop.permute.xlu1 %2011  ;;  %v2063_v47 = vadd.f32 1.0, %v3173_v45  ;;  %v2022_v17 = vmul.f32 %v5855_v56, %v2000_v62  ;;  %v2126_v21 = vmul.f32 1.442695, %v5857_v48 }
 0x29c   :  { %v3175_v2 = vpop.eup %3174  ;;  %3200 = vpow2.f32 %v1616_v41  ;;  %v1035_v41 = vmul.f32 %v1030_v4, %v961_v37  ;;  %v1912_v19 = vmul.f32 1.442695, %v1903_v6  ;;  %v5859_v48 = vmov 28  }
 0x29d   :  { %v3177_v23 = vpop.eup %3176  ;;  %v1989_v18 = vadd.f32 1.0, %v3175_v2  ;;  %2410 = vperm.xlu1 %3004, %v4834_v25   ;;  %3202 = vpow2.f32 %v1690_v26  ;;  %v939_v25 = vsub.f32 %v5858_v59, %v914_v28  ;;  %v1986_v6 = vmul.f32 1.442695, %v1977_v40  ;;  %v5860_v28 = vld [vmem:[#allocation59_spill] sm:$0xff]  ;;  %v5862_v40 = vld [vmem:[#allocation65_spill] sm:$0xff]  ;;  %v5864_v59 = vld [vmem:[#allocation60_spill] sm:$0xff] }
 0x29e   :  { %v3179_v10 = vpop.eup %3178  ;;  %3204 = vpow2.f32 %v798_v39  ;;  %v1178_v2 = vadd.f32 1.0, %v3177_v23  ;;  %v1109_v46 = vmul.f32 %v1104_v38, %v1035_v41  ;;  %v988_v37 = vmul.f32 %v5800_v3, %v5860_v28  ;;  %v5863_v3 = vld [vmem:[#allocation64_spill] sm:$0xff] }
 0x29f   :  { %v3181_v51 = vpop.eup %3180  ;;  %v1994_v55 = vmul.f32 %v1989_v18, %v4915_v29  ;;  %v2029_v30 = vpop.permute.xlu1 %2028  ;;  %3206 = vpow2.f32 %v1764_v15  ;;  %v5861_v15 = vld [vmem:[#allocation71_spill] sm:$0xff] }
 0x2a0   :  { %v3183_v45 = vpop.eup %3182  ;;  %v2047_v26 = vsub.f32 %v2029_v30, %v2022_v17  ;;  %3208 = vpow2.f32 %v1838_v50  ;;  %v1252_v4 = vadd.f32 1.0, %v3181_v51  ;;  %v1062_v23 = vmul.f32 %v5802_v35, %v5861_v15 }
 0x2a1   :  { %v3185_v1 = vpop.eup %3184  ;;  %v5116_v62 = vmul.f32 %v2063_v47, %v1994_v55  ;;  %v1991_v58 = vadd.f32 1.0, %v3183_v45  ;;  %3005 = vset.pattern.permute.xlu1 %v5859_v48  ;;  %3210 = vpow2.f32 %v2126_v21  ;;  %v1183_v47 = vmul.f32 %v1178_v2, %v1109_v46  ;;  %v5866_v46 = vld [vmem:[#allocation93_spill] sm:$0xff] }
 0x2a2   :  { %v3187_v39 = vpop.eup %3186  ;;  %v2052_v32 = vmul.f32 1.442695, %v2047_v26  ;;  %2443 = vperm.xlu1 %3005, %v4921_v34   ;;  %3212 = vpow2.f32 %v1912_v19  ;;  %v1326_v33 = vadd.f32 1.0, %v3185_v1  ;;  %v2026_v17 = vmul.f32 %v5855_v56, %v5862_v40  ;;  %v5865_v26 = vld [vmem:[#allocation81_spill] sm:$0xff] }
 0x2a3   :  { %v3189_v29 = vpop.eup %3188  ;;  %v5125_v38 = vmul.f32 %v1991_v58, %v5009_v5  ;;  %v5127_v50 = vpop.permute.xlu1 %2036  ;;  %v441_v51 = vadd.f32 1.0, %v3179_v10  ;;  %v510_v41 = vadd.f32 1.0, %v3187_v39  ;;  %v1013_v35 = vsub.f32 %v5863_v3, %v988_v37  ;;  %v5867_v37 = vld [vmem:[#allocation86_spill] sm:$0xff] }
 0x2a4   :  { %v3191_v18 = vpop.eup %3190  ;;  %3214 = vpow2.f32 %v2052_v32  ;;  %v1257_v55 = vmul.f32 %v1252_v4, %v1183_v47  ;;  %v1400_v5 = vadd.f32 1.0, %v3189_v29  ;;  %v946_v45 = vmul.f32 1.442695, %v939_v25 }
 0x2a5   :  { %v3193_v21 = vpop.eup %3192  ;;  %3216 = vpow2.f32 %v5093_v53  ;;  %v1087_v2 = vsub.f32 %v5864_v59, %v1062_v23  ;;  %v1136_v1 = vmul.f32 %v5813_v52, %v5865_v26  ;;  %v1210_v10 = vmul.f32 %v5821_v44, %v5866_v46  ;;  %v5868_v44 = vld [vmem:[#allocation78_spill] sm:$0xff]  ;;  %v5869_v26 = vld [vmem:[#allocation103_spill] sm:$0xff] }
 0x2a6   :  { %v3195_v19 = vpop.eup %3194  ;;  %3218 = vpow2.f32 %v1986_v6  ;;  %2451 = vperm.xlu1 %3005, %v4854_v42   ;;  %v1331_v39 = vmul.f32 %v1326_v33, %v1257_v55  ;;  %v1474_v32 = vadd.f32 1.0, %v3193_v21  ;;  %v515_v29 = vmul.f32 %v510_v41, %v441_v51  ;;  %v5870_v21 = vld [vmem:[#allocation116_spill] sm:$0xff] }
 0x2a7   :  { %v3197_v30 = vpop.eup %3196  ;;  %v2045_v58 = vpop.permute.xlu1 %2044  ;;  %v1020_v6 = vmul.f32 1.442695, %v1013_v35  ;;  %v1161_v15 = vsub.f32 %v5867_v37, %v1136_v1  ;;  %v584_v47 = vadd.f32 1.0, %v3191_v18  ;;  %3220 = vpow2.f32 %v946_v45 }
 0x2a8   :  { %v3199_v53 = vpop.eup %3198  ;;  %v2051_v28 = vsub.f32 %v2045_v58, %v2026_v17  ;;  %v1405_v25 = vmul.f32 %v1400_v5, %v1331_v39  ;;  %v1548_v40 = vadd.f32 1.0, %v3197_v30  ;;  %v1094_v3 = vmul.f32 1.442695, %v1087_v2  ;;  %v5873_v39 = vld [vmem:[#allocation126_spill] sm:$0xff] }
 0x2a9   :  { %v3201_v4 = vpop.eup %3200  ;;  %v1235_v59 = vsub.f32 %v5868_v44, %v1210_v10  ;;  %v1284_v33 = vmul.f32 %v4586_v13, %v5869_v26  ;;  %v1358_v51 = vmul.f32 %v4635_v9, %v5870_v21  ;;  %v1168_v5 = vmul.f32 1.442695, %v1161_v15  ;;  %v5872_v10 = vld [vmem:[#allocation21_spill] sm:$0xff] }
 0x2aa   :  { %v2060_v23 = vmul.f32 1.442695, %v2051_v28  ;;  %2455 = vperm.xlu1 %3005, %v4929_v63   ;;  %v3203_v52 = vpop.eup %3202  ;;  %v1479_v41 = vmul.f32 %v1474_v32, %v1405_v25  ;;  %v1622_v35 = vadd.f32 1.0, %v3201_v4  ;;  %v5871_v63 = vld [vmem:[#allocation109_spill] sm:$0xff]  ;;  %v589_v2 = vmul.f32 %v584_v47, %v515_v29 }
 0x2ab   :  { %v3205_v17 = vpop.eup %3204  ;;  %v1309_v30 = vsub.f32 %v5871_v63, %v1284_v33  ;;  %v1696_v46 = vadd.f32 1.0, %v3203_v52  ;;  %v1242_v58 = vmul.f32 1.442695, %v1235_v59  ;;  %v1432_v9 = vmul.f32 %v4623_v12, %v5873_v39 }
 0x2ac   :  { %3222 = vpow2.f32 %v2060_v23  ;;  %v2078_v18 = vpop.permute.xlu1 %2077  ;;  %v3207_v55 = vpop.eup %3206  ;;  %v1553_v1 = vmul.f32 %v1548_v40, %v1479_v41  ;;  %v2025_v32 = vmul.f32 %v5855_v56, %v5102_v16  ;;  %v658_v4 = vadd.f32 1.0, %v3195_v19  ;;  %v5875_v23 = vld [vmem:[#allocation132_spill] sm:$0xff]  ;;  %v5877_v19 = vld [vmem:[#allocation73_spill] sm:$0xff] }
 0x2ad   :  { %3224 = vpow2.f32 %v1020_v6  ;;  %v3209_v45 = vpop.eup %3208  ;;  %v5874_v6 = vld [vmem:[#allocation98_spill] sm:$0xff]  ;;  %v1770_v25 = vadd.f32 1.0, %v3207_v55  ;;  %v1316_v40 = vmul.f32 1.442695, %v1309_v30  ;;  %v1457_v52 = vsub.f32 %v5875_v23, %v1432_v9 }
 0x2ae   :  { %2472 = vperm.xlu1 %3005, %v5872_v10   ;;  %v3211_v13 = vpop.eup %3210  ;;  %3226 = vpow2.f32 %v1094_v3  ;;  %v1383_v37 = vsub.f32 %v5874_v6, %v1358_v51  ;;  %v1627_v15 = vmul.f32 %v1622_v35, %v1553_v1  ;;  %v5876_v3 = vld [vmem:[#allocation138_spill] sm:$0xff]  ;;  %v1844_v26 = vadd.f32 1.0, %v3209_v45  ;;  %v5878_v35 = vld [vmem:[#allocation68_spill] sm:$0xff] }
 0x2af   :  { %v3213_v28 = vpop.eup %3212  ;;  %3228 = vpow2.f32 %v1168_v5  ;;  %v1506_v44 = vmul.f32 %v4668_v11, %v5876_v3  ;;  %v2136_v33 = vadd.f32 1.0, %v3211_v13  ;;  %v663_v51 = vmul.f32 %v658_v4, %v589_v2  ;;  %v5881_v2 = vld [vmem:[#allocation24_spill] sm:$0xff] }
 0x2b0   :  { %v5153_v29 = vpop.permute.xlu1 %2081  ;;  %v1701_v59 = vmul.f32 %v1696_v46, %v1627_v15  ;;  %v732_v41 = vadd.f32 1.0, %v3199_v53  ;;  %3230 = vpow2.f32 %v1242_v58  ;;  %v2050_v55 = vsub.f32 %v5878_v35, %v2025_v32  ;;  %v5879_v46 = vld [vmem:[#allocation117_spill] sm:$0xff]  ;;  %v5882_v58 = vld [vmem:[#allocation87_spill] sm:$0xff] }
 0x2b1   :  { %v3215_v47 = vpop.eup %3214  ;;  %v1390_v5 = vmul.f32 1.442695, %v1383_v37  ;;  %v1918_v30 = vadd.f32 1.0, %v3213_v28  ;;  %v806_v11 = vadd.f32 1.0, %v3205_v17  ;;  %3232 = vpow2.f32 %v1316_v40  ;;  %v5885_v40 = vld [vmem:[#allocation156_spill] sm:$0xff] }
 0x2b2   :  { %v3217_v12 = vpop.eup %3216  ;;  %v2062_v16 = vadd.f32 1.0, %v3215_v47  ;;  %2480 = vperm.xlu1 %3005, %v5877_v19   ;;  %v1775_v63 = vmul.f32 %v1770_v25, %v1701_v59  ;;  %v1464_v45 = vmul.f32 1.442695, %v1457_v52  ;;  %v1531_v13 = vsub.f32 %v5879_v46, %v1506_v44  ;;  %v5884_v25 = vld [vmem:[#allocation15_spill] sm:$0xff]  ;;  %v5886_v52 = vld [vmem:[#allocation37_spill] sm:$0xff] }
 0x2b3   :  { %v3219_v21 = vpop.eup %3218  ;;  %v5880_v53 = vmov 29   ;;  %v5883_v32 = vsub.f32 %v5881_v2, %v5882_v58  ;;  %v737_v28 = vmul.f32 %v732_v41, %v663_v51  ;;  %v880_v37 = vadd.f32 1.0, %v3217_v12  ;;  %v5888_v51 = vld [vmem:[#allocation168_spill] sm:$0xff]  ;;  %v5891_v46 = vld [vmem:[#allocation11_spill] sm:$0xff] }
 0x2b4   :  { %v2067_v1 = vmul.f32 %v2062_v16, %v5030_v54  ;;  %v5161_v39 = vpop.permute.xlu1 %2089  ;;  %v1849_v9 = vmul.f32 %v1844_v26, %v1775_v63  ;;  %v1992_v6 = vadd.f32 1.0, %v3219_v21  ;;  %v2058_v54 = vmul.f32 1.442695, %v2050_v55  ;;  %v3221_v17 = vpop.eup %3220  ;;  %v5889_v63 = vld [vmem:[#allocation135_spill] sm:$0xff] }
 0x2b5   :  { %v2202_v4 = vmul.f32 1.442695, %v5883_v32  ;;  %v2097_v47 = vmul.f32 %v5884_v25, %v2078_v18  ;;  %3234 = vpow2.f32 %v1390_v5  ;;  %v1580_v23 = vmul.f32 %v4672_v22, %v5885_v40 }
 0x2b6   :  { %v5164_v15 = vmul.f32 %v2136_v33, %v2067_v1  ;;  %3007 = vset.pattern.permute.xlu1 %v5880_v53  ;;  %v1654_v3 = vmul.f32 %v4714_v24, %v5886_v52  ;;  %v1923_v44 = vmul.f32 %v1918_v30, %v1849_v9  ;;  %3236 = vpow2.f32 %v1464_v45  ;;  %v5887_v33 = vld [vmem:[#allocation91_spill] sm:$0xff]  ;;  %v5890_v1 = vld [vmem:[#allocation38_spill] sm:$0xff] }
 0x2b7   :  { %2521 = vperm.xlu1 %3007, %v4826_v61   ;;  %v1538_v16 = vmul.f32 1.442695, %v1531_v13  ;;  %v2099_v12 = vmul.f32 %v5884_v25, %v5887_v33  ;;  %v1605_v61 = vsub.f32 %v5888_v51, %v1580_v23  ;;  %3238 = vpow2.f32 %v2202_v4  ;;  %v5894_v52 = vld [vmem:[#allocation63_spill] sm:$0xff] }
 0x2b8   :  { %v2107_v59 = vpop.permute.xlu1 %2106  ;;  %v1997_v41 = vmul.f32 %v1992_v6, %v1923_v44  ;;  %v811_v55 = vmul.f32 %v806_v11, %v737_v28  ;;  %v954_v22 = vadd.f32 1.0, %v3221_v17  ;;  %3240 = vpow2.f32 %v2058_v54 }
 0x2b9   :  { %v3223_v26 = vpop.eup %3222  ;;  %v2122_v21 = vsub.f32 %v2107_v59, %v2097_v47  ;;  %v1679_v30 = vsub.f32 %v5889_v63, %v1654_v3  ;;  %v1728_v45 = vmul.f32 %v4718_v20, %v5890_v1  ;;  %v1802_v13 = vmul.f32 %v4794_v60, %v5891_v46  ;;  %v5893_v60 = vld [vmem:[#allocation166_spill] sm:$0xff]  ;;  %v5895_v3 = vld [vmem:[#allocation120_spill] sm:$0xff] }
 0x2ba   :  { %v3225_v18 = vpop.eup %3224  ;;  %v2066_v35 = vadd.f32 1.0, %v3223_v26  ;;  %v885_v2 = vmul.f32 %v880_v37, %v811_v55  ;;  %v1612_v4 = vmul.f32 1.442695, %v1605_v61  ;;  %v1876_v37 = vmul.f32 %v4734_v27, %v5894_v52 }
 0x2bb   :  { %v2128_v5 = vmul.f32 1.442695, %v2122_v21  ;;  %2525 = vperm.xlu1 %3007, %v4854_v42   ;;  %v3227_v24 = vpop.eup %3226  ;;  %v1028_v58 = vadd.f32 1.0, %v3225_v18  ;;  %v5892_v42 = vld [vmem:[#allocation52_spill] sm:$0xff]  ;;  %v1686_v40 = vmul.f32 1.442695, %v1679_v30  ;;  %v1827_v23 = vsub.f32 %v5893_v60, %v1802_v13 }
 0x2bc   :  { %v5185_v9 = vmul.f32 %v2066_v35, %v1997_v41  ;;  %v2115_v6 = vpop.permute.xlu1 %2114  ;;  %v3229_v32 = vpop.eup %3228  ;;  %v1753_v28 = vsub.f32 %v5892_v42, %v1728_v45  ;;  %v959_v54 = vmul.f32 %v954_v22, %v885_v2  ;;  %v1102_v47 = vadd.f32 1.0, %v3227_v24  ;;  %v5896_v21 = vld [vmem:[#allocation56_spill] sm:$0xff]  ;;  %v5898_v35 = vld [vmem:[#allocation61_spill] sm:$0xff]  ;;  %v5899_v13 = vld [vmem:[#allocation83_spill] sm:$0xff] }
 0x2bd   :  { %3242 = vpow2.f32 %v2128_v5  ;;  %v2124_v11 = vsub.f32 %v2115_v6, %v2099_v12  ;;  %v3231_v20 = vpop.eup %3230  ;;  %v1950_v44 = vmul.f32 %v5826_v49, %v5895_v3  ;;  %v1176_v26 = vadd.f32 1.0, %v3229_v32  ;;  %v3376_v22 = vld [vmem:[%s5395_s4 + $0x8] sm:$0xff]  ;;  %v5212_v32 = vld [vmem:[%s5396_s5 + $0x18] sm:$0xff] }
 0x2be   :  { %3244 = vpow2.f32 %v1538_v16  ;;  %v1033_v59 = vmul.f32 %v1028_v58, %v959_v54  ;;  %v3233_v33 = vpop.eup %3232  ;;  %v1760_v12 = vmul.f32 1.442695, %v1753_v28  ;;  %v1901_v18 = vsub.f32 %v5896_v21, %v1876_v37  ;;  %v5903_v37 = vld [vmem:[#allocation97_spill] sm:$0xff] }
 0x2bf   :  { %v2132_v17 = vmul.f32 1.442695, %v2124_v11  ;;  %2550 = vperm.xlu1 %3007, %v4889_v7   ;;  %v1250_v51 = vadd.f32 1.0, %v3231_v20  ;;  %v2098_v61 = vmul.f32 %v5884_v25, %v5153_v29  ;;  %v5897_v41 = vmov 30  }
 0x2c0   :  { %v1107_v7 = vmul.f32 %v1102_v47, %v1033_v59  ;;  %v1834_v27 = vmul.f32 1.442695, %v1827_v23  ;;  %v1975_v49 = vsub.f32 %v5898_v35, %v1950_v44  ;;  %v2024_v55 = vmul.f32 %v5855_v56, %v5087_v14  ;;  %v5904_v59 = vld [vmem:[#allocation113_spill] sm:$0xff] }
 0x2c1   :  { %3246 = vpow2.f32 %v2132_v17  ;;  %v2148_v16 = vpop.permute.xlu1 %2147  ;;  %v1324_v1 = vadd.f32 1.0, %v3233_v33  ;;  %v1908_v29 = vmul.f32 1.442695, %v1901_v18  ;;  %v2123_v6 = vsub.f32 %v5899_v13, %v2098_v61 }
 0x2c2   :  { %3248 = vpow2.f32 %v1612_v4  ;;  %v3235_v5 = vpop.eup %3234  ;;  %v1181_v24 = vmul.f32 %v1176_v26, %v1107_v7  ;;  %v2049_v45 = vsub.f32 %v5127_v50, %v2024_v55  ;;  %v1982_v14 = vmul.f32 1.442695, %v1975_v49  ;;  %v5900_v4 = vld [vmem:[#allocation76_spill] sm:$0xff] }
 0x2c3   :  { %3009 = vset.pattern.permute.xlu1 %v5897_v41  ;;  %3250 = vpow2.f32 %v1686_v40  ;;  %v3237_v30 = vpop.eup %3236  ;;  %v2100_v56 = vmul.f32 %v5884_v25, %v5161_v39  ;;  %v1398_v11 = vadd.f32 1.0, %v3235_v5  ;;  %v5901_v42 = vsub.f32 %v5017_v57, %v5900_v4  ;;  %v5902_v39 = vld [vmem:[#allocation17_spill] sm:$0xff] }
 0x2c4   :  { %2595 = vperm.xlu1 %3009, %v3376_v22   ;;  %3252 = vpow2.f32 %v1760_v12  ;;  %v3239_v46 = vpop.eup %3238  ;;  %v1255_v58 = vmul.f32 %v1250_v51, %v1181_v24  ;;  %v2056_v17 = vmul.f32 1.442695, %v2049_v45  ;;  %v2130_v60 = vmul.f32 1.442695, %v2123_v6 }
 0x2c5   :  { %v2156_v63 = vpop.permute.xlu1 %2155  ;;  %v3241_v2 = vpop.eup %3240  ;;  %3254 = vpow2.f32 %v1834_v27  ;;  %v2274_v28 = vmul.f32 1.442695, %v5901_v42  ;;  %v2211_v52 = vadd.f32 1.0, %v3239_v46  ;;  %v2125_v3 = vsub.f32 %v5903_v37, %v2100_v56  ;;  %v5905_v46 = vld [vmem:[#allocation19_spill] sm:$0xff] }
 0x2c6   :  { %v1329_v47 = vmul.f32 %v1324_v1, %v1255_v58  ;;  %3256 = vpow2.f32 %v1908_v29  ;;  %v2065_v40 = vadd.f32 1.0, %v3241_v2  ;;  %v2170_v44 = vmul.f32 %v5902_v39, %v2148_v16 }
 0x2c7   :  { %3258 = vpow2.f32 %v1982_v14  ;;  %v1472_v33 = vadd.f32 1.0, %v3237_v30  ;;  %v2134_v55 = vmul.f32 1.442695, %v2125_v3  ;;  %v2174_v13 = vmul.f32 %v5902_v39, %v5905_v46 }
 0x2c8   :  { %3010 = vset.pattern.permute.xlu1 %v5859_v48  ;;  %v1403_v57 = vmul.f32 %v1398_v11, %v1329_v47  ;;  %3260 = vpow2.f32 %v2274_v28  ;;  %v2070_v35 = vmul.f32 %v2065_v40, %v5125_v38  ;;  %v3378_v38 = vld [vmem:[%s5395_s4 + $0x10] sm:$0xff]  ;;  %v5238_v28 = vld [vmem:[%s5396_s5 + $0x8] sm:$0xff]  ;;  %v5909_v46 = vsub.f32 %v5099_v31, %v5090_v8 }
 0x2c9   :  { %2484 = vperm.xlu1 %3010, %v5212_v32   ;;  %v2160_v50 = vpop.permute.xlu1 %2159  ;;  %3262 = vpow2.f32 %v2056_v17 }
 0x2ca   :  { %v3243_v54 = vpop.eup %3242  ;;  %v2173_v25 = vmul.f32 %v5902_v39, %v2160_v50  ;;  %3264 = vpow2.f32 %v2130_v60  ;;  %v1477_v24 = vmul.f32 %v1472_v33, %v1403_v57 }
 0x2cb   :  { %v3245_v20 = vpop.eup %3244  ;;  %v2137_v23 = vadd.f32 1.0, %v3243_v54 }
 0x2cc   :  { %v2198_v26 = vsub.f32 %v5904_v59, %v2173_v25  ;;  %v1546_v7 = vadd.f32 1.0, %v3245_v20 }
 0x2cd   :  { %v2142_v12 = vmul.f32 %v2137_v23, %v5116_v62  ;;  %3011 = vset.pattern.permute.xlu1 %v5880_v53  ;;  %v2177_v21 = vpop.permute.xlu1 %2176  ;;  %v2172_v62 = vmul.f32 %v5902_v39, %v2156_v63 }
 0x2ce   :  { %v3247_v18 = vpop.eup %3246  ;;  %v2206_v51 = vmul.f32 1.442695, %v2198_v26  ;;  %v2195_v61 = vsub.f32 %v2177_v21, %v2170_v44  ;;  %2554 = vperm.xlu1 %3011, %v5877_v19   ;;  %v1551_v63 = vmul.f32 %v1546_v7, %v1477_v24  ;;  %v5907_v7 = vld [vmem:[#allocation102_spill] sm:$0xff] }
 0x2cf   :  { %v3249_v27 = vpop.eup %3248  ;;  %v5225_v16 = vmul.f32 %v2211_v52, %v2142_v12  ;;  %v2139_v49 = vadd.f32 1.0, %v3247_v18  ;;  %v5906_v52 = vmov 31  }
 0x2d0   :  { %3266 = vpow2.f32 %v2206_v51  ;;  %v2200_v22 = vmul.f32 1.442695, %v2195_v61  ;;  %v3251_v5 = vpop.eup %3250  ;;  %v1620_v29 = vadd.f32 1.0, %v3249_v27 }
 0x2d1   :  { %v2144_v30 = vmul.f32 %v2139_v49, %v2070_v35  ;;  %v2185_v1 = vpop.permute.xlu1 %2184  ;;  %v3253_v6 = vpop.eup %3252  ;;  %v1694_v2 = vadd.f32 1.0, %v3251_v5 }
 0x2d2   :  { %3268 = vpow2.f32 %v2200_v22  ;;  %v2197_v45 = vsub.f32 %v2185_v1, %v2172_v62  ;;  %3012 = vset.pattern.permute.xlu1 %v5897_v41  ;;  %v3255_v14 = vpop.eup %3254  ;;  %v1625_v11 = vmul.f32 %v1620_v29, %v1551_v63  ;;  %v1768_v50 = vadd.f32 1.0, %v3253_v6  ;;  %v5908_v62 = vld [vmem:[#allocation106_spill] sm:$0xff]  ;;  %v5254_v5 = vpop.permute.xlu0 %2336 }
 0x2d3   :  { %2599 = vperm.xlu1 %3012, %v3378_v38   ;;  %3270 = vpow2.f32 %v2134_v55  ;;  %v3257_v42 = vpop.eup %3256  ;;  %v1842_v47 = vadd.f32 1.0, %v3255_v14 }
 0x2d4   :  { %v2204_v58 = vmul.f32 1.442695, %v2197_v45  ;;  %v1699_v54 = vmul.f32 %v1694_v2, %v1625_v11  ;;  %v3259_v39 = vpop.eup %3258  ;;  %v1916_v40 = vadd.f32 1.0, %v3257_v42  ;;  %v5910_v11 = vld [vmem:[#allocation26_spill] sm:$0xff] }
 0x2d5   :  { %v2193_v56 = vpop.permute.xlu1 %2192  ;;  %v3261_v25 = vpop.eup %3260  ;;  %v1990_v44 = vadd.f32 1.0, %v3259_v39 }
 0x2d6   :  { %3272 = vpow2.f32 %v2204_v58  ;;  %v2199_v4 = vsub.f32 %v2193_v56, %v2174_v13  ;;  %v1773_v20 = vmul.f32 %v1768_v50, %v1699_v54  ;;  %v3263_v23 = vpop.eup %3262  ;;  %v2284_v18 = vadd.f32 1.0, %v3261_v25  ;;  %v3381_v56 = vld [vmem:[%s5395_s4 + $0x20] sm:$0xff]  ;;  %v5271_v54 = vpop.permute.xlu0 %2369 }
 0x2d7   :  { %2624 = vperm.xlu1 %3012, %v5238_v28   ;;  %v3265_v37 = vpop.eup %3264  ;;  %v2064_v57 = vadd.f32 1.0, %v3263_v23  ;;  %v2350_v13 = vmul.f32 1.442695, %v5909_v46  ;;  %v2247_v50 = vmul.f32 %v5907_v7, %v5910_v11 }
 0x2d8   :  { %v2208_v17 = vmul.f32 1.442695, %v2199_v4  ;;  %v1847_v3 = vmul.f32 %v1842_v47, %v1773_v20  ;;  %v2138_v27 = vadd.f32 1.0, %v3265_v37  ;;  %v3382_v20 = vld [vmem:[%s5395_s4 + $0x18] sm:$0xff] }
 0x2da   :  { %3274 = vpow2.f32 %v2208_v17  ;;  %v2226_v60 = vpop.permute.xlu1 %2225  ;;  %v1921_v26 = vmul.f32 %v1916_v40, %v1847_v3 }
 0x2db   :  { %3014 = vset.pattern.permute.xlu1 %v5906_v52  ;;  %v2245_v58 = vmul.f32 %v5907_v7, %v2226_v60  ;;  %v5278_v60 = vpop.permute.xlu0 %2381 }
 0x2dc   :  { %2665 = vperm.xlu1 %3014, %v4921_v34   ;;  %v1995_v61 = vmul.f32 %v1990_v44, %v1921_v26  ;;  %v5251_v34 = vld [vmem:[%s5396_s5 + $0x20] sm:$0xff] }
 0x2dd   :  { %v3267_v59 = vpop.eup %3266 }
 0x2de   :  { %v2213_v33 = vadd.f32 1.0, %v3267_v59  ;;  %v2230_v12 = vpop.permute.xlu1 %2229  ;;  %v2069_v24 = vmul.f32 %v2064_v57, %v1995_v61 }
 0x2df   :  { %v3269_v21 = vpop.eup %3268  ;;  %v2246_v51 = vmul.f32 %v5907_v7, %v2230_v12  ;;  %v5282_v44 = vpop.permute.xlu0 %2398 }
 0x2e0   :  { %v2210_v35 = vadd.f32 1.0, %v3269_v21  ;;  %3015 = vset.pattern.permute.xlu1 %v5859_v48  ;;  %v5245_v49 = vmul.f32 %v2213_v33, %v2144_v30  ;;  %v3271_v55 = vpop.eup %3270  ;;  %v2143_v63 = vmul.f32 %v2138_v27, %v2069_v24 }
 0x2e1   :  { %v2271_v22 = vsub.f32 %v5908_v62, %v2246_v51  ;;  %2488 = vperm.xlu1 %3015, %v5251_v34   ;;  %v2140_v6 = vadd.f32 1.0, %v3271_v55 }
 0x2e2   :  { %v2215_v1 = vmul.f32 %v2210_v35, %v5164_v15  ;;  %v2238_v29 = vpop.permute.xlu1 %2237 }
 0x2e3   :  { %v3273_v45 = vpop.eup %3272  ;;  %v2278_v48 = vmul.f32 1.442695, %v2271_v22  ;;  %v2248_v30 = vmul.f32 %v5907_v7, %v2238_v29  ;;  %v2145_v47 = vmul.f32 %v2140_v6, %v5185_v9  ;;  %v2407_v61 = vpop.permute.xlu0 %2406 }
 0x2e4   :  { %v5261_v38 = vmul.f32 %v2284_v18, %v2215_v1  ;;  %v2212_v2 = vadd.f32 1.0, %v3273_v45 }
 0x2e5   :  { %3276 = vpow2.f32 %v2278_v48  ;;  %v2273_v14 = vsub.f32 %v5055_v36, %v2248_v30  ;;  %3016 = vset.pattern.permute.xlu1 %v5880_v53 }
 0x2e6   :  { %v2217_v15 = vmul.f32 %v2212_v2, %v2143_v63  ;;  %2533 = vperm.xlu1 %3016, %v3381_v56   ;;  %v2255_v8 = vpop.permute.xlu1 %2254  ;;  %3278 = vpow2.f32 %v2350_v13 }
 0x2e7   :  { %v3275_v31 = vpop.eup %3274  ;;  %v2282_v4 = vmul.f32 1.442695, %v2273_v14  ;;  %v2270_v42 = vsub.f32 %v2255_v8, %v2245_v58  ;;  %v5911_v14 = vld [vmem:[#allocation152_spill] sm:$0xff] }
 0x2e8   :  { %v2214_v36 = vadd.f32 1.0, %v3275_v31 }
 0x2e9   :  { %3280 = vpow2.f32 %v2282_v4  ;;  %v2276_v53 = vmul.f32 1.442695, %v2270_v42 }
 0x2ea   :  { %v2219_v17 = vmul.f32 %v2214_v36, %v2145_v47  ;;  %3017 = vset.pattern.permute.xlu1 %v5897_v41  ;;  %v2263_v39 = vpop.permute.xlu1 %2262 }
 0x2eb   :  { %3282 = vpow2.f32 %v2276_v53  ;;  %v2272_v25 = vsub.f32 %v2263_v39, %v2247_v50  ;;  %2603 = vperm.xlu1 %3017, %v3382_v20  }
 0x2ed   :  { %v2280_v40 = vmul.f32 1.442695, %v2272_v25 }
 0x2ef   :  { %3284 = vpow2.f32 %v2280_v40  ;;  %2628 = vperm.xlu1 %3017, %v5877_v19   ;;  %v2296_v9 = vpop.permute.xlu1 %2295 }
 0x2f0   :  { %v2318_v27 = vmul.f32 %v5072_v0, %v2296_v9 }
 0x2f2   :  { %v3277_v23 = vpop.eup %3276 }
 0x2f3   :  { %v2286_v37 = vadd.f32 1.0, %v3277_v23  ;;  %3018 = vset.pattern.permute.xlu1 %v5906_v52  ;;  %v2304_v3 = vpop.permute.xlu1 %2303  ;;  %v3279_v59 = vpop.eup %3278 }
 0x2f4   :  { %2694 = vperm.xlu1 %3018, %v5872_v10   ;;  %v2359_v7 = vadd.f32 1.0, %v3279_v59  ;;  %v2320_v29 = vmul.f32 %v5072_v0, %v2304_v3 }
 0x2f5   :  { %v5285_v26 = vmul.f32 %v2286_v37, %v2217_v15  ;;  %v5912_v15 = vld [vmem:[#allocation57_spill] sm:$0xff] }
 0x2f6   :  { %v3281_v57 = vpop.eup %3280 }
 0x2f7   :  { %v2288_v33 = vadd.f32 1.0, %v3281_v57  ;;  %v2308_v12 = vpop.permute.xlu1 %2307 }
 0x2f8   :  { %v3283_v21 = vpop.eup %3282  ;;  %v2321_v18 = vmul.f32 %v5072_v0, %v2308_v12  ;;  %2698 = vperm.xlu1 %3018, %v5238_v28  }
 0x2f9   :  { %v2285_v19 = vadd.f32 1.0, %v3283_v21  ;;  %v5289_v51 = vmul.f32 %v2288_v33, %v2219_v17 }
 0x2fa   :  { %v2346_v10 = vsub.f32 %v5254_v5, %v2321_v18  ;;  %v2415_v5 = vpop.permute.xlu0 %2414 }
 0x2fb   :  { %v2290_v35 = vmul.f32 %v2285_v19, %v5225_v16  ;;  %v2325_v55 = vpop.permute.xlu1 %2324  ;;  %v2322_v16 = vmul.f32 %v5072_v0, %v5083_v43  ;;  %v5913_v19 = vld [vmem:[#allocation163_spill] sm:$0xff] }
 0x2fc   :  { %v3285_v62 = vpop.eup %3284  ;;  %v2354_v22 = vmul.f32 1.442695, %v2346_v10  ;;  %v2343_v24 = vsub.f32 %v2325_v55, %v2318_v27  ;;  %3020 = vset.pattern.permute.xlu1 %v5897_v41 }
 0x2fd   :  { %v5295_v1 = vmul.f32 %v2359_v7, %v2290_v35  ;;  %v2287_v28 = vadd.f32 1.0, %v3285_v62  ;;  %2607 = vperm.xlu1 %3020, %v3381_v56   ;;  %v2391_v56 = vrot.slane %v5912_v15, %v5911_v14  ;;  %v5327_v7 = vrot.slane %v5912_v15, %v5913_v19 }
 0x2fe   :  { %3286 = vpow2.f32 %v2354_v22  ;;  %v2348_v45 = vmul.f32 1.442695, %v2343_v24  ;;  %v5303_v2 = vpop.permute.xlu0 %2447 }
 0x2ff   :  { %v2292_v48 = vmul.f32 %v2287_v28, %v5245_v49  ;;  %v2333_v30 = vpop.permute.xlu1 %2332  ;;  %v3383_v49 = vld [vmem:[%s5396_s5 + $0x10] sm:$0xff]  ;;  %v2392_v12 = vmul.f32 %v2391_v56, %v5271_v54 }
 0x300   :  { %3288 = vpow2.f32 %v2348_v45  ;;  %v2345_v46 = vsub.f32 %v2333_v30, %v2320_v29 }
 0x301   :  { %2632 = vperm.xlu1 %3020, %v5212_v32  }
 0x302   :  { %v2352_v13 = vmul.f32 1.442695, %v2345_v46  ;;  %v5312_v8 = vpop.permute.xlu0 %2459 }
 0x303   :  { %v2341_v6 = vpop.permute.xlu1 %2340 }
 0x304   :  { %3290 = vpow2.f32 %v2352_v13  ;;  %v2347_v63 = vsub.f32 %v2341_v6, %v2322_v16 }
 0x305   :  { %3021 = vset.pattern.permute.xlu1 %v5906_v52 }
 0x306   :  { %v2356_v58 = vmul.f32 1.442695, %v2347_v63  ;;  %2702 = vperm.xlu1 %3021, %v3383_v49   ;;  %v5319_v25 = vpop.permute.xlu0 %2476 }
 0x308   :  { %3292 = vpow2.f32 %v2356_v58  ;;  %v2374_v0 = vpop.permute.xlu1 %2373 }
 0x309   :  { %v2393_v40 = vmul.f32 %v2391_v56, %v2374_v0 }
 0x30a   :  { %3022 = vset.pattern.permute.xlu1 %v5897_v41  ;;  %v2592_v33 = vpop.permute.xlu0 %2591 }
 0x30b   :  { %v3287_v43 = vpop.eup %3286  ;;  %2636 = vperm.xlu1 %3022, %v5251_v34   ;;  %v2614_v27 = vmul.f32 %v5327_v7, %v2592_v33 }
 0x30c   :  { %v2361_v31 = vadd.f32 1.0, %v3287_v43  ;;  %v2378_v11 = vpop.permute.xlu1 %2377 }
 0x30d   :  { %v3289_v50 = vpop.eup %3288  ;;  %v2394_v4 = vmul.f32 %v2391_v56, %v2378_v11 }
 0x30e   :  { %v2358_v42 = vadd.f32 1.0, %v3289_v50  ;;  %v2366_v47 = vmul.f32 %v2361_v31, %v2292_v48  ;;  %v2621_v35 = vpop.permute.xlu0 %2620 }
 0x30f   :  { %v2419_v36 = vsub.f32 %v2407_v61, %v2394_v4  ;;  %3023 = vset.pattern.permute.xlu1 %v5906_v52  ;;  %v2395_v52 = vmul.f32 %v2391_v56, %v5278_v60  ;;  %v2417_v60 = vsub.f32 %v5282_v44, %v2392_v12  ;;  %v2639_v54 = vsub.f32 %v2621_v35, %v2614_v27 }
 0x310   :  { %v5316_v53 = vmul.f32 %v2358_v42, %v5261_v38  ;;  %2706 = vperm.xlu1 %3023, %v5212_v32   ;;  %v2386_v41 = vpop.permute.xlu1 %2385 }
 0x311   :  { %v3291_v17 = vpop.eup %3290  ;;  %v2426_v39 = vmul.f32 1.442695, %v2419_v36  ;;  %v2396_v34 = vmul.f32 %v2391_v56, %v2386_v41  ;;  %v2422_v62 = vmul.f32 1.442695, %v2417_v60  ;;  %v2644_v29 = vmul.f32 1.442695, %v2639_v54 }
 0x312   :  { %v2360_v20 = vadd.f32 1.0, %v3291_v17 }
 0x313   :  { %3294 = vpow2.f32 %v2426_v39  ;;  %v2421_v9 = vsub.f32 %v2415_v5, %v2396_v34  ;;  %v5914_v5 = vld [vmem:[#allocation150_spill] sm:$0xff] }
 0x314   :  { %v2365_v23 = vmul.f32 %v2360_v20, %v5285_v26  ;;  %v2403_v37 = vpop.permute.xlu1 %2402  ;;  %v5333_v44 = vrot.slane %v5912_v15, %v5914_v5  ;;  %v5915_v20 = vld [vmem:[#allocation159_spill] sm:$0xff] }
 0x315   :  { %v3293_v3 = vpop.eup %3292  ;;  %v2430_v38 = vmul.f32 1.442695, %v2421_v9  ;;  %v2418_v59 = vsub.f32 %v2403_v37, %v2393_v40  ;;  %v5345_v40 = vrot.slane %v5912_v15, %v5915_v20 }
 0x316   :  { %v2362_v57 = vadd.f32 1.0, %v3293_v3  ;;  %v2467_v56 = vmul.f32 %v5333_v44, %v5303_v2 }
 0x317   :  { %3296 = vpow2.f32 %v2430_v38  ;;  %v2424_v32 = vmul.f32 1.442695, %v2418_v59 }
 0x318   :  { %v2367_v21 = vmul.f32 %v2362_v57, %v5289_v51  ;;  %v2411_v18 = vpop.permute.xlu1 %2410  ;;  %v2492_v36 = vsub.f32 %v5319_v25, %v2467_v56 }
 0x319   :  { %3298 = vpow2.f32 %v2424_v32  ;;  %v2420_v26 = vsub.f32 %v2411_v18, %v2395_v52 }
 0x31a   :  { %v2498_v39 = vmul.f32 1.442695, %v2492_v36 }
 0x31b   :  { %v2428_v61 = vmul.f32 1.442695, %v2420_v26 }
 0x31d   :  { %3300 = vpow2.f32 %v2428_v61  ;;  %v2444_v10 = vpop.permute.xlu1 %2443 }
 0x31e   :  { %3302 = vpow2.f32 %v2422_v62  ;;  %v2466_v13 = vmul.f32 %v5333_v44, %v2444_v10 }
 0x31f   :  { %3304 = vpow2.f32 %v2644_v29 }
 0x320   :  { %v3295_v55 = vpop.eup %3294 }
 0x321   :  { %v2434_v22 = vadd.f32 1.0, %v3295_v55  ;;  %v2452_v51 = vpop.permute.xlu1 %2451 }
 0x322   :  { %v2468_v43 = vmul.f32 %v5333_v44, %v2452_v51 }
 0x323   :  { %v2439_v24 = vmul.f32 %v2434_v22, %v2365_v23 }
 0x324   :  { %v3297_v28 = vpop.eup %3296 }
 0x325   :  { %v2436_v45 = vadd.f32 1.0, %v3297_v28  ;;  %v2456_v48 = vpop.permute.xlu1 %2455  ;;  %v2518_v28 = vpop.permute.xlu0 %2517 }
 0x326   :  { %v3299_v30 = vpop.eup %3298 }
 0x327   :  { %v2433_v16 = vadd.f32 1.0, %v3299_v30  ;;  %v5335_v46 = vmul.f32 %v2436_v45, %v2367_v21  ;;  %v2469_v21 = vmul.f32 %v5333_v44, %v2456_v48 }
 0x329   :  { %v2438_v6 = vmul.f32 %v2433_v16, %v5295_v1  ;;  %v2473_v63 = vpop.permute.xlu1 %2472  ;;  %v2547_v30 = vpop.permute.xlu0 %2546 }
 0x32a   :  { %v3301_v58 = vpop.eup %3300  ;;  %v2491_v49 = vsub.f32 %v2473_v63, %v2466_v13 }
 0x32b   :  { %v2435_v0 = vadd.f32 1.0, %v3301_v58  ;;  %v3303_v42 = vpop.eup %3302 }
 0x32c   :  { %v2496_v14 = vmul.f32 1.442695, %v2491_v49  ;;  %v2432_v41 = vadd.f32 1.0, %v3303_v42  ;;  %v3305_v17 = vpop.eup %3304  ;;  %v5916_v42 = vld [vmem:[#allocation165_spill] sm:$0xff] }
 0x32d   :  { %v2440_v31 = vmul.f32 %v2435_v0, %v2366_v47  ;;  %v2481_v11 = vpop.permute.xlu1 %2480  ;;  %v2654_v47 = vadd.f32 1.0, %v3305_v17  ;;  %v2530_v58 = vpop.permute.xlu0 %2529  ;;  %v2540_v0 = vmul.f32 %v5345_v40, %v2518_v28 }
 0x32e   :  { %3306 = vpow2.f32 %v2496_v14  ;;  %v2493_v50 = vsub.f32 %v2481_v11, %v2468_v43  ;;  %v2437_v2 = vmul.f32 %v2432_v41, %v5316_v53 }
 0x32f   :  { %v2565_v56 = vsub.f32 %v2547_v30, %v2540_v0 }
 0x330   :  { %v2500_v4 = vmul.f32 1.442695, %v2493_v50  ;;  %v2511_v25 = vmul.f32 %v2654_v47, %v2437_v2 }
 0x331   :  { %v2559_v43 = vpop.permute.xlu0 %2558 }
 0x332   :  { %3308 = vpow2.f32 %v2500_v4  ;;  %v2522_v1 = vpop.permute.xlu1 %2521 }
 0x333   :  { %3310 = vpow2.f32 %v2498_v39  ;;  %v2541_v9 = vmul.f32 %v5345_v40, %v2522_v1  ;;  %v2570_v1 = vmul.f32 1.442695, %v2565_v56 }
 0x335   :  { %v2563_v11 = vpop.permute.xlu0 %2562 }
 0x336   :  { %v2526_v34 = vpop.permute.xlu1 %2525 }
 0x337   :  { %v2542_v61 = vmul.f32 %v5345_v40, %v2526_v34 }
 0x339   :  { %v2670_v41 = vpop.permute.xlu0 %2669 }
 0x33a   :  { %v2551_v23 = vpop.permute.xlu1 %2550 }
 0x33b   :  { %v3307_v37 = vpop.eup %3306  ;;  %v2566_v3 = vsub.f32 %v2551_v23, %v2541_v9 }
 0x33c   :  { %v2506_v52 = vadd.f32 1.0, %v3307_v37 }
 0x33d   :  { %v2572_v38 = vmul.f32 1.442695, %v2566_v3  ;;  %v2674_v47 = vpop.permute.xlu0 %2673 }
 0x33e   :  { %v5349_v59 = vmul.f32 %v2511_v25, %v2506_v52 }
 0x33f   :  { %v3309_v57 = vpop.eup %3308  ;;  %3312 = vpow2.f32 %v2572_v38  ;;  %v2596_v32 = vpop.permute.xlu1 %2595  ;;  %v2543_v38 = vmul.f32 %v5345_v40, %v2530_v58 }
 0x340   :  { %v2508_v33 = vadd.f32 1.0, %v3309_v57  ;;  %v3311_v19 = vpop.eup %3310  ;;  %v2615_v50 = vmul.f32 %v5327_v7, %v2596_v32  ;;  %v2470_v32 = vmul.f32 %v5333_v44, %v5312_v8 }
 0x341   :  { %v2507_v60 = vadd.f32 1.0, %v3311_v19  ;;  %v2678_v25 = vpop.permute.xlu0 %2677 }
 0x342   :  { %v2513_v12 = vmul.f32 %v2508_v33, %v2439_v24 }
 0x343   :  { %v2512_v62 = vmul.f32 %v2507_v60, %v2438_v6 }
 0x344   :  { %v2485_v53 = vpop.permute.xlu1 %2484 }
 0x345   :  { %v2494_v18 = vsub.f32 %v2485_v53, %v2469_v21 }
 0x347   :  { %v2502_v26 = vmul.f32 1.442695, %v2494_v18  ;;  %v2568_v18 = vsub.f32 %v2559_v43, %v2543_v38 }
 0x349   :  { %3314 = vpow2.f32 %v2502_v26  ;;  %v2555_v27 = vpop.permute.xlu1 %2554  ;;  %v2682_v26 = vpop.permute.xlu0 %2681 }
 0x34a   :  { %v2567_v10 = vsub.f32 %v2555_v27, %v2542_v61 }
 0x34c   :  { %v3313_v35 = vpop.eup %3312  ;;  %v2574_v55 = vmul.f32 1.442695, %v2567_v10 }
 0x34d   :  { %v2581_v54 = vadd.f32 1.0, %v3313_v35 }
 0x34e   :  { %3316 = vpow2.f32 %v2574_v55  ;;  %v2600_v22 = vpop.permute.xlu1 %2599 }
 0x34f   :  { %v5353_v51 = vmul.f32 %v2581_v54, %v2512_v62  ;;  %3318 = vpow2.f32 %v2570_v1 }
 0x352   :  { %v2625_v24 = vpop.permute.xlu1 %2624 }
 0x353   :  { %v2640_v4 = vsub.f32 %v2625_v24, %v2615_v50 }
 0x355   :  { %v2646_v17 = vmul.f32 1.442695, %v2640_v4 }
 0x356   :  { %v3315_v29 = vpop.eup %3314 }
 0x357   :  { %v2509_v45 = vadd.f32 1.0, %v3315_v29  ;;  %v2666_v48 = vpop.permute.xlu1 %2665  ;;  %3320 = vpow2.f32 %v2646_v17 }
 0x359   :  { %v5355_v5 = vmul.f32 %v2509_v45, %v2440_v31  ;;  %v5363_v31 = vrot.slane %v5912_v15, %v5916_v42  ;;  %v2616_v15 = vmul.f32 %v5327_v7, %v2600_v22  ;;  %v2576_v22 = vmul.f32 1.442695, %v2568_v18 }
 0x35b   :  { %v3317_v16 = vpop.eup %3316  ;;  %v2688_v39 = vmul.f32 %v5363_v31, %v2666_v48  ;;  %v2689_v20 = vmul.f32 %v5363_v31, %v2670_v41  ;;  %v2690_v55 = vmul.f32 %v5363_v31, %v2674_v47  ;;  %v2692_v8 = vmul.f32 %v5363_v31, %v2682_v26  ;;  %v2711_v48 = vpop.permute.xlu0 %2710 }
 0x35c   :  { %v2582_v13 = vadd.f32 1.0, %v3317_v16  ;;  %v2489_v63 = vpop.permute.xlu1 %2488  ;;  %v2691_v50 = vmul.f32 %v5363_v31, %v2678_v25 }
 0x35d   :  { %v2495_v21 = vsub.f32 %v2489_v63, %v2470_v32  ;;  %v2717_v43 = vsub.f32 %v2711_v48, %v2692_v8 }
 0x35e   :  { %v5357_v49 = vmul.f32 %v2582_v13, %v2513_v12  ;;  %v3319_v12 = vpop.eup %3318 }
 0x35f   :  { %v2580_v10 = vadd.f32 1.0, %v3319_v12  ;;  %v2504_v35 = vmul.f32 1.442695, %v2495_v21  ;;  %v2726_v4 = vmul.f32 1.442695, %v2717_v43 }
 0x361   :  { %v2534_v6 = vpop.permute.xlu1 %2533  ;;  %v2659_v45 = vmul.f32 %v5349_v59, %v2580_v10 }
 0x362   :  { %v2544_v33 = vmul.f32 %v5345_v40, %v2534_v6 }
 0x364   :  { %v2569_v61 = vsub.f32 %v2563_v11, %v2544_v33  ;;  %v3321_v27 = vpop.eup %3320 }
 0x365   :  { %v2655_v40 = vadd.f32 1.0, %v3321_v27 }
 0x366   :  { %v2604_v14 = vpop.permute.xlu1 %2603  ;;  %v2578_v24 = vmul.f32 1.442695, %v2569_v61 }
 0x367   :  { %v2617_v60 = vmul.f32 %v5327_v7, %v2604_v14  ;;  %v2660_v6 = vmul.f32 %v2655_v40, %v5353_v51 }
 0x36a   :  { %v2629_v36 = vpop.permute.xlu1 %2628 }
 0x36b   :  { %v2641_v57 = vsub.f32 %v2629_v36, %v2616_v15 }
 0x36d   :  { %v2648_v19 = vmul.f32 1.442695, %v2641_v57 }
 0x36f   :  { %v2695_v34 = vpop.permute.xlu1 %2694 }
 0x370   :  { %v2713_v2 = vsub.f32 %v2695_v34, %v2688_v39 }
 0x372   :  { %v2718_v9 = vmul.f32 1.442695, %v2713_v2 }
 0x373   :  { %v2699_v23 = vpop.permute.xlu1 %2698 }
 0x374   :  { %3322 = vpow2.f32 %v2718_v9  ;;  %v2714_v37 = vsub.f32 %v2699_v23, %v2689_v20 }
 0x376   :  { %v2720_v3 = vmul.f32 1.442695, %v2714_v37 }
 0x378   :  { %3324 = vpow2.f32 %v2720_v3  ;;  %v2608_v52 = vpop.permute.xlu1 %2607 }
 0x379   :  { %3326 = vpow2.f32 %v2648_v19  ;;  %v2618_v58 = vmul.f32 %v5327_v7, %v2608_v52 }
 0x37a   :  { %3328 = vpow2.f32 %v2504_v35 }
 0x37b   :  { %3330 = vpow2.f32 %v2576_v22 }
 0x37c   :  { %v2633_v53 = vpop.permute.xlu1 %2632  ;;  %3332 = vpow2.f32 %v2578_v24 }
 0x37d   :  { %v2642_v62 = vsub.f32 %v2633_v53, %v2617_v60 }
 0x37f   :  { %v2650_v30 = vmul.f32 1.442695, %v2642_v62  ;;  %v2749_v62 = vstv %s5398_s7 }
 0x381   :  { %v3323_v54 = vpop.eup %3322  ;;  %v2703_v44 = vpop.permute.xlu1 %2702 }
 0x382   :  { %v2728_v28 = vadd.f32 1.0, %v3323_v54  ;;  %v2715_v29 = vsub.f32 %v2703_v44, %v2690_v55 }
 0x384   :  { %v2722_v16 = vmul.f32 1.442695, %v2715_v29  ;;  %v2733_v63 = vmul.f32 %v2728_v28, %v2659_v45 }
 0x385   :  { %v3325_v13 = vpop.eup %3324 }
 0x386   :  { %v2729_v0 = vadd.f32 1.0, %v3325_v13  ;;  %v2637_v14 = vpop.permute.xlu1 %2636  ;;  %3334 = vpow2.f32 %v2722_v16  ;;  %v3327_v7 = vpop.eup %3326 }
 0x387   :  { %v2643_v56 = vsub.f32 %v2637_v14, %v2618_v58  ;;  %3336 = vpow2.f32 %v2650_v30  ;;  %v3329_v1 = vpop.eup %3328  ;;  %v2656_v41 = vadd.f32 1.0, %v3327_v7 }
 0x388   :  { %v2734_v11 = vmul.f32 %v2729_v0, %v2660_v6  ;;  %3338 = vrcp.f32 %v2733_v63  ;;  %v3331_v17 = vpop.eup %3330  ;;  %v2510_v20 = vadd.f32 1.0, %v3329_v1 }
 0x389   :  { %v2652_v59 = vmul.f32 1.442695, %v2643_v56  ;;  %v3333_v39 = vpop.eup %3332  ;;  %v2661_v47 = vmul.f32 %v2656_v41, %v5357_v49  ;;  %v2583_v25 = vadd.f32 1.0, %v3331_v17 }
 0x38a   :  { %3340 = vrcp.f32 %v2734_v11  ;;  %v2584_v23 = vadd.f32 1.0, %v3333_v39  ;;  %v2515_v52 = vmul.f32 %v2510_v20, %v5335_v46 }
 0x38b   :  { %3342 = vpow2.f32 %v2652_v59  ;;  %v2707_v42 = vpop.permute.xlu1 %2706  ;;  %v2588_v21 = vmul.f32 %v2583_v25, %v5355_v5  ;;  %v2751_v5 = vstv %s5397_s6 }
 0x38c   :  { %v2716_v36 = vsub.f32 %v2707_v42, %v2691_v50  ;;  %3344 = vpow2.f32 %v2726_v4  ;;  %v2589_v32 = vmul.f32 %v2584_v23, %v2515_v52 }
 0x38e   :  { %v2724_v51 = vmul.f32 1.442695, %v2716_v36 }
 0x390   :  { %3346 = vpow2.f32 %v2724_v51 }
 0x393   :  { %v3335_v34 = vpop.eup %3334 }
 0x394   :  { %v3337_v2 = vpop.eup %3336  ;;  %v2730_v9 = vadd.f32 1.0, %v3335_v34 }
 0x395   :  { %v3339_v31 = vpop.eup %3338  ;;  %v2657_v33 = vadd.f32 1.0, %v3337_v2 }
 0x396   :  { %v2735_v3 = vmul.f32 %v2730_v9, %v2661_v47 }
 0x397   :  { %v3341_v37 = vpop.eup %3340  ;;  %v2662_v19 = vmul.f32 %v2657_v33, %v2588_v21 }
 0x398   :  { %v3343_v15 = vpop.eup %3342  ;;  %v2743_v38 = vadd.f32 %v3341_v37, %v3339_v31  ;;  %3348 = vrcp.f32 %v2735_v3 }
 0x399   :  { %v2658_v57 = vadd.f32 1.0, %v3343_v15  ;;  %v3345_v12 = vpop.eup %3344 }
 0x39a   :  { %v2732_v49 = vadd.f32 1.0, %v3345_v12 }
 0x39b   :  { %v2663_v53 = vmul.f32 %v2658_v57, %v2589_v32 }
 0x39d   :  { %v3347_v18 = vpop.eup %3346  ;;  %v2737_v61 = vmul.f32 %v2732_v49, %v2663_v53 }
 0x39e   :  { %v2731_v26 = vadd.f32 1.0, %v3347_v18 }
 0x3a0   :  { %v2736_v60 = vmul.f32 %v2731_v26, %v2662_v19 }
 0x3a2   :  { %3350 = vrcp.f32 %v2736_v60 }
 0x3a3   :  { %3352 = vrcp.f32 %v2737_v61 }
 0x3a5   :  { %v3349_v27 = vpop.eup %3348 }
 0x3a6   :  { %v2744_v10 = vadd.f32 %v3349_v27, %v2743_v38 }
 0x3af   :  { %v3351_v46 = vpop.eup %3350 }
 0x3b0   :  { %v2745_v35 = vadd.f32 %v3351_v46, %v2744_v10  ;;  %v3353_v55 = vpop.eup %3352 }
 0x3b2   :  { %v2746_v54 = vadd.f32 %v3353_v55, %v2745_v35 }
 0x3b4   :  { %v2750_v22 = vsub.f32 %v2746_v54, %v2749_v62 }
 0x3b6   :  { %v2752_v8 = vmul.f32 %v2751_v5, %v2750_v22 }
 0x3b8   :  { %3354 = vtanh.f32 %v2752_v8 }
 0x3c5   :  { %v3355_v44 = vpop.eup %3354 }
 0x3c6   :  { %2754 = vst [vmem:[%s5399_s8] sm:$0xff] %v3355_v44 }
 0x3c7   :  { %2759 = vsyncpa [#allocation5], 1 }
 0x3c8   :  { %2760 = vsyncpa [#allocation7], 1 }

</bundles_post_ra>
